<compile_context>
chip_gen: v5e
topology: v5e:2x2
jax: 0.10.0
libtpu: 0.0.40
codegen_flags: <defaults>
</compile_context>

<pallas_src>
import numpy as np
import jax
import jax.numpy as jnp
from jax import lax
from jax.experimental import pallas as pl
from jax.experimental.pallas import tpu as pltpu

_KS = 3          # conv kernel size
_STRIDE = 2
_PAD = 1
_LANES = 128     # output channels padded to 128 lanes -> lane-dense dots/stores


def _round_up(n, m):
    return -(-n // m) * m


def _conv_out(sz):
    # k=3, stride=2, pad=1  ->  floor((sz - 1) / 2) + 1  (correct for odd sz)
    return (sz - 1) // _STRIDE + 1


# --------------------------- stage geometry (static) -------------------------

def _stage_cfgs(h, w, cin, couts):
    """Static per-stage geometry for a chain of conv3x3(s2,p1)+ReLU stages.

    Activation layout inside the kernel (per image): flattened rows x channels,
    with row pitch `pitch` (multiple of 8).  Unpadded input row i lives at
    flattened offset (i + 2) * pitch .. + win; every other slot stays zero and
    doubles as the conv zero border, so all stores are 8-aligned and all
    border reads land on pre-zeroed slots.
    """
    cfgs = []
    for cout in couts:
        ho, wo = _conv_out(h), _conv_out(w)
        pitch = _round_up(w + 2, 8)
        cfgs.append(dict(
            hin=h, win=w, cin=cin, cout=cout, hout=ho, wout=wo,
            pitch=pitch,
            rows_in=(h + 3) * pitch,          # flattened padded-input rows
            m_out=ho * wo, m_pad=_round_up(ho * wo, 8),
            k=_KS * _KS * cin,                # dense contraction size
        ))
        h, w, cin = ho, wo, cout
    return cfgs


# ------------------------------- Pallas kernel -------------------------------

def _make_kernel(cfgs):
    """Whole backbone (len(cfgs) stages) for ONE image, fused in VMEM.

    Ref order: x_ref, (w_s, b_s)*S, out_ref, patch_s*S, act_s*(S-1)
      x_ref   : (rows_in_0, Cin0)   f32  padded input, aligned-pitch layout
      w_s     : (9*Cin_s, 128)      bf16 dense im2col weights (Cout padded)
      b_s     : (1, 128)            f32  bias (zero padded)
      out_ref : (m_pad_last, 128)   f32  lane-dense output slab
      patch_s : (m_pad_s, 9*Cin_s)  f32  VMEM im2col scratch
      act_s   : (rows_in_{s+1}, Cout_s) f32 VMEM padded activation scratch
    """
    num_stages = len(cfgs)

    def kernel(*refs):
        x_ref = refs[0]
        w_refs = [refs[1 + 2 * s] for s in range(num_stages)]
        b_refs = [refs[2 + 2 * s] for s in range(num_stages)]
        out_ref = refs[1 + 2 * num_stages]
        scratch = refs[2 + 2 * num_stages:]
        patch_refs = list(scratch[:num_stages])
        act_refs = list(scratch[num_stages:])       # num_stages - 1 buffers

        src = x_ref
        for s, cfg in enumerate(cfgs):              # statically unrolled
            cin, cout = cfg["cin"], cfg["cout"]
            ho, wo = cfg["hout"], cfg["wout"]
            pitch = cfg["pitch"]
            patch = patch_refs[s]

            # ---- im2col via strided VMEM loads: dense K = 9*cin -------------
            # (no O(M^2) selection matrices, no gather matmuls)
            patch[...] = jnp.zeros_like(patch)      # keep pad rows finite
            for oh in range(ho):
                for kh in range(_KS):
                    # unpadded input row = 2*oh + kh - 1  ->  offset (row+2)*pitch
                    row_base = (2 * oh + kh + 1) * pitch
                    for kw in range(_KS):
                        start = row_base + kw - 1   # always >= pitch - 1 >= 0
                        if wo == 1:
                            tap = src[pl.ds(start, 1), :]
                        else:
                            tap = src[pl.ds(start, wo, _STRIDE), :]
                        t = kh * _KS + kw
                        # within-tile store: lane offset t*cin (cin | 128),
                        # sublane offset oh*wo (wo | 8)
                        patch[pl.ds(oh * wo, wo), pl.ds(t * cin, cin)] = tap

            # ---- one MXU matmul per stage: (m_pad, 9*cin) @ (9*cin, 128) ----
            acc = jnp.dot(patch[...].astype(jnp.bfloat16), w_refs[s][...],
                          preferred_element_type=jnp.float32)
            act = jnp.maximum(acc + b_refs[s][...], 0.0)        # bias + ReLU (f32)

            if s + 1 < num_stages:
                nxt = act_refs[s]
                pitch_n = cfgs[s + 1]["pitch"]
                nxt[...] = jnp.zeros_like(nxt)       # zero border / unused slots
                for oh in range(ho):
                    # aligned store: (oh+2)*pitch_n is a multiple of 8, wo <= 8
                    nxt[pl.ds((oh + 2) * pitch_n, wo), :] = \
                        act[oh * wo:(oh + 1) * wo, 0:cout]
                src = nxt
            else:
                out_ref[...] = act                   # lane-dense (m_pad, 128) f32

    return kernel


# --------------------------- host-side packing (glue) -------------------------

def _pack_input(x_nchw, cfg0):
    """NCHW -> per-image flattened, aligned-pitch, zero-bordered f32 layout."""
    n = x_nchw.shape[0]
    h, w, cin, pitch = cfg0["hin"], cfg0["win"], cfg0["cin"], cfg0["pitch"]
    x = jnp.transpose(x_nchw, (0, 2, 3, 1)).astype(jnp.float32)  # NHWC boundary transpose
    buf = jnp.zeros((n, h + 3, pitch, cin), jnp.float32)
    buf = buf.at[:, 2:2 + h, 0:w, :].set(x)
    return buf.reshape(n, (h + 3) * pitch, cin)


def _pack_weight(w_oihw):
    """(Cout, Cin, 3, 3) -> dense im2col matrix (9*Cin, 128) in bf16."""
    cout, cin = w_oihw.shape[0], w_oihw.shape[1]
    wt = jnp.transpose(jnp.asarray(w_oihw, jnp.float32), (2, 3, 1, 0))  # (kh,kw,cin,cout)
    wt = wt.reshape(_KS * _KS * cin, cout)
    wp = jnp.zeros((_KS * _KS * cin, _LANES), jnp.float32).at[:, :cout].set(wt)
    return wp.astype(jnp.bfloat16)


def _pack_bias(b):
    c = b.shape[0]
    return jnp.zeros((1, _LANES), jnp.float32).at[0, :c].set(
        jnp.asarray(b, jnp.float32))


# ------------------------------- pallas wrapper -------------------------------

def _fused_forward(x_nchw, weights, biases, cfgs):
    """Run len(cfgs) conv3x3(s2,p1)+ReLU stages in ONE pallas_call,
    gridded (parallel) over the batch dimension."""
    n = x_nchw.shape[0]
    xp = _pack_input(x_nchw, cfgs[0])
    m_last = cfgs[-1]["m_pad"]

    inputs = [xp]
    in_specs = [pl.BlockSpec((None, xp.shape[1], xp.shape[2]),
                             lambda i: (i, 0, 0))]
    for wmat, bvec in zip(weights, biases):
        inputs += [wmat, bvec]
        in_specs += [pl.BlockSpec(wmat.shape, lambda i: (0, 0)),
                     pl.BlockSpec(bvec.shape, lambda i: (0, 0))]

    scratch = [pltpu.VMEM((c["m_pad"], c["k"]), jnp.float32) for c in cfgs]
    scratch += [pltpu.VMEM((c["rows_in"], c["cin"]), jnp.float32) for c in cfgs[1:]]

    out = pl.pallas_call(
        _make_kernel(cfgs),
        out_shape=jax.ShapeDtypeStruct((n, m_last, _LANES), jnp.float32),
        grid=(n,),
        in_specs=in_specs,
        out_specs=pl.BlockSpec((None, m_last, _LANES), lambda i: (i, 0, 0)),
        scratch_shapes=scratch,
        compiler_params=pltpu.CompilerParams(
            dimension_semantics=("parallel",),       # both TCs on v7x
            vmem_limit_bytes=32 << 20),
    )(*inputs)

    ho, wo, cout = cfgs[-1]["hout"], cfgs[-1]["wout"], cfgs[-1]["cout"]
    out = out[:, :ho * wo, :cout].reshape(n, ho, wo, cout)
    return jnp.transpose(out, (0, 3, 1, 2))          # NCHW at the API boundary


# -------------------------------- backbone class ------------------------------

class PallasBackbone:
    """Concrete synthetic Backbone: sequential conv3x3-s2(p1) + ReLU stages,
    fused into a single batch-parallel Pallas TPU kernel for forward()."""

    def __init__(self, in_channels, stages_n_channels, key):
        self.in_channels = in_channels
        self.stages_n_channels = list(stages_n_channels)
        self.stages_downsampling = [2 ** (i + 1) for i in range(len(stages_n_channels))]
        self.stages_memory_layout = ["nchw"] * len(stages_n_channels)

        self.params = []
        cin = in_channels
        for cout in stages_n_channels:
            key, k_w, k_b = jax.random.split(key, 3)
            fan_in = cin * _KS * _KS
            w = jax.random.normal(k_w, (cout, cin, _KS, _KS), jnp.float32) / np.sqrt(fan_in)
            b = jax.random.normal(k_b, (cout,), jnp.float32) * 0.01
            self.params.append((w, b))
            cin = cout

        # shape-independent packed constants (bf16 MXU weights, f32 bias)
        self._wpacked = [_pack_weight(w) for w, _ in self.params]
        self._bpacked = [_pack_bias(b) for _, b in self.params]

    def _stage_in_channels(self, stage_idx):
        if stage_idx == 0:
            return self.in_channels
        return self.stages_n_channels[stage_idx - 1]

    def _run(self, x, start, count):
        n, c, h, w = x.shape
        assert c == self._stage_in_channels(start)
        couts = self.stages_n_channels[start:start + count]
        cfgs = _stage_cfgs(h, w, c, couts)
        return _fused_forward(x,
                              self._wpacked[start:start + count],
                              self._bpacked[start:start + count],
                              cfgs)

    def forward_stage(self, stage_idx, x):
        return self._run(x, stage_idx, 1)

    def forward(self, x):
        # Whole backbone as ONE fused Pallas call; activations stay in VMEM.
        return self._run(x, 0, len(self.params))


# ---------------------------------- reference ---------------------------------

def _reference_forward(backbone, x, num_stages=None):
    """bf16-operand / f32-accumulate reference matching the MXU math."""
    if num_stages is None:
        num_stages = len(backbone.params)
    act = x.astype(jnp.bfloat16).astype(jnp.float32)
    y = act
    for w, b in backbone.params[:num_stages]:
        wb = w.astype(jnp.bfloat16).astype(jnp.float32)
        y = lax.conv_general_dilated(
            act, wb, window_strides=(_STRIDE, _STRIDE),
            padding=((_PAD, _PAD), (_PAD, _PAD)),
            dimension_numbers=("NCHW", "OIHW", "NCHW"))
        y = jnp.maximum(y + b[None, :, None, None], 0.0)
        act = y.astype(jnp.bfloat16).astype(jnp.float32)
    return y


# ------------------------------------- main ------------------------------------

if __name__ == "__main__":
    key = jax.random.PRNGKey(0)
    key, kx = jax.random.split(key)

    N, C, H, W = 2, 4, 16, 16
    x = jax.random.normal(kx, (N, C, H, W), jnp.float32)

    backbone = PallasBackbone(in_channels=C, stages_n_channels=(8, 16, 32, 32), key=key)

    # full fused forward (one pallas_call for all 4 stages, grid over batch)
    out = jax.block_until_ready(backbone.forward(x))
    ref = jax.block_until_ready(_reference_forward(backbone, x))
    assert out.shape == (N, 32, 1, 1), out.shape
    max_err = float(np.max(np.abs(np.asarray(out) - np.asarray(ref))))
    assert np.allclose(np.asarray(out), np.asarray(ref), atol=2e-3, rtol=2e-3), max_err

    # single-stage API (Backbone.forward_stage) sanity check
    y0 = jax.block_until_ready(backbone.forward_stage(0, x))
    ref0 = jax.block_until_ready(_reference_forward(backbone, x, num_stages=1))
    assert y0.shape == (N, 8, 8, 8), y0.shape
    assert np.allclose(np.asarray(y0), np.asarray(ref0), atol=2e-3, rtol=2e-3)

    print("KERNEL_OK")
</pallas_src>

<mosaic_0001>
module attributes {stable_mosaic.version = 11 : i64} {
  func.func @kernel(%arg0: i32, %arg1: memref<1x456x4xf32, #tpu.memory_space<vmem>>, %arg2: memref<36x128xbf16, #tpu.memory_space<vmem>>, %arg3: memref<1x128xf32, #tpu.memory_space<vmem>>, %arg4: memref<72x128xbf16, #tpu.memory_space<vmem>>, %arg5: memref<1x128xf32, #tpu.memory_space<vmem>>, %arg6: memref<144x128xbf16, #tpu.memory_space<vmem>>, %arg7: memref<1x128xf32, #tpu.memory_space<vmem>>, %arg8: memref<288x128xbf16, #tpu.memory_space<vmem>>, %arg9: memref<1x128xf32, #tpu.memory_space<vmem>>, %arg10: memref<1x8x128xf32, #tpu.memory_space<vmem>>, %arg11: memref<64x36xf32, #tpu.memory_space<vmem>>, %arg12: memref<16x72xf32, #tpu.memory_space<vmem>>, %arg13: memref<8x144xf32, #tpu.memory_space<vmem>>, %arg14: memref<8x288xf32, #tpu.memory_space<vmem>>, %arg15: memref<176x8xf32, #tpu.memory_space<vmem>>, %arg16: memref<56x16xf32, #tpu.memory_space<vmem>>, %arg17: memref<40x32xf32, #tpu.memory_space<vmem>>) attributes {dimension_semantics = [#tpu.dimension_semantics<parallel>], iteration_bounds = array<i64: 2>, scalar_prefetch = 0 : i64, scratch_operands = 7 : i64, tpu.core_type = #tpu.core_type<tc>, window_params = [{transform_indices = @transform_0, window_bounds = array<i64: 1, 456, 4>}, {pipeline_mode = #tpu.pipeline_mode<synchronous>, transform_indices = @transform_1, window_bounds = array<i64: 36, 128>}, {pipeline_mode = #tpu.pipeline_mode<synchronous>, transform_indices = @transform_2, window_bounds = array<i64: 1, 128>}, {pipeline_mode = #tpu.pipeline_mode<synchronous>, transform_indices = @transform_3, window_bounds = array<i64: 72, 128>}, {pipeline_mode = #tpu.pipeline_mode<synchronous>, transform_indices = @transform_4, window_bounds = array<i64: 1, 128>}, {pipeline_mode = #tpu.pipeline_mode<synchronous>, transform_indices = @transform_5, window_bounds = array<i64: 144, 128>}, {pipeline_mode = #tpu.pipeline_mode<synchronous>, transform_indices = @transform_6, window_bounds = array<i64: 1, 128>}, {pipeline_mode = #tpu.pipeline_mode<synchronous>, transform_indices = @transform_7, window_bounds = array<i64: 288, 128>}, {pipeline_mode = #tpu.pipeline_mode<synchronous>, transform_indices = @transform_8, window_bounds = array<i64: 1, 128>}, {transform_indices = @transform_9, window_bounds = array<i64: 1, 8, 128>}]} {
    %cst = arith.constant 0.000000e+00 : f32
    %0 = vector.broadcast %cst : f32 to vector<64x36xf32>
    %c0 = arith.constant 0 : index
    %c0_0 = arith.constant 0 : index
    %1 = vector.load %arg11[%c0, %c0_0] : memref<64x36xf32, #tpu.memory_space<vmem>>, vector<64x36xf32>
    tpu.vector_store %arg11[%c0, %c0_0], %0 {strides = array<i32>} : memref<64x36xf32, #tpu.memory_space<vmem>>, vector<64x36xf32>,
    %c0_1 = arith.constant 0 : index
    %c23 = arith.constant 23 : index
    %c0_2 = arith.constant 0 : index
    %2 = tpu.strided_load %arg1[%c0_1, %c23, %c0_2] {strides = array<i32: 1, 2, 1>} : memref<1x456x4xf32, #tpu.memory_space<vmem>>, vector<1x8x4xf32>
    %3 = vector.shape_cast %2 : vector<1x8x4xf32> to vector<8x4xf32>
    %c0_3 = arith.constant 0 : index
    %c0_4 = arith.constant 0 : index
    %4 = vector.load %arg11[%c0_3, %c0_4] : memref<64x36xf32, #tpu.memory_space<vmem>>, vector<8x4xf32>
    tpu.vector_store %arg11[%c0_3, %c0_4], %3 {strides = array<i32>} : memref<64x36xf32, #tpu.memory_space<vmem>>, vector<8x4xf32>,
    %c0_5 = arith.constant 0 : index
    %c24 = arith.constant 24 : index
    %c0_6 = arith.constant 0 : index
    %5 = tpu.strided_load %arg1[%c0_5, %c24, %c0_6] {strides = array<i32: 1, 2, 1>} : memref<1x456x4xf32, #tpu.memory_space<vmem>>, vector<1x8x4xf32>
    %6 = vector.shape_cast %5 : vector<1x8x4xf32> to vector<8x4xf32>
    %c0_7 = arith.constant 0 : index
    %c4 = arith.constant 4 : index
    %7 = vector.load %arg11[%c0_7, %c4] : memref<64x36xf32, #tpu.memory_space<vmem>>, vector<8x4xf32>
    tpu.vector_store %arg11[%c0_7, %c4], %6 {strides = array<i32>} : memref<64x36xf32, #tpu.memory_space<vmem>>, vector<8x4xf32>,
    %c0_8 = arith.constant 0 : index
    %c25 = arith.constant 25 : index
    %c0_9 = arith.constant 0 : index
    %8 = tpu.strided_load %arg1[%c0_8, %c25, %c0_9] {strides = array<i32: 1, 2, 1>} : memref<1x456x4xf32, #tpu.memory_space<vmem>>, vector<1x8x4xf32>
    %9 = vector.shape_cast %8 : vector<1x8x4xf32> to vector<8x4xf32>
    %c0_10 = arith.constant 0 : index
    %c8 = arith.constant 8 : index
    %10 = vector.load %arg11[%c0_10, %c8] : memref<64x36xf32, #tpu.memory_space<vmem>>, vector<8x4xf32>
    tpu.vector_store %arg11[%c0_10, %c8], %9 {strides = array<i32>} : memref<64x36xf32, #tpu.memory_space<vmem>>, vector<8x4xf32>,
    %c0_11 = arith.constant 0 : index
    %c47 = arith.constant 47 : index
    %c0_12 = arith.constant 0 : index
    %11 = tpu.strided_load %arg1[%c0_11, %c47, %c0_12] {strides = array<i32: 1, 2, 1>} : memref<1x456x4xf32, #tpu.memory_space<vmem>>, vector<1x8x4xf32>
    %12 = vector.shape_cast %11 : vector<1x8x4xf32> to vector<8x4xf32>
    %c0_13 = arith.constant 0 : index
    %c12 = arith.constant 12 : index
    %13 = vector.load %arg11[%c0_13, %c12] : memref<64x36xf32, #tpu.memory_space<vmem>>, vector<8x4xf32>
    tpu.vector_store %arg11[%c0_13, %c12], %12 {strides = array<i32>} : memref<64x36xf32, #tpu.memory_space<vmem>>, vector<8x4xf32>,
    %c0_14 = arith.constant 0 : index
    %c48 = arith.constant 48 : index
    %c0_15 = arith.constant 0 : index
    %14 = tpu.strided_load %arg1[%c0_14, %c48, %c0_15] {strides = array<i32: 1, 2, 1>} : memref<1x456x4xf32, #tpu.memory_space<vmem>>, vector<1x8x4xf32>
    %15 = vector.shape_cast %14 : vector<1x8x4xf32> to vector<8x4xf32>
    %c0_16 = arith.constant 0 : index
    %c16 = arith.constant 16 : index
    %16 = vector.load %arg11[%c0_16, %c16] : memref<64x36xf32, #tpu.memory_space<vmem>>, vector<8x4xf32>
    tpu.vector_store %arg11[%c0_16, %c16], %15 {strides = array<i32>} : memref<64x36xf32, #tpu.memory_space<vmem>>, vector<8x4xf32>,
    %c0_17 = arith.constant 0 : index
    %c49 = arith.constant 49 : index
    %c0_18 = arith.constant 0 : index
    %17 = tpu.strided_load %arg1[%c0_17, %c49, %c0_18] {strides = array<i32: 1, 2, 1>} : memref<1x456x4xf32, #tpu.memory_space<vmem>>, vector<1x8x4xf32>
    %18 = vector.shape_cast %17 : vector<1x8x4xf32> to vector<8x4xf32>
    %c0_19 = arith.constant 0 : index
    %c20 = arith.constant 20 : index
    %19 = vector.load %arg11[%c0_19, %c20] : memref<64x36xf32, #tpu.memory_space<vmem>>, vector<8x4xf32>
    tpu.vector_store %arg11[%c0_19, %c20], %18 {strides = array<i32>} : memref<64x36xf32, #tpu.memory_space<vmem>>, vector<8x4xf32>,
    %c0_20 = arith.constant 0 : index
    %c71 = arith.constant 71 : index
    %c0_21 = arith.constant 0 : index
    %20 = tpu.strided_load %arg1[%c0_20, %c71, %c0_21] {strides = array<i32: 1, 2, 1>} : memref<1x456x4xf32, #tpu.memory_space<vmem>>, vector<1x8x4xf32>
    %21 = vector.shape_cast %20 : vector<1x8x4xf32> to vector<8x4xf32>
    %c0_22 = arith.constant 0 : index
    %c24_23 = arith.constant 24 : index
    %22 = vector.load %arg11[%c0_22, %c24_23] : memref<64x36xf32, #tpu.memory_space<vmem>>, vector<8x4xf32>
    tpu.vector_store %arg11[%c0_22, %c24_23], %21 {strides = array<i32>} : memref<64x36xf32, #tpu.memory_space<vmem>>, vector<8x4xf32>,
    %c0_24 = arith.constant 0 : index
    %c72 = arith.constant 72 : index
    %c0_25 = arith.constant 0 : index
    %23 = tpu.strided_load %arg1[%c0_24, %c72, %c0_25] {strides = array<i32: 1, 2, 1>} : memref<1x456x4xf32, #tpu.memory_space<vmem>>, vector<1x8x4xf32>
    %24 = vector.shape_cast %23 : vector<1x8x4xf32> to vector<8x4xf32>
    %c0_26 = arith.constant 0 : index
    %c28 = arith.constant 28 : index
    %25 = vector.load %arg11[%c0_26, %c28] : memref<64x36xf32, #tpu.memory_space<vmem>>, vector<8x4xf32>
    tpu.vector_store %arg11[%c0_26, %c28], %24 {strides = array<i32>} : memref<64x36xf32, #tpu.memory_space<vmem>>, vector<8x4xf32>,
    %c0_27 = arith.constant 0 : index
    %c73 = arith.constant 73 : index
    %c0_28 = arith.constant 0 : index
    %26 = tpu.strided_load %arg1[%c0_27, %c73, %c0_28] {strides = array<i32: 1, 2, 1>} : memref<1x456x4xf32, #tpu.memory_space<vmem>>, vector<1x8x4xf32>
    %27 = vector.shape_cast %26 : vector<1x8x4xf32> to vector<8x4xf32>
    %c0_29 = arith.constant 0 : index
    %c32 = arith.constant 32 : index
    %28 = vector.load %arg11[%c0_29, %c32] : memref<64x36xf32, #tpu.memory_space<vmem>>, vector<8x4xf32>
    tpu.vector_store %arg11[%c0_29, %c32], %27 {strides = array<i32>} : memref<64x36xf32, #tpu.memory_space<vmem>>, vector<8x4xf32>,
    %c0_30 = arith.constant 0 : index
    %c71_31 = arith.constant 71 : index
    %c0_32 = arith.constant 0 : index
    %29 = tpu.strided_load %arg1[%c0_30, %c71_31, %c0_32] {strides = array<i32: 1, 2, 1>} : memref<1x456x4xf32, #tpu.memory_space<vmem>>, vector<1x8x4xf32>
    %30 = vector.shape_cast %29 : vector<1x8x4xf32> to vector<8x4xf32>
    %c8_33 = arith.constant 8 : index
    %c0_34 = arith.constant 0 : index
    %31 = vector.load %arg11[%c8_33, %c0_34] : memref<64x36xf32, #tpu.memory_space<vmem>>, vector<8x4xf32>
    tpu.vector_store %arg11[%c8_33, %c0_34], %30 {strides = array<i32>} : memref<64x36xf32, #tpu.memory_space<vmem>>, vector<8x4xf32>,
    %c0_35 = arith.constant 0 : index
    %c72_36 = arith.constant 72 : index
    %c0_37 = arith.constant 0 : index
    %32 = tpu.strided_load %arg1[%c0_35, %c72_36, %c0_37] {strides = array<i32: 1, 2, 1>} : memref<1x456x4xf32, #tpu.memory_space<vmem>>, vector<1x8x4xf32>
    %33 = vector.shape_cast %32 : vector<1x8x4xf32> to vector<8x4xf32>
    %c8_38 = arith.constant 8 : index
    %c4_39 = arith.constant 4 : index
    %34 = vector.load %arg11[%c8_38, %c4_39] : memref<64x36xf32, #tpu.memory_space<vmem>>, vector<8x4xf32>
    tpu.vector_store %arg11[%c8_38, %c4_39], %33 {strides = array<i32>} : memref<64x36xf32, #tpu.memory_space<vmem>>, vector<8x4xf32>,
    %c0_40 = arith.constant 0 : index
    %c73_41 = arith.constant 73 : index
    %c0_42 = arith.constant 0 : index
    %35 = tpu.strided_load %arg1[%c0_40, %c73_41, %c0_42] {strides = array<i32: 1, 2, 1>} : memref<1x456x4xf32, #tpu.memory_space<vmem>>, vector<1x8x4xf32>
    %36 = vector.shape_cast %35 : vector<1x8x4xf32> to vector<8x4xf32>
    %c8_43 = arith.constant 8 : index
    %c8_44 = arith.constant 8 : index
    %37 = vector.load %arg11[%c8_43, %c8_44] : memref<64x36xf32, #tpu.memory_space<vmem>>, vector<8x4xf32>
    tpu.vector_store %arg11[%c8_43, %c8_44], %36 {strides = array<i32>} : memref<64x36xf32, #tpu.memory_space<vmem>>, vector<8x4xf32>,
    %c0_45 = arith.constant 0 : index
    %c95 = arith.constant 95 : index
    %c0_46 = arith.constant 0 : index
    %38 = tpu.strided_load %arg1[%c0_45, %c95, %c0_46] {strides = array<i32: 1, 2, 1>} : memref<1x456x4xf32, #tpu.memory_space<vmem>>, vector<1x8x4xf32>
    %39 = vector.shape_cast %38 : vector<1x8x4xf32> to vector<8x4xf32>
    %c8_47 = arith.constant 8 : index
    %c12_48 = arith.constant 12 : index
    %40 = vector.load %arg11[%c8_47, %c12_48] : memref<64x36xf32, #tpu.memory_space<vmem>>, vector<8x4xf32>
    tpu.vector_store %arg11[%c8_47, %c12_48], %39 {strides = array<i32>} : memref<64x36xf32, #tpu.memory_space<vmem>>, vector<8x4xf32>,
    %c0_49 = arith.constant 0 : index
    %c96 = arith.constant 96 : index
    %c0_50 = arith.constant 0 : index
    %41 = tpu.strided_load %arg1[%c0_49, %c96, %c0_50] {strides = array<i32: 1, 2, 1>} : memref<1x456x4xf32, #tpu.memory_space<vmem>>, vector<1x8x4xf32>
    %42 = vector.shape_cast %41 : vector<1x8x4xf32> to vector<8x4xf32>
    %c8_51 = arith.constant 8 : index
    %c16_52 = arith.constant 16 : index
    %43 = vector.load %arg11[%c8_51, %c16_52] : memref<64x36xf32, #tpu.memory_space<vmem>>, vector<8x4xf32>
    tpu.vector_store %arg11[%c8_51, %c16_52], %42 {strides = array<i32>} : memref<64x36xf32, #tpu.memory_space<vmem>>, vector<8x4xf32>,
    %c0_53 = arith.constant 0 : index
    %c97 = arith.constant 97 : index
    %c0_54 = arith.constant 0 : index
    %44 = tpu.strided_load %arg1[%c0_53, %c97, %c0_54] {strides = array<i32: 1, 2, 1>} : memref<1x456x4xf32, #tpu.memory_space<vmem>>, vector<1x8x4xf32>
    %45 = vector.shape_cast %44 : vector<1x8x4xf32> to vector<8x4xf32>
    %c8_55 = arith.constant 8 : index
    %c20_56 = arith.constant 20 : index
    %46 = vector.load %arg11[%c8_55, %c20_56] : memref<64x36xf32, #tpu.memory_space<vmem>>, vector<8x4xf32>
    tpu.vector_store %arg11[%c8_55, %c20_56], %45 {strides = array<i32>} : memref<64x36xf32, #tpu.memory_space<vmem>>, vector<8x4xf32>,
    %c0_57 = arith.constant 0 : index
    %c119 = arith.constant 119 : index
    %c0_58 = arith.constant 0 : index
    %47 = tpu.strided_load %arg1[%c0_57, %c119, %c0_58] {strides = array<i32: 1, 2, 1>} : memref<1x456x4xf32, #tpu.memory_space<vmem>>, vector<1x8x4xf32>
    %48 = vector.shape_cast %47 : vector<1x8x4xf32> to vector<8x4xf32>
    %c8_59 = arith.constant 8 : index
    %c24_60 = arith.constant 24 : index
    %49 = vector.load %arg11[%c8_59, %c24_60] : memref<64x36xf32, #tpu.memory_space<vmem>>, vector<8x4xf32>
    tpu.vector_store %arg11[%c8_59, %c24_60], %48 {strides = array<i32>} : memref<64x36xf32, #tpu.memory_space<vmem>>, vector<8x4xf32>,
    %c0_61 = arith.constant 0 : index
    %c120 = arith.constant 120 : index
    %c0_62 = arith.constant 0 : index
    %50 = tpu.strided_load %arg1[%c0_61, %c120, %c0_62] {strides = array<i32: 1, 2, 1>} : memref<1x456x4xf32, #tpu.memory_space<vmem>>, vector<1x8x4xf32>
    %51 = vector.shape_cast %50 : vector<1x8x4xf32> to vector<8x4xf32>
    %c8_63 = arith.constant 8 : index
    %c28_64 = arith.constant 28 : index
    %52 = vector.load %arg11[%c8_63, %c28_64] : memref<64x36xf32, #tpu.memory_space<vmem>>, vector<8x4xf32>
    tpu.vector_store %arg11[%c8_63, %c28_64], %51 {strides = array<i32>} : memref<64x36xf32, #tpu.memory_space<vmem>>, vector<8x4xf32>,
    %c0_65 = arith.constant 0 : index
    %c121 = arith.constant 121 : index
    %c0_66 = arith.constant 0 : index
    %53 = tpu.strided_load %arg1[%c0_65, %c121, %c0_66] {strides = array<i32: 1, 2, 1>} : memref<1x456x4xf32, #tpu.memory_space<vmem>>, vector<1x8x4xf32>
    %54 = vector.shape_cast %53 : vector<1x8x4xf32> to vector<8x4xf32>
    %c8_67 = arith.constant 8 : index
    %c32_68 = arith.constant 32 : index
    %55 = vector.load %arg11[%c8_67, %c32_68] : memref<64x36xf32, #tpu.memory_space<vmem>>, vector<8x4xf32>
    tpu.vector_store %arg11[%c8_67, %c32_68], %54 {strides = array<i32>} : memref<64x36xf32, #tpu.memory_space<vmem>>, vector<8x4xf32>,
    %c0_69 = arith.constant 0 : index
    %c119_70 = arith.constant 119 : index
    %c0_71 = arith.constant 0 : index
    %56 = tpu.strided_load %arg1[%c0_69, %c119_70, %c0_71] {strides = array<i32: 1, 2, 1>} : memref<1x456x4xf32, #tpu.memory_space<vmem>>, vector<1x8x4xf32>
    %57 = vector.shape_cast %56 : vector<1x8x4xf32> to vector<8x4xf32>
    %c16_72 = arith.constant 16 : index
    %c0_73 = arith.constant 0 : index
    %58 = vector.load %arg11[%c16_72, %c0_73] : memref<64x36xf32, #tpu.memory_space<vmem>>, vector<8x4xf32>
    tpu.vector_store %arg11[%c16_72, %c0_73], %57 {strides = array<i32>} : memref<64x36xf32, #tpu.memory_space<vmem>>, vector<8x4xf32>,
    %c0_74 = arith.constant 0 : index
    %c120_75 = arith.constant 120 : index
    %c0_76 = arith.constant 0 : index
    %59 = tpu.strided_load %arg1[%c0_74, %c120_75, %c0_76] {strides = array<i32: 1, 2, 1>} : memref<1x456x4xf32, #tpu.memory_space<vmem>>, vector<1x8x4xf32>
    %60 = vector.shape_cast %59 : vector<1x8x4xf32> to vector<8x4xf32>
    %c16_77 = arith.constant 16 : index
    %c4_78 = arith.constant 4 : index
    %61 = vector.load %arg11[%c16_77, %c4_78] : memref<64x36xf32, #tpu.memory_space<vmem>>, vector<8x4xf32>
    tpu.vector_store %arg11[%c16_77, %c4_78], %60 {strides = array<i32>} : memref<64x36xf32, #tpu.memory_space<vmem>>, vector<8x4xf32>,
    %c0_79 = arith.constant 0 : index
    %c121_80 = arith.constant 121 : index
    %c0_81 = arith.constant 0 : index
    %62 = tpu.strided_load %arg1[%c0_79, %c121_80, %c0_81] {strides = array<i32: 1, 2, 1>} : memref<1x456x4xf32, #tpu.memory_space<vmem>>, vector<1x8x4xf32>
    %63 = vector.shape_cast %62 : vector<1x8x4xf32> to vector<8x4xf32>
    %c16_82 = arith.constant 16 : index
    %c8_83 = arith.constant 8 : index
    %64 = vector.load %arg11[%c16_82, %c8_83] : memref<64x36xf32, #tpu.memory_space<vmem>>, vector<8x4xf32>
    tpu.vector_store %arg11[%c16_82, %c8_83], %63 {strides = array<i32>} : memref<64x36xf32, #tpu.memory_space<vmem>>, vector<8x4xf32>,
    %c0_84 = arith.constant 0 : index
    %c143 = arith.constant 143 : index
    %c0_85 = arith.constant 0 : index
    %65 = tpu.strided_load %arg1[%c0_84, %c143, %c0_85] {strides = array<i32: 1, 2, 1>} : memref<1x456x4xf32, #tpu.memory_space<vmem>>, vector<1x8x4xf32>
    %66 = vector.shape_cast %65 : vector<1x8x4xf32> to vector<8x4xf32>
    %c16_86 = arith.constant 16 : index
    %c12_87 = arith.constant 12 : index
    %67 = vector.load %arg11[%c16_86, %c12_87] : memref<64x36xf32, #tpu.memory_space<vmem>>, vector<8x4xf32>
    tpu.vector_store %arg11[%c16_86, %c12_87], %66 {strides = array<i32>} : memref<64x36xf32, #tpu.memory_space<vmem>>, vector<8x4xf32>,
    %c0_88 = arith.constant 0 : index
    %c144 = arith.constant 144 : index
    %c0_89 = arith.constant 0 : index
    %68 = tpu.strided_load %arg1[%c0_88, %c144, %c0_89] {strides = array<i32: 1, 2, 1>} : memref<1x456x4xf32, #tpu.memory_space<vmem>>, vector<1x8x4xf32>
    %69 = vector.shape_cast %68 : vector<1x8x4xf32> to vector<8x4xf32>
    %c16_90 = arith.constant 16 : index
    %c16_91 = arith.constant 16 : index
    %70 = vector.load %arg11[%c16_90, %c16_91] : memref<64x36xf32, #tpu.memory_space<vmem>>, vector<8x4xf32>
    tpu.vector_store %arg11[%c16_90, %c16_91], %69 {strides = array<i32>} : memref<64x36xf32, #tpu.memory_space<vmem>>, vector<8x4xf32>,
    %c0_92 = arith.constant 0 : index
    %c145 = arith.constant 145 : index
    %c0_93 = arith.constant 0 : index
    %71 = tpu.strided_load %arg1[%c0_92, %c145, %c0_93] {strides = array<i32: 1, 2, 1>} : memref<1x456x4xf32, #tpu.memory_space<vmem>>, vector<1x8x4xf32>
    %72 = vector.shape_cast %71 : vector<1x8x4xf32> to vector<8x4xf32>
    %c16_94 = arith.constant 16 : index
    %c20_95 = arith.constant 20 : index
    %73 = vector.load %arg11[%c16_94, %c20_95] : memref<64x36xf32, #tpu.memory_space<vmem>>, vector<8x4xf32>
    tpu.vector_store %arg11[%c16_94, %c20_95], %72 {strides = array<i32>} : memref<64x36xf32, #tpu.memory_space<vmem>>, vector<8x4xf32>,
    %c0_96 = arith.constant 0 : index
    %c167 = arith.constant 167 : index
    %c0_97 = arith.constant 0 : index
    %74 = tpu.strided_load %arg1[%c0_96, %c167, %c0_97] {strides = array<i32: 1, 2, 1>} : memref<1x456x4xf32, #tpu.memory_space<vmem>>, vector<1x8x4xf32>
    %75 = vector.shape_cast %74 : vector<1x8x4xf32> to vector<8x4xf32>
    %c16_98 = arith.constant 16 : index
    %c24_99 = arith.constant 24 : index
    %76 = vector.load %arg11[%c16_98, %c24_99] : memref<64x36xf32, #tpu.memory_space<vmem>>, vector<8x4xf32>
    tpu.vector_store %arg11[%c16_98, %c24_99], %75 {strides = array<i32>} : memref<64x36xf32, #tpu.memory_space<vmem>>, vector<8x4xf32>,
    %c0_100 = arith.constant 0 : index
    %c168 = arith.constant 168 : index
    %c0_101 = arith.constant 0 : index
    %77 = tpu.strided_load %arg1[%c0_100, %c168, %c0_101] {strides = array<i32: 1, 2, 1>} : memref<1x456x4xf32, #tpu.memory_space<vmem>>, vector<1x8x4xf32>
    %78 = vector.shape_cast %77 : vector<1x8x4xf32> to vector<8x4xf32>
    %c16_102 = arith.constant 16 : index
    %c28_103 = arith.constant 28 : index
    %79 = vector.load %arg11[%c16_102, %c28_103] : memref<64x36xf32, #tpu.memory_space<vmem>>, vector<8x4xf32>
    tpu.vector_store %arg11[%c16_102, %c28_103], %78 {strides = array<i32>} : memref<64x36xf32, #tpu.memory_space<vmem>>, vector<8x4xf32>,
    %c0_104 = arith.constant 0 : index
    %c169 = arith.constant 169 : index
    %c0_105 = arith.constant 0 : index
    %80 = tpu.strided_load %arg1[%c0_104, %c169, %c0_105] {strides = array<i32: 1, 2, 1>} : memref<1x456x4xf32, #tpu.memory_space<vmem>>, vector<1x8x4xf32>
    %81 = vector.shape_cast %80 : vector<1x8x4xf32> to vector<8x4xf32>
    %c16_106 = arith.constant 16 : index
    %c32_107 = arith.constant 32 : index
    %82 = vector.load %arg11[%c16_106, %c32_107] : memref<64x36xf32, #tpu.memory_space<vmem>>, vector<8x4xf32>
    tpu.vector_store %arg11[%c16_106, %c32_107], %81 {strides = array<i32>} : memref<64x36xf32, #tpu.memory_space<vmem>>, vector<8x4xf32>,
    %c0_108 = arith.constant 0 : index
    %c167_109 = arith.constant 167 : index
    %c0_110 = arith.constant 0 : index
    %83 = tpu.strided_load %arg1[%c0_108, %c167_109, %c0_110] {strides = array<i32: 1, 2, 1>} : memref<1x456x4xf32, #tpu.memory_space<vmem>>, vector<1x8x4xf32>
    %84 = vector.shape_cast %83 : vector<1x8x4xf32> to vector<8x4xf32>
    %c24_111 = arith.constant 24 : index
    %c0_112 = arith.constant 0 : index
    %85 = vector.load %arg11[%c24_111, %c0_112] : memref<64x36xf32, #tpu.memory_space<vmem>>, vector<8x4xf32>
    tpu.vector_store %arg11[%c24_111, %c0_112], %84 {strides = array<i32>} : memref<64x36xf32, #tpu.memory_space<vmem>>, vector<8x4xf32>,
    %c0_113 = arith.constant 0 : index
    %c168_114 = arith.constant 168 : index
    %c0_115 = arith.constant 0 : index
    %86 = tpu.strided_load %arg1[%c0_113, %c168_114, %c0_115] {strides = array<i32: 1, 2, 1>} : memref<1x456x4xf32, #tpu.memory_space<vmem>>, vector<1x8x4xf32>
    %87 = vector.shape_cast %86 : vector<1x8x4xf32> to vector<8x4xf32>
    %c24_116 = arith.constant 24 : index
    %c4_117 = arith.constant 4 : index
    %88 = vector.load %arg11[%c24_116, %c4_117] : memref<64x36xf32, #tpu.memory_space<vmem>>, vector<8x4xf32>
    tpu.vector_store %arg11[%c24_116, %c4_117], %87 {strides = array<i32>} : memref<64x36xf32, #tpu.memory_space<vmem>>, vector<8x4xf32>,
    %c0_118 = arith.constant 0 : index
    %c169_119 = arith.constant 169 : index
    %c0_120 = arith.constant 0 : index
    %89 = tpu.strided_load %arg1[%c0_118, %c169_119, %c0_120] {strides = array<i32: 1, 2, 1>} : memref<1x456x4xf32, #tpu.memory_space<vmem>>, vector<1x8x4xf32>
    %90 = vector.shape_cast %89 : vector<1x8x4xf32> to vector<8x4xf32>
    %c24_121 = arith.constant 24 : index
    %c8_122 = arith.constant 8 : index
    %91 = vector.load %arg11[%c24_121, %c8_122] : memref<64x36xf32, #tpu.memory_space<vmem>>, vector<8x4xf32>
    tpu.vector_store %arg11[%c24_121, %c8_122], %90 {strides = array<i32>} : memref<64x36xf32, #tpu.memory_space<vmem>>, vector<8x4xf32>,
    %c0_123 = arith.constant 0 : index
    %c191 = arith.constant 191 : index
    %c0_124 = arith.constant 0 : index
    %92 = tpu.strided_load %arg1[%c0_123, %c191, %c0_124] {strides = array<i32: 1, 2, 1>} : memref<1x456x4xf32, #tpu.memory_space<vmem>>, vector<1x8x4xf32>
    %93 = vector.shape_cast %92 : vector<1x8x4xf32> to vector<8x4xf32>
    %c24_125 = arith.constant 24 : index
    %c12_126 = arith.constant 12 : index
    %94 = vector.load %arg11[%c24_125, %c12_126] : memref<64x36xf32, #tpu.memory_space<vmem>>, vector<8x4xf32>
    tpu.vector_store %arg11[%c24_125, %c12_126], %93 {strides = array<i32>} : memref<64x36xf32, #tpu.memory_space<vmem>>, vector<8x4xf32>,
    %c0_127 = arith.constant 0 : index
    %c192 = arith.constant 192 : index
    %c0_128 = arith.constant 0 : index
    %95 = tpu.strided_load %arg1[%c0_127, %c192, %c0_128] {strides = array<i32: 1, 2, 1>} : memref<1x456x4xf32, #tpu.memory_space<vmem>>, vector<1x8x4xf32>
    %96 = vector.shape_cast %95 : vector<1x8x4xf32> to vector<8x4xf32>
    %c24_129 = arith.constant 24 : index
    %c16_130 = arith.constant 16 : index
    %97 = vector.load %arg11[%c24_129, %c16_130] : memref<64x36xf32, #tpu.memory_space<vmem>>, vector<8x4xf32>
    tpu.vector_store %arg11[%c24_129, %c16_130], %96 {strides = array<i32>} : memref<64x36xf32, #tpu.memory_space<vmem>>, vector<8x4xf32>,
    %c0_131 = arith.constant 0 : index
    %c193 = arith.constant 193 : index
    %c0_132 = arith.constant 0 : index
    %98 = tpu.strided_load %arg1[%c0_131, %c193, %c0_132] {strides = array<i32: 1, 2, 1>} : memref<1x456x4xf32, #tpu.memory_space<vmem>>, vector<1x8x4xf32>
    %99 = vector.shape_cast %98 : vector<1x8x4xf32> to vector<8x4xf32>
    %c24_133 = arith.constant 24 : index
    %c20_134 = arith.constant 20 : index
    %100 = vector.load %arg11[%c24_133, %c20_134] : memref<64x36xf32, #tpu.memory_space<vmem>>, vector<8x4xf32>
    tpu.vector_store %arg11[%c24_133, %c20_134], %99 {strides = array<i32>} : memref<64x36xf32, #tpu.memory_space<vmem>>, vector<8x4xf32>,
    %c0_135 = arith.constant 0 : index
    %c215 = arith.constant 215 : index
    %c0_136 = arith.constant 0 : index
    %101 = tpu.strided_load %arg1[%c0_135, %c215, %c0_136] {strides = array<i32: 1, 2, 1>} : memref<1x456x4xf32, #tpu.memory_space<vmem>>, vector<1x8x4xf32>
    %102 = vector.shape_cast %101 : vector<1x8x4xf32> to vector<8x4xf32>
    %c24_137 = arith.constant 24 : index
    %c24_138 = arith.constant 24 : index
    %103 = vector.load %arg11[%c24_137, %c24_138] : memref<64x36xf32, #tpu.memory_space<vmem>>, vector<8x4xf32>
    tpu.vector_store %arg11[%c24_137, %c24_138], %102 {strides = array<i32>} : memref<64x36xf32, #tpu.memory_space<vmem>>, vector<8x4xf32>,
    %c0_139 = arith.constant 0 : index
    %c216 = arith.constant 216 : index
    %c0_140 = arith.constant 0 : index
    %104 = tpu.strided_load %arg1[%c0_139, %c216, %c0_140] {strides = array<i32: 1, 2, 1>} : memref<1x456x4xf32, #tpu.memory_space<vmem>>, vector<1x8x4xf32>
    %105 = vector.shape_cast %104 : vector<1x8x4xf32> to vector<8x4xf32>
    %c24_141 = arith.constant 24 : index
    %c28_142 = arith.constant 28 : index
    %106 = vector.load %arg11[%c24_141, %c28_142] : memref<64x36xf32, #tpu.memory_space<vmem>>, vector<8x4xf32>
    tpu.vector_store %arg11[%c24_141, %c28_142], %105 {strides = array<i32>} : memref<64x36xf32, #tpu.memory_space<vmem>>, vector<8x4xf32>,
    %c0_143 = arith.constant 0 : index
    %c217 = arith.constant 217 : index
    %c0_144 = arith.constant 0 : index
    %107 = tpu.strided_load %arg1[%c0_143, %c217, %c0_144] {strides = array<i32: 1, 2, 1>} : memref<1x456x4xf32, #tpu.memory_space<vmem>>, vector<1x8x4xf32>
    %108 = vector.shape_cast %107 : vector<1x8x4xf32> to vector<8x4xf32>
    %c24_145 = arith.constant 24 : index
    %c32_146 = arith.constant 32 : index
    %109 = vector.load %arg11[%c24_145, %c32_146] : memref<64x36xf32, #tpu.memory_space<vmem>>, vector<8x4xf32>
    tpu.vector_store %arg11[%c24_145, %c32_146], %108 {strides = array<i32>} : memref<64x36xf32, #tpu.memory_space<vmem>>, vector<8x4xf32>,
    %c0_147 = arith.constant 0 : index
    %c215_148 = arith.constant 215 : index
    %c0_149 = arith.constant 0 : index
    %110 = tpu.strided_load %arg1[%c0_147, %c215_148, %c0_149] {strides = array<i32: 1, 2, 1>} : memref<1x456x4xf32, #tpu.memory_space<vmem>>, vector<1x8x4xf32>
    %111 = vector.shape_cast %110 : vector<1x8x4xf32> to vector<8x4xf32>
    %c32_150 = arith.constant 32 : index
    %c0_151 = arith.constant 0 : index
    %112 = vector.load %arg11[%c32_150, %c0_151] : memref<64x36xf32, #tpu.memory_space<vmem>>, vector<8x4xf32>
    tpu.vector_store %arg11[%c32_150, %c0_151], %111 {strides = array<i32>} : memref<64x36xf32, #tpu.memory_space<vmem>>, vector<8x4xf32>,
    %c0_152 = arith.constant 0 : index
    %c216_153 = arith.constant 216 : index
    %c0_154 = arith.constant 0 : index
    %113 = tpu.strided_load %arg1[%c0_152, %c216_153, %c0_154] {strides = array<i32: 1, 2, 1>} : memref<1x456x4xf32, #tpu.memory_space<vmem>>, vector<1x8x4xf32>
    %114 = vector.shape_cast %113 : vector<1x8x4xf32> to vector<8x4xf32>
    %c32_155 = arith.constant 32 : index
    %c4_156 = arith.constant 4 : index
    %115 = vector.load %arg11[%c32_155, %c4_156] : memref<64x36xf32, #tpu.memory_space<vmem>>, vector<8x4xf32>
    tpu.vector_store %arg11[%c32_155, %c4_156], %114 {strides = array<i32>} : memref<64x36xf32, #tpu.memory_space<vmem>>, vector<8x4xf32>,
    %c0_157 = arith.constant 0 : index
    %c217_158 = arith.constant 217 : index
    %c0_159 = arith.constant 0 : index
    %116 = tpu.strided_load %arg1[%c0_157, %c217_158, %c0_159] {strides = array<i32: 1, 2, 1>} : memref<1x456x4xf32, #tpu.memory_space<vmem>>, vector<1x8x4xf32>
    %117 = vector.shape_cast %116 : vector<1x8x4xf32> to vector<8x4xf32>
    %c32_160 = arith.constant 32 : index
    %c8_161 = arith.constant 8 : index
    %118 = vector.load %arg11[%c32_160, %c8_161] : memref<64x36xf32, #tpu.memory_space<vmem>>, vector<8x4xf32>
    tpu.vector_store %arg11[%c32_160, %c8_161], %117 {strides = array<i32>} : memref<64x36xf32, #tpu.memory_space<vmem>>, vector<8x4xf32>,
    %c0_162 = arith.constant 0 : index
    %c239 = arith.constant 239 : index
    %c0_163 = arith.constant 0 : index
    %119 = tpu.strided_load %arg1[%c0_162, %c239, %c0_163] {strides = array<i32: 1, 2, 1>} : memref<1x456x4xf32, #tpu.memory_space<vmem>>, vector<1x8x4xf32>
    %120 = vector.shape_cast %119 : vector<1x8x4xf32> to vector<8x4xf32>
    %c32_164 = arith.constant 32 : index
    %c12_165 = arith.constant 12 : index
    %121 = vector.load %arg11[%c32_164, %c12_165] : memref<64x36xf32, #tpu.memory_space<vmem>>, vector<8x4xf32>
    tpu.vector_store %arg11[%c32_164, %c12_165], %120 {strides = array<i32>} : memref<64x36xf32, #tpu.memory_space<vmem>>, vector<8x4xf32>,
    %c0_166 = arith.constant 0 : index
    %c240 = arith.constant 240 : index
    %c0_167 = arith.constant 0 : index
    %122 = tpu.strided_load %arg1[%c0_166, %c240, %c0_167] {strides = array<i32: 1, 2, 1>} : memref<1x456x4xf32, #tpu.memory_space<vmem>>, vector<1x8x4xf32>
    %123 = vector.shape_cast %122 : vector<1x8x4xf32> to vector<8x4xf32>
    %c32_168 = arith.constant 32 : index
    %c16_169 = arith.constant 16 : index
    %124 = vector.load %arg11[%c32_168, %c16_169] : memref<64x36xf32, #tpu.memory_space<vmem>>, vector<8x4xf32>
    tpu.vector_store %arg11[%c32_168, %c16_169], %123 {strides = array<i32>} : memref<64x36xf32, #tpu.memory_space<vmem>>, vector<8x4xf32>,
    %c0_170 = arith.constant 0 : index
    %c241 = arith.constant 241 : index
    %c0_171 = arith.constant 0 : index
    %125 = tpu.strided_load %arg1[%c0_170, %c241, %c0_171] {strides = array<i32: 1, 2, 1>} : memref<1x456x4xf32, #tpu.memory_space<vmem>>, vector<1x8x4xf32>
    %126 = vector.shape_cast %125 : vector<1x8x4xf32> to vector<8x4xf32>
    %c32_172 = arith.constant 32 : index
    %c20_173 = arith.constant 20 : index
    %127 = vector.load %arg11[%c32_172, %c20_173] : memref<64x36xf32, #tpu.memory_space<vmem>>, vector<8x4xf32>
    tpu.vector_store %arg11[%c32_172, %c20_173], %126 {strides = array<i32>} : memref<64x36xf32, #tpu.memory_space<vmem>>, vector<8x4xf32>,
    %c0_174 = arith.constant 0 : index
    %c263 = arith.constant 263 : index
    %c0_175 = arith.constant 0 : index
    %128 = tpu.strided_load %arg1[%c0_174, %c263, %c0_175] {strides = array<i32: 1, 2, 1>} : memref<1x456x4xf32, #tpu.memory_space<vmem>>, vector<1x8x4xf32>
    %129 = vector.shape_cast %128 : vector<1x8x4xf32> to vector<8x4xf32>
    %c32_176 = arith.constant 32 : index
    %c24_177 = arith.constant 24 : index
    %130 = vector.load %arg11[%c32_176, %c24_177] : memref<64x36xf32, #tpu.memory_space<vmem>>, vector<8x4xf32>
    tpu.vector_store %arg11[%c32_176, %c24_177], %129 {strides = array<i32>} : memref<64x36xf32, #tpu.memory_space<vmem>>, vector<8x4xf32>,
    %c0_178 = arith.constant 0 : index
    %c264 = arith.constant 264 : index
    %c0_179 = arith.constant 0 : index
    %131 = tpu.strided_load %arg1[%c0_178, %c264, %c0_179] {strides = array<i32: 1, 2, 1>} : memref<1x456x4xf32, #tpu.memory_space<vmem>>, vector<1x8x4xf32>
    %132 = vector.shape_cast %131 : vector<1x8x4xf32> to vector<8x4xf32>
    %c32_180 = arith.constant 32 : index
    %c28_181 = arith.constant 28 : index
    %133 = vector.load %arg11[%c32_180, %c28_181] : memref<64x36xf32, #tpu.memory_space<vmem>>, vector<8x4xf32>
    tpu.vector_store %arg11[%c32_180, %c28_181], %132 {strides = array<i32>} : memref<64x36xf32, #tpu.memory_space<vmem>>, vector<8x4xf32>,
    %c0_182 = arith.constant 0 : index
    %c265 = arith.constant 265 : index
    %c0_183 = arith.constant 0 : index
    %134 = tpu.strided_load %arg1[%c0_182, %c265, %c0_183] {strides = array<i32: 1, 2, 1>} : memref<1x456x4xf32, #tpu.memory_space<vmem>>, vector<1x8x4xf32>
    %135 = vector.shape_cast %134 : vector<1x8x4xf32> to vector<8x4xf32>
    %c32_184 = arith.constant 32 : index
    %c32_185 = arith.constant 32 : index
    %136 = vector.load %arg11[%c32_184, %c32_185] : memref<64x36xf32, #tpu.memory_space<vmem>>, vector<8x4xf32>
    tpu.vector_store %arg11[%c32_184, %c32_185], %135 {strides = array<i32>} : memref<64x36xf32, #tpu.memory_space<vmem>>, vector<8x4xf32>,
    %c0_186 = arith.constant 0 : index
    %c263_187 = arith.constant 263 : index
    %c0_188 = arith.constant 0 : index
    %137 = tpu.strided_load %arg1[%c0_186, %c263_187, %c0_188] {strides = array<i32: 1, 2, 1>} : memref<1x456x4xf32, #tpu.memory_space<vmem>>, vector<1x8x4xf32>
    %138 = vector.shape_cast %137 : vector<1x8x4xf32> to vector<8x4xf32>
    %c40 = arith.constant 40 : index
    %c0_189 = arith.constant 0 : index
    %139 = vector.load %arg11[%c40, %c0_189] : memref<64x36xf32, #tpu.memory_space<vmem>>, vector<8x4xf32>
    tpu.vector_store %arg11[%c40, %c0_189], %138 {strides = array<i32>} : memref<64x36xf32, #tpu.memory_space<vmem>>, vector<8x4xf32>,
    %c0_190 = arith.constant 0 : index
    %c264_191 = arith.constant 264 : index
    %c0_192 = arith.constant 0 : index
    %140 = tpu.strided_load %arg1[%c0_190, %c264_191, %c0_192] {strides = array<i32: 1, 2, 1>} : memref<1x456x4xf32, #tpu.memory_space<vmem>>, vector<1x8x4xf32>
    %141 = vector.shape_cast %140 : vector<1x8x4xf32> to vector<8x4xf32>
    %c40_193 = arith.constant 40 : index
    %c4_194 = arith.constant 4 : index
    %142 = vector.load %arg11[%c40_193, %c4_194] : memref<64x36xf32, #tpu.memory_space<vmem>>, vector<8x4xf32>
    tpu.vector_store %arg11[%c40_193, %c4_194], %141 {strides = array<i32>} : memref<64x36xf32, #tpu.memory_space<vmem>>, vector<8x4xf32>,
    %c0_195 = arith.constant 0 : index
    %c265_196 = arith.constant 265 : index
    %c0_197 = arith.constant 0 : index
    %143 = tpu.strided_load %arg1[%c0_195, %c265_196, %c0_197] {strides = array<i32: 1, 2, 1>} : memref<1x456x4xf32, #tpu.memory_space<vmem>>, vector<1x8x4xf32>
    %144 = vector.shape_cast %143 : vector<1x8x4xf32> to vector<8x4xf32>
    %c40_198 = arith.constant 40 : index
    %c8_199 = arith.constant 8 : index
    %145 = vector.load %arg11[%c40_198, %c8_199] : memref<64x36xf32, #tpu.memory_space<vmem>>, vector<8x4xf32>
    tpu.vector_store %arg11[%c40_198, %c8_199], %144 {strides = array<i32>} : memref<64x36xf32, #tpu.memory_space<vmem>>, vector<8x4xf32>,
    %c0_200 = arith.constant 0 : index
    %c287 = arith.constant 287 : index
    %c0_201 = arith.constant 0 : index
    %146 = tpu.strided_load %arg1[%c0_200, %c287, %c0_201] {strides = array<i32: 1, 2, 1>} : memref<1x456x4xf32, #tpu.memory_space<vmem>>, vector<1x8x4xf32>
    %147 = vector.shape_cast %146 : vector<1x8x4xf32> to vector<8x4xf32>
    %c40_202 = arith.constant 40 : index
    %c12_203 = arith.constant 12 : index
    %148 = vector.load %arg11[%c40_202, %c12_203] : memref<64x36xf32, #tpu.memory_space<vmem>>, vector<8x4xf32>
    tpu.vector_store %arg11[%c40_202, %c12_203], %147 {strides = array<i32>} : memref<64x36xf32, #tpu.memory_space<vmem>>, vector<8x4xf32>,
    %c0_204 = arith.constant 0 : index
    %c288 = arith.constant 288 : index
    %c0_205 = arith.constant 0 : index
    %149 = tpu.strided_load %arg1[%c0_204, %c288, %c0_205] {strides = array<i32: 1, 2, 1>} : memref<1x456x4xf32, #tpu.memory_space<vmem>>, vector<1x8x4xf32>
    %150 = vector.shape_cast %149 : vector<1x8x4xf32> to vector<8x4xf32>
    %c40_206 = arith.constant 40 : index
    %c16_207 = arith.constant 16 : index
    %151 = vector.load %arg11[%c40_206, %c16_207] : memref<64x36xf32, #tpu.memory_space<vmem>>, vector<8x4xf32>
    tpu.vector_store %arg11[%c40_206, %c16_207], %150 {strides = array<i32>} : memref<64x36xf32, #tpu.memory_space<vmem>>, vector<8x4xf32>,
    %c0_208 = arith.constant 0 : index
    %c289 = arith.constant 289 : index
    %c0_209 = arith.constant 0 : index
    %152 = tpu.strided_load %arg1[%c0_208, %c289, %c0_209] {strides = array<i32: 1, 2, 1>} : memref<1x456x4xf32, #tpu.memory_space<vmem>>, vector<1x8x4xf32>
    %153 = vector.shape_cast %152 : vector<1x8x4xf32> to vector<8x4xf32>
    %c40_210 = arith.constant 40 : index
    %c20_211 = arith.constant 20 : index
    %154 = vector.load %arg11[%c40_210, %c20_211] : memref<64x36xf32, #tpu.memory_space<vmem>>, vector<8x4xf32>
    tpu.vector_store %arg11[%c40_210, %c20_211], %153 {strides = array<i32>} : memref<64x36xf32, #tpu.memory_space<vmem>>, vector<8x4xf32>,
    %c0_212 = arith.constant 0 : index
    %c311 = arith.constant 311 : index
    %c0_213 = arith.constant 0 : index
    %155 = tpu.strided_load %arg1[%c0_212, %c311, %c0_213] {strides = array<i32: 1, 2, 1>} : memref<1x456x4xf32, #tpu.memory_space<vmem>>, vector<1x8x4xf32>
    %156 = vector.shape_cast %155 : vector<1x8x4xf32> to vector<8x4xf32>
    %c40_214 = arith.constant 40 : index
    %c24_215 = arith.constant 24 : index
    %157 = vector.load %arg11[%c40_214, %c24_215] : memref<64x36xf32, #tpu.memory_space<vmem>>, vector<8x4xf32>
    tpu.vector_store %arg11[%c40_214, %c24_215], %156 {strides = array<i32>} : memref<64x36xf32, #tpu.memory_space<vmem>>, vector<8x4xf32>,
    %c0_216 = arith.constant 0 : index
    %c312 = arith.constant 312 : index
    %c0_217 = arith.constant 0 : index
    %158 = tpu.strided_load %arg1[%c0_216, %c312, %c0_217] {strides = array<i32: 1, 2, 1>} : memref<1x456x4xf32, #tpu.memory_space<vmem>>, vector<1x8x4xf32>
    %159 = vector.shape_cast %158 : vector<1x8x4xf32> to vector<8x4xf32>
    %c40_218 = arith.constant 40 : index
    %c28_219 = arith.constant 28 : index
    %160 = vector.load %arg11[%c40_218, %c28_219] : memref<64x36xf32, #tpu.memory_space<vmem>>, vector<8x4xf32>
    tpu.vector_store %arg11[%c40_218, %c28_219], %159 {strides = array<i32>} : memref<64x36xf32, #tpu.memory_space<vmem>>, vector<8x4xf32>,
    %c0_220 = arith.constant 0 : index
    %c313 = arith.constant 313 : index
    %c0_221 = arith.constant 0 : index
    %161 = tpu.strided_load %arg1[%c0_220, %c313, %c0_221] {strides = array<i32: 1, 2, 1>} : memref<1x456x4xf32, #tpu.memory_space<vmem>>, vector<1x8x4xf32>
    %162 = vector.shape_cast %161 : vector<1x8x4xf32> to vector<8x4xf32>
    %c40_222 = arith.constant 40 : index
    %c32_223 = arith.constant 32 : index
    %163 = vector.load %arg11[%c40_222, %c32_223] : memref<64x36xf32, #tpu.memory_space<vmem>>, vector<8x4xf32>
    tpu.vector_store %arg11[%c40_222, %c32_223], %162 {strides = array<i32>} : memref<64x36xf32, #tpu.memory_space<vmem>>, vector<8x4xf32>,
    %c0_224 = arith.constant 0 : index
    %c311_225 = arith.constant 311 : index
    %c0_226 = arith.constant 0 : index
    %164 = tpu.strided_load %arg1[%c0_224, %c311_225, %c0_226] {strides = array<i32: 1, 2, 1>} : memref<1x456x4xf32, #tpu.memory_space<vmem>>, vector<1x8x4xf32>
    %165 = vector.shape_cast %164 : vector<1x8x4xf32> to vector<8x4xf32>
    %c48_227 = arith.constant 48 : index
    %c0_228 = arith.constant 0 : index
    %166 = vector.load %arg11[%c48_227, %c0_228] : memref<64x36xf32, #tpu.memory_space<vmem>>, vector<8x4xf32>
    tpu.vector_store %arg11[%c48_227, %c0_228], %165 {strides = array<i32>} : memref<64x36xf32, #tpu.memory_space<vmem>>, vector<8x4xf32>,
    %c0_229 = arith.constant 0 : index
    %c312_230 = arith.constant 312 : index
    %c0_231 = arith.constant 0 : index
    %167 = tpu.strided_load %arg1[%c0_229, %c312_230, %c0_231] {strides = array<i32: 1, 2, 1>} : memref<1x456x4xf32, #tpu.memory_space<vmem>>, vector<1x8x4xf32>
    %168 = vector.shape_cast %167 : vector<1x8x4xf32> to vector<8x4xf32>
    %c48_232 = arith.constant 48 : index
    %c4_233 = arith.constant 4 : index
    %169 = vector.load %arg11[%c48_232, %c4_233] : memref<64x36xf32, #tpu.memory_space<vmem>>, vector<8x4xf32>
    tpu.vector_store %arg11[%c48_232, %c4_233], %168 {strides = array<i32>} : memref<64x36xf32, #tpu.memory_space<vmem>>, vector<8x4xf32>,
    %c0_234 = arith.constant 0 : index
    %c313_235 = arith.constant 313 : index
    %c0_236 = arith.constant 0 : index
    %170 = tpu.strided_load %arg1[%c0_234, %c313_235, %c0_236] {strides = array<i32: 1, 2, 1>} : memref<1x456x4xf32, #tpu.memory_space<vmem>>, vector<1x8x4xf32>
    %171 = vector.shape_cast %170 : vector<1x8x4xf32> to vector<8x4xf32>
    %c48_237 = arith.constant 48 : index
    %c8_238 = arith.constant 8 : index
    %172 = vector.load %arg11[%c48_237, %c8_238] : memref<64x36xf32, #tpu.memory_space<vmem>>, vector<8x4xf32>
    tpu.vector_store %arg11[%c48_237, %c8_238], %171 {strides = array<i32>} : memref<64x36xf32, #tpu.memory_space<vmem>>, vector<8x4xf32>,
    %c0_239 = arith.constant 0 : index
    %c335 = arith.constant 335 : index
    %c0_240 = arith.constant 0 : index
    %173 = tpu.strided_load %arg1[%c0_239, %c335, %c0_240] {strides = array<i32: 1, 2, 1>} : memref<1x456x4xf32, #tpu.memory_space<vmem>>, vector<1x8x4xf32>
    %174 = vector.shape_cast %173 : vector<1x8x4xf32> to vector<8x4xf32>
    %c48_241 = arith.constant 48 : index
    %c12_242 = arith.constant 12 : index
    %175 = vector.load %arg11[%c48_241, %c12_242] : memref<64x36xf32, #tpu.memory_space<vmem>>, vector<8x4xf32>
    tpu.vector_store %arg11[%c48_241, %c12_242], %174 {strides = array<i32>} : memref<64x36xf32, #tpu.memory_space<vmem>>, vector<8x4xf32>,
    %c0_243 = arith.constant 0 : index
    %c336 = arith.constant 336 : index
    %c0_244 = arith.constant 0 : index
    %176 = tpu.strided_load %arg1[%c0_243, %c336, %c0_244] {strides = array<i32: 1, 2, 1>} : memref<1x456x4xf32, #tpu.memory_space<vmem>>, vector<1x8x4xf32>
    %177 = vector.shape_cast %176 : vector<1x8x4xf32> to vector<8x4xf32>
    %c48_245 = arith.constant 48 : index
    %c16_246 = arith.constant 16 : index
    %178 = vector.load %arg11[%c48_245, %c16_246] : memref<64x36xf32, #tpu.memory_space<vmem>>, vector<8x4xf32>
    tpu.vector_store %arg11[%c48_245, %c16_246], %177 {strides = array<i32>} : memref<64x36xf32, #tpu.memory_space<vmem>>, vector<8x4xf32>,
    %c0_247 = arith.constant 0 : index
    %c337 = arith.constant 337 : index
    %c0_248 = arith.constant 0 : index
    %179 = tpu.strided_load %arg1[%c0_247, %c337, %c0_248] {strides = array<i32: 1, 2, 1>} : memref<1x456x4xf32, #tpu.memory_space<vmem>>, vector<1x8x4xf32>
    %180 = vector.shape_cast %179 : vector<1x8x4xf32> to vector<8x4xf32>
    %c48_249 = arith.constant 48 : index
    %c20_250 = arith.constant 20 : index
    %181 = vector.load %arg11[%c48_249, %c20_250] : memref<64x36xf32, #tpu.memory_space<vmem>>, vector<8x4xf32>
    tpu.vector_store %arg11[%c48_249, %c20_250], %180 {strides = array<i32>} : memref<64x36xf32, #tpu.memory_space<vmem>>, vector<8x4xf32>,
    %c0_251 = arith.constant 0 : index
    %c359 = arith.constant 359 : index
    %c0_252 = arith.constant 0 : index
    %182 = tpu.strided_load %arg1[%c0_251, %c359, %c0_252] {strides = array<i32: 1, 2, 1>} : memref<1x456x4xf32, #tpu.memory_space<vmem>>, vector<1x8x4xf32>
    %183 = vector.shape_cast %182 : vector<1x8x4xf32> to vector<8x4xf32>
    %c48_253 = arith.constant 48 : index
    %c24_254 = arith.constant 24 : index
    %184 = vector.load %arg11[%c48_253, %c24_254] : memref<64x36xf32, #tpu.memory_space<vmem>>, vector<8x4xf32>
    tpu.vector_store %arg11[%c48_253, %c24_254], %183 {strides = array<i32>} : memref<64x36xf32, #tpu.memory_space<vmem>>, vector<8x4xf32>,
    %c0_255 = arith.constant 0 : index
    %c360 = arith.constant 360 : index
    %c0_256 = arith.constant 0 : index
    %185 = tpu.strided_load %arg1[%c0_255, %c360, %c0_256] {strides = array<i32: 1, 2, 1>} : memref<1x456x4xf32, #tpu.memory_space<vmem>>, vector<1x8x4xf32>
    %186 = vector.shape_cast %185 : vector<1x8x4xf32> to vector<8x4xf32>
    %c48_257 = arith.constant 48 : index
    %c28_258 = arith.constant 28 : index
    %187 = vector.load %arg11[%c48_257, %c28_258] : memref<64x36xf32, #tpu.memory_space<vmem>>, vector<8x4xf32>
    tpu.vector_store %arg11[%c48_257, %c28_258], %186 {strides = array<i32>} : memref<64x36xf32, #tpu.memory_space<vmem>>, vector<8x4xf32>,
    %c0_259 = arith.constant 0 : index
    %c361 = arith.constant 361 : index
    %c0_260 = arith.constant 0 : index
    %188 = tpu.strided_load %arg1[%c0_259, %c361, %c0_260] {strides = array<i32: 1, 2, 1>} : memref<1x456x4xf32, #tpu.memory_space<vmem>>, vector<1x8x4xf32>
    %189 = vector.shape_cast %188 : vector<1x8x4xf32> to vector<8x4xf32>
    %c48_261 = arith.constant 48 : index
    %c32_262 = arith.constant 32 : index
    %190 = vector.load %arg11[%c48_261, %c32_262] : memref<64x36xf32, #tpu.memory_space<vmem>>, vector<8x4xf32>
    tpu.vector_store %arg11[%c48_261, %c32_262], %189 {strides = array<i32>} : memref<64x36xf32, #tpu.memory_space<vmem>>, vector<8x4xf32>,
    %c0_263 = arith.constant 0 : index
    %c359_264 = arith.constant 359 : index
    %c0_265 = arith.constant 0 : index
    %191 = tpu.strided_load %arg1[%c0_263, %c359_264, %c0_265] {strides = array<i32: 1, 2, 1>} : memref<1x456x4xf32, #tpu.memory_space<vmem>>, vector<1x8x4xf32>
    %192 = vector.shape_cast %191 : vector<1x8x4xf32> to vector<8x4xf32>
    %c56 = arith.constant 56 : index
    %c0_266 = arith.constant 0 : index
    %193 = vector.load %arg11[%c56, %c0_266] : memref<64x36xf32, #tpu.memory_space<vmem>>, vector<8x4xf32>
    tpu.vector_store %arg11[%c56, %c0_266], %192 {strides = array<i32>} : memref<64x36xf32, #tpu.memory_space<vmem>>, vector<8x4xf32>,
    %c0_267 = arith.constant 0 : index
    %c360_268 = arith.constant 360 : index
    %c0_269 = arith.constant 0 : index
    %194 = tpu.strided_load %arg1[%c0_267, %c360_268, %c0_269] {strides = array<i32: 1, 2, 1>} : memref<1x456x4xf32, #tpu.memory_space<vmem>>, vector<1x8x4xf32>
    %195 = vector.shape_cast %194 : vector<1x8x4xf32> to vector<8x4xf32>
    %c56_270 = arith.constant 56 : index
    %c4_271 = arith.constant 4 : index
    %196 = vector.load %arg11[%c56_270, %c4_271] : memref<64x36xf32, #tpu.memory_space<vmem>>, vector<8x4xf32>
    tpu.vector_store %arg11[%c56_270, %c4_271], %195 {strides = array<i32>} : memref<64x36xf32, #tpu.memory_space<vmem>>, vector<8x4xf32>,
    %c0_272 = arith.constant 0 : index
    %c361_273 = arith.constant 361 : index
    %c0_274 = arith.constant 0 : index
    %197 = tpu.strided_load %arg1[%c0_272, %c361_273, %c0_274] {strides = array<i32: 1, 2, 1>} : memref<1x456x4xf32, #tpu.memory_space<vmem>>, vector<1x8x4xf32>
    %198 = vector.shape_cast %197 : vector<1x8x4xf32> to vector<8x4xf32>
    %c56_275 = arith.constant 56 : index
    %c8_276 = arith.constant 8 : index
    %199 = vector.load %arg11[%c56_275, %c8_276] : memref<64x36xf32, #tpu.memory_space<vmem>>, vector<8x4xf32>
    tpu.vector_store %arg11[%c56_275, %c8_276], %198 {strides = array<i32>} : memref<64x36xf32, #tpu.memory_space<vmem>>, vector<8x4xf32>,
    %c0_277 = arith.constant 0 : index
    %c383 = arith.constant 383 : index
    %c0_278 = arith.constant 0 : index
    %200 = tpu.strided_load %arg1[%c0_277, %c383, %c0_278] {strides = array<i32: 1, 2, 1>} : memref<1x456x4xf32, #tpu.memory_space<vmem>>, vector<1x8x4xf32>
    %201 = vector.shape_cast %200 : vector<1x8x4xf32> to vector<8x4xf32>
    %c56_279 = arith.constant 56 : index
    %c12_280 = arith.constant 12 : index
    %202 = vector.load %arg11[%c56_279, %c12_280] : memref<64x36xf32, #tpu.memory_space<vmem>>, vector<8x4xf32>
    tpu.vector_store %arg11[%c56_279, %c12_280], %201 {strides = array<i32>} : memref<64x36xf32, #tpu.memory_space<vmem>>, vector<8x4xf32>,
    %c0_281 = arith.constant 0 : index
    %c384 = arith.constant 384 : index
    %c0_282 = arith.constant 0 : index
    %203 = tpu.strided_load %arg1[%c0_281, %c384, %c0_282] {strides = array<i32: 1, 2, 1>} : memref<1x456x4xf32, #tpu.memory_space<vmem>>, vector<1x8x4xf32>
    %204 = vector.shape_cast %203 : vector<1x8x4xf32> to vector<8x4xf32>
    %c56_283 = arith.constant 56 : index
    %c16_284 = arith.constant 16 : index
    %205 = vector.load %arg11[%c56_283, %c16_284] : memref<64x36xf32, #tpu.memory_space<vmem>>, vector<8x4xf32>
    tpu.vector_store %arg11[%c56_283, %c16_284], %204 {strides = array<i32>} : memref<64x36xf32, #tpu.memory_space<vmem>>, vector<8x4xf32>,
    %c0_285 = arith.constant 0 : index
    %c385 = arith.constant 385 : index
    %c0_286 = arith.constant 0 : index
    %206 = tpu.strided_load %arg1[%c0_285, %c385, %c0_286] {strides = array<i32: 1, 2, 1>} : memref<1x456x4xf32, #tpu.memory_space<vmem>>, vector<1x8x4xf32>
    %207 = vector.shape_cast %206 : vector<1x8x4xf32> to vector<8x4xf32>
    %c56_287 = arith.constant 56 : index
    %c20_288 = arith.constant 20 : index
    %208 = vector.load %arg11[%c56_287, %c20_288] : memref<64x36xf32, #tpu.memory_space<vmem>>, vector<8x4xf32>
    tpu.vector_store %arg11[%c56_287, %c20_288], %207 {strides = array<i32>} : memref<64x36xf32, #tpu.memory_space<vmem>>, vector<8x4xf32>,
    %c0_289 = arith.constant 0 : index
    %c407 = arith.constant 407 : index
    %c0_290 = arith.constant 0 : index
    %209 = tpu.strided_load %arg1[%c0_289, %c407, %c0_290] {strides = array<i32: 1, 2, 1>} : memref<1x456x4xf32, #tpu.memory_space<vmem>>, vector<1x8x4xf32>
    %210 = vector.shape_cast %209 : vector<1x8x4xf32> to vector<8x4xf32>
    %c56_291 = arith.constant 56 : index
    %c24_292 = arith.constant 24 : index
    %211 = vector.load %arg11[%c56_291, %c24_292] : memref<64x36xf32, #tpu.memory_space<vmem>>, vector<8x4xf32>
    tpu.vector_store %arg11[%c56_291, %c24_292], %210 {strides = array<i32>} : memref<64x36xf32, #tpu.memory_space<vmem>>, vector<8x4xf32>,
    %c0_293 = arith.constant 0 : index
    %c408 = arith.constant 408 : index
    %c0_294 = arith.constant 0 : index
    %212 = tpu.strided_load %arg1[%c0_293, %c408, %c0_294] {strides = array<i32: 1, 2, 1>} : memref<1x456x4xf32, #tpu.memory_space<vmem>>, vector<1x8x4xf32>
    %213 = vector.shape_cast %212 : vector<1x8x4xf32> to vector<8x4xf32>
    %c56_295 = arith.constant 56 : index
    %c28_296 = arith.constant 28 : index
    %214 = vector.load %arg11[%c56_295, %c28_296] : memref<64x36xf32, #tpu.memory_space<vmem>>, vector<8x4xf32>
    tpu.vector_store %arg11[%c56_295, %c28_296], %213 {strides = array<i32>} : memref<64x36xf32, #tpu.memory_space<vmem>>, vector<8x4xf32>,
    %c0_297 = arith.constant 0 : index
    %c409 = arith.constant 409 : index
    %c0_298 = arith.constant 0 : index
    %215 = tpu.strided_load %arg1[%c0_297, %c409, %c0_298] {strides = array<i32: 1, 2, 1>} : memref<1x456x4xf32, #tpu.memory_space<vmem>>, vector<1x8x4xf32>
    %216 = vector.shape_cast %215 : vector<1x8x4xf32> to vector<8x4xf32>
    %c56_299 = arith.constant 56 : index
    %c32_300 = arith.constant 32 : index
    %217 = vector.load %arg11[%c56_299, %c32_300] : memref<64x36xf32, #tpu.memory_space<vmem>>, vector<8x4xf32>
    tpu.vector_store %arg11[%c56_299, %c32_300], %216 {strides = array<i32>} : memref<64x36xf32, #tpu.memory_space<vmem>>, vector<8x4xf32>,
    %c0_301 = arith.constant 0 : index
    %c0_302 = arith.constant 0 : index
    %218 = vector.load %arg11[%c0_301, %c0_302] : memref<64x36xf32, #tpu.memory_space<vmem>>, vector<64x36xf32>
    %219 = arith.truncf %218 : vector<64x36xf32> to vector<64x36xbf16>
    %c0_303 = arith.constant 0 : index
    %c0_304 = arith.constant 0 : index
    %220 = vector.load %arg2[%c0_303, %c0_304] : memref<36x128xbf16, #tpu.memory_space<vmem>>, vector<36x128xbf16>
    %cst_305 = arith.constant dense<0.000000e+00> : vector<64x128xf32>
    %221 = tpu.matmul %219, %220, %cst_305 {dimension_numbers = #tpu.dot_dimension_numbers<[1], [0], [0], [1], [0, 0, 1, 1], [], []>} : vector<64x36xbf16>, vector<36x128xbf16>, vector<64x128xf32> -> vector<64x128xf32>
    %c0_306 = arith.constant 0 : index
    %c0_307 = arith.constant 0 : index
    %222 = vector.load %arg3[%c0_306, %c0_307] : memref<1x128xf32, #tpu.memory_space<vmem>>, vector<1x128xf32>
    %223 = vector.broadcast %222 : vector<1x128xf32> to vector<64x128xf32>
    %224 = arith.addf %221, %223 : vector<64x128xf32>
    %cst_308 = arith.constant 0.000000e+00 : f32
    %225 = vector.broadcast %cst_308 : f32 to vector<64x128xf32>
    %226 = arith.maximumf %224, %225 : vector<64x128xf32>
    %cst_309 = arith.constant 0.000000e+00 : f32
    %227 = vector.broadcast %cst_309 : f32 to vector<176x8xf32>
    %c0_310 = arith.constant 0 : index
    %c0_311 = arith.constant 0 : index
    %228 = vector.load %arg15[%c0_310, %c0_311] : memref<176x8xf32, #tpu.memory_space<vmem>>, vector<176x8xf32>
    tpu.vector_store %arg15[%c0_310, %c0_311], %227 {strides = array<i32>} : memref<176x8xf32, #tpu.memory_space<vmem>>, vector<176x8xf32>,
    %229 = vector.extract_strided_slice %226 {offsets = [0, 0], sizes = [8, 8], strides = [1, 1]} : vector<64x128xf32> to vector<8x8xf32>
    %c32_312 = arith.constant 32 : index
    %c0_313 = arith.constant 0 : index
    %230 = vector.load %arg15[%c32_312, %c0_313] : memref<176x8xf32, #tpu.memory_space<vmem>>, vector<8x8xf32>
    tpu.vector_store %arg15[%c32_312, %c0_313], %229 {strides = array<i32>} : memref<176x8xf32, #tpu.memory_space<vmem>>, vector<8x8xf32>,
    %231 = vector.extract_strided_slice %226 {offsets = [8, 0], sizes = [8, 8], strides = [1, 1]} : vector<64x128xf32> to vector<8x8xf32>
    %c48_314 = arith.constant 48 : index
    %c0_315 = arith.constant 0 : index
    %232 = vector.load %arg15[%c48_314, %c0_315] : memref<176x8xf32, #tpu.memory_space<vmem>>, vector<8x8xf32>
    tpu.vector_store %arg15[%c48_314, %c0_315], %231 {strides = array<i32>} : memref<176x8xf32, #tpu.memory_space<vmem>>, vector<8x8xf32>,
    %233 = vector.extract_strided_slice %226 {offsets = [16, 0], sizes = [8, 8], strides = [1, 1]} : vector<64x128xf32> to vector<8x8xf32>
    %c64 = arith.constant 64 : index
    %c0_316 = arith.constant 0 : index
    %234 = vector.load %arg15[%c64, %c0_316] : memref<176x8xf32, #tpu.memory_space<vmem>>, vector<8x8xf32>
    tpu.vector_store %arg15[%c64, %c0_316], %233 {strides = array<i32>} : memref<176x8xf32, #tpu.memory_space<vmem>>, vector<8x8xf32>,
    %235 = vector.extract_strided_slice %226 {offsets = [24, 0], sizes = [8, 8], strides = [1, 1]} : vector<64x128xf32> to vector<8x8xf32>
    %c80 = arith.constant 80 : index
    %c0_317 = arith.constant 0 : index
    %236 = vector.load %arg15[%c80, %c0_317] : memref<176x8xf32, #tpu.memory_space<vmem>>, vector<8x8xf32>
    tpu.vector_store %arg15[%c80, %c0_317], %235 {strides = array<i32>} : memref<176x8xf32, #tpu.memory_space<vmem>>, vector<8x8xf32>,
    %237 = vector.extract_strided_slice %226 {offsets = [32, 0], sizes = [8, 8], strides = [1, 1]} : vector<64x128xf32> to vector<8x8xf32>
    %c96_318 = arith.constant 96 : index
    %c0_319 = arith.constant 0 : index
    %238 = vector.load %arg15[%c96_318, %c0_319] : memref<176x8xf32, #tpu.memory_space<vmem>>, vector<8x8xf32>
    tpu.vector_store %arg15[%c96_318, %c0_319], %237 {strides = array<i32>} : memref<176x8xf32, #tpu.memory_space<vmem>>, vector<8x8xf32>,
    %239 = vector.extract_strided_slice %226 {offsets = [40, 0], sizes = [8, 8], strides = [1, 1]} : vector<64x128xf32> to vector<8x8xf32>
    %c112 = arith.constant 112 : index
    %c0_320 = arith.constant 0 : index
    %240 = vector.load %arg15[%c112, %c0_320] : memref<176x8xf32, #tpu.memory_space<vmem>>, vector<8x8xf32>
    tpu.vector_store %arg15[%c112, %c0_320], %239 {strides = array<i32>} : memref<176x8xf32, #tpu.memory_space<vmem>>, vector<8x8xf32>,
    %241 = vector.extract_strided_slice %226 {offsets = [48, 0], sizes = [8, 8], strides = [1, 1]} : vector<64x128xf32> to vector<8x8xf32>
    %c128 = arith.constant 128 : index
    %c0_321 = arith.constant 0 : index
    %242 = vector.load %arg15[%c128, %c0_321] : memref<176x8xf32, #tpu.memory_space<vmem>>, vector<8x8xf32>
    tpu.vector_store %arg15[%c128, %c0_321], %241 {strides = array<i32>} : memref<176x8xf32, #tpu.memory_space<vmem>>, vector<8x8xf32>,
    %243 = vector.extract_strided_slice %226 {offsets = [56, 0], sizes = [8, 8], strides = [1, 1]} : vector<64x128xf32> to vector<8x8xf32>
    %c144_322 = arith.constant 144 : index
    %c0_323 = arith.constant 0 : index
    %244 = vector.load %arg15[%c144_322, %c0_323] : memref<176x8xf32, #tpu.memory_space<vmem>>, vector<8x8xf32>
    tpu.vector_store %arg15[%c144_322, %c0_323], %243 {strides = array<i32>} : memref<176x8xf32, #tpu.memory_space<vmem>>, vector<8x8xf32>,
    %cst_324 = arith.constant 0.000000e+00 : f32
    %245 = vector.broadcast %cst_324 : f32 to vector<16x72xf32>
    %c0_325 = arith.constant 0 : index
    %c0_326 = arith.constant 0 : index
    %246 = vector.load %arg12[%c0_325, %c0_326] : memref<16x72xf32, #tpu.memory_space<vmem>>, vector<16x72xf32>
    tpu.vector_store %arg12[%c0_325, %c0_326], %245 {strides = array<i32>} : memref<16x72xf32, #tpu.memory_space<vmem>>, vector<16x72xf32>,
    %c15 = arith.constant 15 : index
    %c0_327 = arith.constant 0 : index
    %247 = tpu.strided_load %arg15[%c15, %c0_327] {strides = array<i32: 2, 1>} : memref<176x8xf32, #tpu.memory_space<vmem>>, vector<4x8xf32>
    %c0_328 = arith.constant 0 : index
    %c0_329 = arith.constant 0 : index
    %248 = vector.load %arg12[%c0_328, %c0_329] : memref<16x72xf32, #tpu.memory_space<vmem>>, vector<4x8xf32>
    tpu.vector_store %arg12[%c0_328, %c0_329], %247 {strides = array<i32>} : memref<16x72xf32, #tpu.memory_space<vmem>>, vector<4x8xf32>,
    %c16_330 = arith.constant 16 : index
    %c0_331 = arith.constant 0 : index
    %249 = tpu.strided_load %arg15[%c16_330, %c0_331] {strides = array<i32: 2, 1>} : memref<176x8xf32, #tpu.memory_space<vmem>>, vector<4x8xf32>
    %c0_332 = arith.constant 0 : index
    %c8_333 = arith.constant 8 : index
    %250 = vector.load %arg12[%c0_332, %c8_333] : memref<16x72xf32, #tpu.memory_space<vmem>>, vector<4x8xf32>
    tpu.vector_store %arg12[%c0_332, %c8_333], %249 {strides = array<i32>} : memref<16x72xf32, #tpu.memory_space<vmem>>, vector<4x8xf32>,
    %c17 = arith.constant 17 : index
    %c0_334 = arith.constant 0 : index
    %251 = tpu.strided_load %arg15[%c17, %c0_334] {strides = array<i32: 2, 1>} : memref<176x8xf32, #tpu.memory_space<vmem>>, vector<4x8xf32>
    %c0_335 = arith.constant 0 : index
    %c16_336 = arith.constant 16 : index
    %252 = vector.load %arg12[%c0_335, %c16_336] : memref<16x72xf32, #tpu.memory_space<vmem>>, vector<4x8xf32>
    tpu.vector_store %arg12[%c0_335, %c16_336], %251 {strides = array<i32>} : memref<16x72xf32, #tpu.memory_space<vmem>>, vector<4x8xf32>,
    %c31 = arith.constant 31 : index
    %c0_337 = arith.constant 0 : index
    %253 = tpu.strided_load %arg15[%c31, %c0_337] {strides = array<i32: 2, 1>} : memref<176x8xf32, #tpu.memory_space<vmem>>, vector<4x8xf32>
    %c0_338 = arith.constant 0 : index
    %c24_339 = arith.constant 24 : index
    %254 = vector.load %arg12[%c0_338, %c24_339] : memref<16x72xf32, #tpu.memory_space<vmem>>, vector<4x8xf32>
    tpu.vector_store %arg12[%c0_338, %c24_339], %253 {strides = array<i32>} : memref<16x72xf32, #tpu.memory_space<vmem>>, vector<4x8xf32>,
    %c32_340 = arith.constant 32 : index
    %c0_341 = arith.constant 0 : index
    %255 = tpu.strided_load %arg15[%c32_340, %c0_341] {strides = array<i32: 2, 1>} : memref<176x8xf32, #tpu.memory_space<vmem>>, vector<4x8xf32>
    %c0_342 = arith.constant 0 : index
    %c32_343 = arith.constant 32 : index
    %256 = vector.load %arg12[%c0_342, %c32_343] : memref<16x72xf32, #tpu.memory_space<vmem>>, vector<4x8xf32>
    tpu.vector_store %arg12[%c0_342, %c32_343], %255 {strides = array<i32>} : memref<16x72xf32, #tpu.memory_space<vmem>>, vector<4x8xf32>,
    %c33 = arith.constant 33 : index
    %c0_344 = arith.constant 0 : index
    %257 = tpu.strided_load %arg15[%c33, %c0_344] {strides = array<i32: 2, 1>} : memref<176x8xf32, #tpu.memory_space<vmem>>, vector<4x8xf32>
    %c0_345 = arith.constant 0 : index
    %c40_346 = arith.constant 40 : index
    %258 = vector.load %arg12[%c0_345, %c40_346] : memref<16x72xf32, #tpu.memory_space<vmem>>, vector<4x8xf32>
    tpu.vector_store %arg12[%c0_345, %c40_346], %257 {strides = array<i32>} : memref<16x72xf32, #tpu.memory_space<vmem>>, vector<4x8xf32>,
    %c47_347 = arith.constant 47 : index
    %c0_348 = arith.constant 0 : index
    %259 = tpu.strided_load %arg15[%c47_347, %c0_348] {strides = array<i32: 2, 1>} : memref<176x8xf32, #tpu.memory_space<vmem>>, vector<4x8xf32>
    %c0_349 = arith.constant 0 : index
    %c48_350 = arith.constant 48 : index
    %260 = vector.load %arg12[%c0_349, %c48_350] : memref<16x72xf32, #tpu.memory_space<vmem>>, vector<4x8xf32>
    tpu.vector_store %arg12[%c0_349, %c48_350], %259 {strides = array<i32>} : memref<16x72xf32, #tpu.memory_space<vmem>>, vector<4x8xf32>,
    %c48_351 = arith.constant 48 : index
    %c0_352 = arith.constant 0 : index
    %261 = tpu.strided_load %arg15[%c48_351, %c0_352] {strides = array<i32: 2, 1>} : memref<176x8xf32, #tpu.memory_space<vmem>>, vector<4x8xf32>
    %c0_353 = arith.constant 0 : index
    %c56_354 = arith.constant 56 : index
    %262 = vector.load %arg12[%c0_353, %c56_354] : memref<16x72xf32, #tpu.memory_space<vmem>>, vector<4x8xf32>
    tpu.vector_store %arg12[%c0_353, %c56_354], %261 {strides = array<i32>} : memref<16x72xf32, #tpu.memory_space<vmem>>, vector<4x8xf32>,
    %c49_355 = arith.constant 49 : index
    %c0_356 = arith.constant 0 : index
    %263 = tpu.strided_load %arg15[%c49_355, %c0_356] {strides = array<i32: 2, 1>} : memref<176x8xf32, #tpu.memory_space<vmem>>, vector<4x8xf32>
    %c0_357 = arith.constant 0 : index
    %c64_358 = arith.constant 64 : index
    %264 = vector.load %arg12[%c0_357, %c64_358] : memref<16x72xf32, #tpu.memory_space<vmem>>, vector<4x8xf32>
    tpu.vector_store %arg12[%c0_357, %c64_358], %263 {strides = array<i32>} : memref<16x72xf32, #tpu.memory_space<vmem>>, vector<4x8xf32>,
    %c47_359 = arith.constant 47 : index
    %c0_360 = arith.constant 0 : index
    %265 = tpu.strided_load %arg15[%c47_359, %c0_360] {strides = array<i32: 2, 1>} : memref<176x8xf32, #tpu.memory_space<vmem>>, vector<4x8xf32>
    %c4_361 = arith.constant 4 : index
    %c0_362 = arith.constant 0 : index
    %266 = vector.load %arg12[%c4_361, %c0_362] : memref<16x72xf32, #tpu.memory_space<vmem>>, vector<4x8xf32>
    tpu.vector_store %arg12[%c4_361, %c0_362], %265 {strides = array<i32>} : memref<16x72xf32, #tpu.memory_space<vmem>>, vector<4x8xf32>,
    %c48_363 = arith.constant 48 : index
    %c0_364 = arith.constant 0 : index
    %267 = tpu.strided_load %arg15[%c48_363, %c0_364] {strides = array<i32: 2, 1>} : memref<176x8xf32, #tpu.memory_space<vmem>>, vector<4x8xf32>
    %c4_365 = arith.constant 4 : index
    %c8_366 = arith.constant 8 : index
    %268 = vector.load %arg12[%c4_365, %c8_366] : memref<16x72xf32, #tpu.memory_space<vmem>>, vector<4x8xf32>
    tpu.vector_store %arg12[%c4_365, %c8_366], %267 {strides = array<i32>} : memref<16x72xf32, #tpu.memory_space<vmem>>, vector<4x8xf32>,
    %c49_367 = arith.constant 49 : index
    %c0_368 = arith.constant 0 : index
    %269 = tpu.strided_load %arg15[%c49_367, %c0_368] {strides = array<i32: 2, 1>} : memref<176x8xf32, #tpu.memory_space<vmem>>, vector<4x8xf32>
    %c4_369 = arith.constant 4 : index
    %c16_370 = arith.constant 16 : index
    %270 = vector.load %arg12[%c4_369, %c16_370] : memref<16x72xf32, #tpu.memory_space<vmem>>, vector<4x8xf32>
    tpu.vector_store %arg12[%c4_369, %c16_370], %269 {strides = array<i32>} : memref<16x72xf32, #tpu.memory_space<vmem>>, vector<4x8xf32>,
    %c63 = arith.constant 63 : index
    %c0_371 = arith.constant 0 : index
    %271 = tpu.strided_load %arg15[%c63, %c0_371] {strides = array<i32: 2, 1>} : memref<176x8xf32, #tpu.memory_space<vmem>>, vector<4x8xf32>
    %c4_372 = arith.constant 4 : index
    %c24_373 = arith.constant 24 : index
    %272 = vector.load %arg12[%c4_372, %c24_373] : memref<16x72xf32, #tpu.memory_space<vmem>>, vector<4x8xf32>
    tpu.vector_store %arg12[%c4_372, %c24_373], %271 {strides = array<i32>} : memref<16x72xf32, #tpu.memory_space<vmem>>, vector<4x8xf32>,
    %c64_374 = arith.constant 64 : index
    %c0_375 = arith.constant 0 : index
    %273 = tpu.strided_load %arg15[%c64_374, %c0_375] {strides = array<i32: 2, 1>} : memref<176x8xf32, #tpu.memory_space<vmem>>, vector<4x8xf32>
    %c4_376 = arith.constant 4 : index
    %c32_377 = arith.constant 32 : index
    %274 = vector.load %arg12[%c4_376, %c32_377] : memref<16x72xf32, #tpu.memory_space<vmem>>, vector<4x8xf32>
    tpu.vector_store %arg12[%c4_376, %c32_377], %273 {strides = array<i32>} : memref<16x72xf32, #tpu.memory_space<vmem>>, vector<4x8xf32>,
    %c65 = arith.constant 65 : index
    %c0_378 = arith.constant 0 : index
    %275 = tpu.strided_load %arg15[%c65, %c0_378] {strides = array<i32: 2, 1>} : memref<176x8xf32, #tpu.memory_space<vmem>>, vector<4x8xf32>
    %c4_379 = arith.constant 4 : index
    %c40_380 = arith.constant 40 : index
    %276 = vector.load %arg12[%c4_379, %c40_380] : memref<16x72xf32, #tpu.memory_space<vmem>>, vector<4x8xf32>
    tpu.vector_store %arg12[%c4_379, %c40_380], %275 {strides = array<i32>} : memref<16x72xf32, #tpu.memory_space<vmem>>, vector<4x8xf32>,
    %c79 = arith.constant 79 : index
    %c0_381 = arith.constant 0 : index
    %277 = tpu.strided_load %arg15[%c79, %c0_381] {strides = array<i32: 2, 1>} : memref<176x8xf32, #tpu.memory_space<vmem>>, vector<4x8xf32>
    %c4_382 = arith.constant 4 : index
    %c48_383 = arith.constant 48 : index
    %278 = vector.load %arg12[%c4_382, %c48_383] : memref<16x72xf32, #tpu.memory_space<vmem>>, vector<4x8xf32>
    tpu.vector_store %arg12[%c4_382, %c48_383], %277 {strides = array<i32>} : memref<16x72xf32, #tpu.memory_space<vmem>>, vector<4x8xf32>,
    %c80_384 = arith.constant 80 : index
    %c0_385 = arith.constant 0 : index
    %279 = tpu.strided_load %arg15[%c80_384, %c0_385] {strides = array<i32: 2, 1>} : memref<176x8xf32, #tpu.memory_space<vmem>>, vector<4x8xf32>
    %c4_386 = arith.constant 4 : index
    %c56_387 = arith.constant 56 : index
    %280 = vector.load %arg12[%c4_386, %c56_387] : memref<16x72xf32, #tpu.memory_space<vmem>>, vector<4x8xf32>
    tpu.vector_store %arg12[%c4_386, %c56_387], %279 {strides = array<i32>} : memref<16x72xf32, #tpu.memory_space<vmem>>, vector<4x8xf32>,
    %c81 = arith.constant 81 : index
    %c0_388 = arith.constant 0 : index
    %281 = tpu.strided_load %arg15[%c81, %c0_388] {strides = array<i32: 2, 1>} : memref<176x8xf32, #tpu.memory_space<vmem>>, vector<4x8xf32>
    %c4_389 = arith.constant 4 : index
    %c64_390 = arith.constant 64 : index
    %282 = vector.load %arg12[%c4_389, %c64_390] : memref<16x72xf32, #tpu.memory_space<vmem>>, vector<4x8xf32>
    tpu.vector_store %arg12[%c4_389, %c64_390], %281 {strides = array<i32>} : memref<16x72xf32, #tpu.memory_space<vmem>>, vector<4x8xf32>,
    %c79_391 = arith.constant 79 : index
    %c0_392 = arith.constant 0 : index
    %283 = tpu.strided_load %arg15[%c79_391, %c0_392] {strides = array<i32: 2, 1>} : memref<176x8xf32, #tpu.memory_space<vmem>>, vector<4x8xf32>
    %c8_393 = arith.constant 8 : index
    %c0_394 = arith.constant 0 : index
    %284 = vector.load %arg12[%c8_393, %c0_394] : memref<16x72xf32, #tpu.memory_space<vmem>>, vector<4x8xf32>
    tpu.vector_store %arg12[%c8_393, %c0_394], %283 {strides = array<i32>} : memref<16x72xf32, #tpu.memory_space<vmem>>, vector<4x8xf32>,
    %c80_395 = arith.constant 80 : index
    %c0_396 = arith.constant 0 : index
    %285 = tpu.strided_load %arg15[%c80_395, %c0_396] {strides = array<i32: 2, 1>} : memref<176x8xf32, #tpu.memory_space<vmem>>, vector<4x8xf32>
    %c8_397 = arith.constant 8 : index
    %c8_398 = arith.constant 8 : index
    %286 = vector.load %arg12[%c8_397, %c8_398] : memref<16x72xf32, #tpu.memory_space<vmem>>, vector<4x8xf32>
    tpu.vector_store %arg12[%c8_397, %c8_398], %285 {strides = array<i32>} : memref<16x72xf32, #tpu.memory_space<vmem>>, vector<4x8xf32>,
    %c81_399 = arith.constant 81 : index
    %c0_400 = arith.constant 0 : index
    %287 = tpu.strided_load %arg15[%c81_399, %c0_400] {strides = array<i32: 2, 1>} : memref<176x8xf32, #tpu.memory_space<vmem>>, vector<4x8xf32>
    %c8_401 = arith.constant 8 : index
    %c16_402 = arith.constant 16 : index
    %288 = vector.load %arg12[%c8_401, %c16_402] : memref<16x72xf32, #tpu.memory_space<vmem>>, vector<4x8xf32>
    tpu.vector_store %arg12[%c8_401, %c16_402], %287 {strides = array<i32>} : memref<16x72xf32, #tpu.memory_space<vmem>>, vector<4x8xf32>,
    %c95_403 = arith.constant 95 : index
    %c0_404 = arith.constant 0 : index
    %289 = tpu.strided_load %arg15[%c95_403, %c0_404] {strides = array<i32: 2, 1>} : memref<176x8xf32, #tpu.memory_space<vmem>>, vector<4x8xf32>
    %c8_405 = arith.constant 8 : index
    %c24_406 = arith.constant 24 : index
    %290 = vector.load %arg12[%c8_405, %c24_406] : memref<16x72xf32, #tpu.memory_space<vmem>>, vector<4x8xf32>
    tpu.vector_store %arg12[%c8_405, %c24_406], %289 {strides = array<i32>} : memref<16x72xf32, #tpu.memory_space<vmem>>, vector<4x8xf32>,
    %c96_407 = arith.constant 96 : index
    %c0_408 = arith.constant 0 : index
    %291 = tpu.strided_load %arg15[%c96_407, %c0_408] {strides = array<i32: 2, 1>} : memref<176x8xf32, #tpu.memory_space<vmem>>, vector<4x8xf32>
    %c8_409 = arith.constant 8 : index
    %c32_410 = arith.constant 32 : index
    %292 = vector.load %arg12[%c8_409, %c32_410] : memref<16x72xf32, #tpu.memory_space<vmem>>, vector<4x8xf32>
    tpu.vector_store %arg12[%c8_409, %c32_410], %291 {strides = array<i32>} : memref<16x72xf32, #tpu.memory_space<vmem>>, vector<4x8xf32>,
    %c97_411 = arith.constant 97 : index
    %c0_412 = arith.constant 0 : index
    %293 = tpu.strided_load %arg15[%c97_411, %c0_412] {strides = array<i32: 2, 1>} : memref<176x8xf32, #tpu.memory_space<vmem>>, vector<4x8xf32>
    %c8_413 = arith.constant 8 : index
    %c40_414 = arith.constant 40 : index
    %294 = vector.load %arg12[%c8_413, %c40_414] : memref<16x72xf32, #tpu.memory_space<vmem>>, vector<4x8xf32>
    tpu.vector_store %arg12[%c8_413, %c40_414], %293 {strides = array<i32>} : memref<16x72xf32, #tpu.memory_space<vmem>>, vector<4x8xf32>,
    %c111 = arith.constant 111 : index
    %c0_415 = arith.constant 0 : index
    %295 = tpu.strided_load %arg15[%c111, %c0_415] {strides = array<i32: 2, 1>} : memref<176x8xf32, #tpu.memory_space<vmem>>, vector<4x8xf32>
    %c8_416 = arith.constant 8 : index
    %c48_417 = arith.constant 48 : index
    %296 = vector.load %arg12[%c8_416, %c48_417] : memref<16x72xf32, #tpu.memory_space<vmem>>, vector<4x8xf32>
    tpu.vector_store %arg12[%c8_416, %c48_417], %295 {strides = array<i32>} : memref<16x72xf32, #tpu.memory_space<vmem>>, vector<4x8xf32>,
    %c112_418 = arith.constant 112 : index
    %c0_419 = arith.constant 0 : index
    %297 = tpu.strided_load %arg15[%c112_418, %c0_419] {strides = array<i32: 2, 1>} : memref<176x8xf32, #tpu.memory_space<vmem>>, vector<4x8xf32>
    %c8_420 = arith.constant 8 : index
    %c56_421 = arith.constant 56 : index
    %298 = vector.load %arg12[%c8_420, %c56_421] : memref<16x72xf32, #tpu.memory_space<vmem>>, vector<4x8xf32>
    tpu.vector_store %arg12[%c8_420, %c56_421], %297 {strides = array<i32>} : memref<16x72xf32, #tpu.memory_space<vmem>>, vector<4x8xf32>,
    %c113 = arith.constant 113 : index
    %c0_422 = arith.constant 0 : index
    %299 = tpu.strided_load %arg15[%c113, %c0_422] {strides = array<i32: 2, 1>} : memref<176x8xf32, #tpu.memory_space<vmem>>, vector<4x8xf32>
    %c8_423 = arith.constant 8 : index
    %c64_424 = arith.constant 64 : index
    %300 = vector.load %arg12[%c8_423, %c64_424] : memref<16x72xf32, #tpu.memory_space<vmem>>, vector<4x8xf32>
    tpu.vector_store %arg12[%c8_423, %c64_424], %299 {strides = array<i32>} : memref<16x72xf32, #tpu.memory_space<vmem>>, vector<4x8xf32>,
    %c111_425 = arith.constant 111 : index
    %c0_426 = arith.constant 0 : index
    %301 = tpu.strided_load %arg15[%c111_425, %c0_426] {strides = array<i32: 2, 1>} : memref<176x8xf32, #tpu.memory_space<vmem>>, vector<4x8xf32>
    %c12_427 = arith.constant 12 : index
    %c0_428 = arith.constant 0 : index
    %302 = vector.load %arg12[%c12_427, %c0_428] : memref<16x72xf32, #tpu.memory_space<vmem>>, vector<4x8xf32>
    tpu.vector_store %arg12[%c12_427, %c0_428], %301 {strides = array<i32>} : memref<16x72xf32, #tpu.memory_space<vmem>>, vector<4x8xf32>,
    %c112_429 = arith.constant 112 : index
    %c0_430 = arith.constant 0 : index
    %303 = tpu.strided_load %arg15[%c112_429, %c0_430] {strides = array<i32: 2, 1>} : memref<176x8xf32, #tpu.memory_space<vmem>>, vector<4x8xf32>
    %c12_431 = arith.constant 12 : index
    %c8_432 = arith.constant 8 : index
    %304 = vector.load %arg12[%c12_431, %c8_432] : memref<16x72xf32, #tpu.memory_space<vmem>>, vector<4x8xf32>
    tpu.vector_store %arg12[%c12_431, %c8_432], %303 {strides = array<i32>} : memref<16x72xf32, #tpu.memory_space<vmem>>, vector<4x8xf32>,
    %c113_433 = arith.constant 113 : index
    %c0_434 = arith.constant 0 : index
    %305 = tpu.strided_load %arg15[%c113_433, %c0_434] {strides = array<i32: 2, 1>} : memref<176x8xf32, #tpu.memory_space<vmem>>, vector<4x8xf32>
    %c12_435 = arith.constant 12 : index
    %c16_436 = arith.constant 16 : index
    %306 = vector.load %arg12[%c12_435, %c16_436] : memref<16x72xf32, #tpu.memory_space<vmem>>, vector<4x8xf32>
    tpu.vector_store %arg12[%c12_435, %c16_436], %305 {strides = array<i32>} : memref<16x72xf32, #tpu.memory_space<vmem>>, vector<4x8xf32>,
    %c127 = arith.constant 127 : index
    %c0_437 = arith.constant 0 : index
    %307 = tpu.strided_load %arg15[%c127, %c0_437] {strides = array<i32: 2, 1>} : memref<176x8xf32, #tpu.memory_space<vmem>>, vector<4x8xf32>
    %c12_438 = arith.constant 12 : index
    %c24_439 = arith.constant 24 : index
    %308 = vector.load %arg12[%c12_438, %c24_439] : memref<16x72xf32, #tpu.memory_space<vmem>>, vector<4x8xf32>
    tpu.vector_store %arg12[%c12_438, %c24_439], %307 {strides = array<i32>} : memref<16x72xf32, #tpu.memory_space<vmem>>, vector<4x8xf32>,
    %c128_440 = arith.constant 128 : index
    %c0_441 = arith.constant 0 : index
    %309 = tpu.strided_load %arg15[%c128_440, %c0_441] {strides = array<i32: 2, 1>} : memref<176x8xf32, #tpu.memory_space<vmem>>, vector<4x8xf32>
    %c12_442 = arith.constant 12 : index
    %c32_443 = arith.constant 32 : index
    %310 = vector.load %arg12[%c12_442, %c32_443] : memref<16x72xf32, #tpu.memory_space<vmem>>, vector<4x8xf32>
    tpu.vector_store %arg12[%c12_442, %c32_443], %309 {strides = array<i32>} : memref<16x72xf32, #tpu.memory_space<vmem>>, vector<4x8xf32>,
    %c129 = arith.constant 129 : index
    %c0_444 = arith.constant 0 : index
    %311 = tpu.strided_load %arg15[%c129, %c0_444] {strides = array<i32: 2, 1>} : memref<176x8xf32, #tpu.memory_space<vmem>>, vector<4x8xf32>
    %c12_445 = arith.constant 12 : index
    %c40_446 = arith.constant 40 : index
    %312 = vector.load %arg12[%c12_445, %c40_446] : memref<16x72xf32, #tpu.memory_space<vmem>>, vector<4x8xf32>
    tpu.vector_store %arg12[%c12_445, %c40_446], %311 {strides = array<i32>} : memref<16x72xf32, #tpu.memory_space<vmem>>, vector<4x8xf32>,
    %c143_447 = arith.constant 143 : index
    %c0_448 = arith.constant 0 : index
    %313 = tpu.strided_load %arg15[%c143_447, %c0_448] {strides = array<i32: 2, 1>} : memref<176x8xf32, #tpu.memory_space<vmem>>, vector<4x8xf32>
    %c12_449 = arith.constant 12 : index
    %c48_450 = arith.constant 48 : index
    %314 = vector.load %arg12[%c12_449, %c48_450] : memref<16x72xf32, #tpu.memory_space<vmem>>, vector<4x8xf32>
    tpu.vector_store %arg12[%c12_449, %c48_450], %313 {strides = array<i32>} : memref<16x72xf32, #tpu.memory_space<vmem>>, vector<4x8xf32>,
    %c144_451 = arith.constant 144 : index
    %c0_452 = arith.constant 0 : index
    %315 = tpu.strided_load %arg15[%c144_451, %c0_452] {strides = array<i32: 2, 1>} : memref<176x8xf32, #tpu.memory_space<vmem>>, vector<4x8xf32>
    %c12_453 = arith.constant 12 : index
    %c56_454 = arith.constant 56 : index
    %316 = vector.load %arg12[%c12_453, %c56_454] : memref<16x72xf32, #tpu.memory_space<vmem>>, vector<4x8xf32>
    tpu.vector_store %arg12[%c12_453, %c56_454], %315 {strides = array<i32>} : memref<16x72xf32, #tpu.memory_space<vmem>>, vector<4x8xf32>,
    %c145_455 = arith.constant 145 : index
    %c0_456 = arith.constant 0 : index
    %317 = tpu.strided_load %arg15[%c145_455, %c0_456] {strides = array<i32: 2, 1>} : memref<176x8xf32, #tpu.memory_space<vmem>>, vector<4x8xf32>
    %c12_457 = arith.constant 12 : index
    %c64_458 = arith.constant 64 : index
    %318 = vector.load %arg12[%c12_457, %c64_458] : memref<16x72xf32, #tpu.memory_space<vmem>>, vector<4x8xf32>
    tpu.vector_store %arg12[%c12_457, %c64_458], %317 {strides = array<i32>} : memref<16x72xf32, #tpu.memory_space<vmem>>, vector<4x8xf32>,
    %c0_459 = arith.constant 0 : index
    %c0_460 = arith.constant 0 : index
    %319 = vector.load %arg12[%c0_459, %c0_460] : memref<16x72xf32, #tpu.memory_space<vmem>>, vector<16x72xf32>
    %320 = arith.truncf %319 : vector<16x72xf32> to vector<16x72xbf16>
    %c0_461 = arith.constant 0 : index
    %c0_462 = arith.constant 0 : index
    %321 = vector.load %arg4[%c0_461, %c0_462] : memref<72x128xbf16, #tpu.memory_space<vmem>>, vector<72x128xbf16>
    %cst_463 = arith.constant dense<0.000000e+00> : vector<16x128xf32>
    %322 = tpu.matmul %320, %321, %cst_463 {dimension_numbers = #tpu.dot_dimension_numbers<[1], [0], [0], [1], [0, 0, 1, 1], [], []>} : vector<16x72xbf16>, vector<72x128xbf16>, vector<16x128xf32> -> vector<16x128xf32>
    %c0_464 = arith.constant 0 : index
    %c0_465 = arith.constant 0 : index
    %323 = vector.load %arg5[%c0_464, %c0_465] : memref<1x128xf32, #tpu.memory_space<vmem>>, vector<1x128xf32>
    %324 = vector.broadcast %323 : vector<1x128xf32> to vector<16x128xf32>
    %325 = arith.addf %322, %324 : vector<16x128xf32>
    %cst_466 = arith.constant 0.000000e+00 : f32
    %326 = vector.broadcast %cst_466 : f32 to vector<16x128xf32>
    %327 = arith.maximumf %325, %326 : vector<16x128xf32>
    %cst_467 = arith.constant 0.000000e+00 : f32
    %328 = vector.broadcast %cst_467 : f32 to vector<56x16xf32>
    %c0_468 = arith.constant 0 : index
    %c0_469 = arith.constant 0 : index
    %329 = vector.load %arg16[%c0_468, %c0_469] : memref<56x16xf32, #tpu.memory_space<vmem>>, vector<56x16xf32>
    tpu.vector_store %arg16[%c0_468, %c0_469], %328 {strides = array<i32>} : memref<56x16xf32, #tpu.memory_space<vmem>>, vector<56x16xf32>,
    %330 = vector.extract_strided_slice %327 {offsets = [0, 0], sizes = [4, 16], strides = [1, 1]} : vector<16x128xf32> to vector<4x16xf32>
    %c16_470 = arith.constant 16 : index
    %c0_471 = arith.constant 0 : index
    %331 = vector.load %arg16[%c16_470, %c0_471] : memref<56x16xf32, #tpu.memory_space<vmem>>, vector<4x16xf32>
    tpu.vector_store %arg16[%c16_470, %c0_471], %330 {strides = array<i32>} : memref<56x16xf32, #tpu.memory_space<vmem>>, vector<4x16xf32>,
    %332 = vector.extract_strided_slice %327 {offsets = [4, 0], sizes = [4, 16], strides = [1, 1]} : vector<16x128xf32> to vector<4x16xf32>
    %c24_472 = arith.constant 24 : index
    %c0_473 = arith.constant 0 : index
    %333 = vector.load %arg16[%c24_472, %c0_473] : memref<56x16xf32, #tpu.memory_space<vmem>>, vector<4x16xf32>
    tpu.vector_store %arg16[%c24_472, %c0_473], %332 {strides = array<i32>} : memref<56x16xf32, #tpu.memory_space<vmem>>, vector<4x16xf32>,
    %334 = vector.extract_strided_slice %327 {offsets = [8, 0], sizes = [4, 16], strides = [1, 1]} : vector<16x128xf32> to vector<4x16xf32>
    %c32_474 = arith.constant 32 : index
    %c0_475 = arith.constant 0 : index
    %335 = vector.load %arg16[%c32_474, %c0_475] : memref<56x16xf32, #tpu.memory_space<vmem>>, vector<4x16xf32>
    tpu.vector_store %arg16[%c32_474, %c0_475], %334 {strides = array<i32>} : memref<56x16xf32, #tpu.memory_space<vmem>>, vector<4x16xf32>,
    %336 = vector.extract_strided_slice %327 {offsets = [12, 0], sizes = [4, 16], strides = [1, 1]} : vector<16x128xf32> to vector<4x16xf32>
    %c40_476 = arith.constant 40 : index
    %c0_477 = arith.constant 0 : index
    %337 = vector.load %arg16[%c40_476, %c0_477] : memref<56x16xf32, #tpu.memory_space<vmem>>, vector<4x16xf32>
    tpu.vector_store %arg16[%c40_476, %c0_477], %336 {strides = array<i32>} : memref<56x16xf32, #tpu.memory_space<vmem>>, vector<4x16xf32>,
    %cst_478 = arith.constant 0.000000e+00 : f32
    %338 = vector.broadcast %cst_478 : f32 to vector<8x144xf32>
    %c0_479 = arith.constant 0 : index
    %c0_480 = arith.constant 0 : index
    %339 = vector.load %arg13[%c0_479, %c0_480] : memref<8x144xf32, #tpu.memory_space<vmem>>, vector<8x144xf32>
    tpu.vector_store %arg13[%c0_479, %c0_480], %338 {strides = array<i32>} : memref<8x144xf32, #tpu.memory_space<vmem>>, vector<8x144xf32>,
    %c7 = arith.constant 7 : index
    %c0_481 = arith.constant 0 : index
    %340 = tpu.strided_load %arg16[%c7, %c0_481] {strides = array<i32: 2, 1>} : memref<56x16xf32, #tpu.memory_space<vmem>>, vector<2x16xf32>
    %c0_482 = arith.constant 0 : index
    %c0_483 = arith.constant 0 : index
    %341 = vector.load %arg13[%c0_482, %c0_483] : memref<8x144xf32, #tpu.memory_space<vmem>>, vector<2x16xf32>
    tpu.vector_store %arg13[%c0_482, %c0_483], %340 {strides = array<i32>} : memref<8x144xf32, #tpu.memory_space<vmem>>, vector<2x16xf32>,
    %c8_484 = arith.constant 8 : index
    %c0_485 = arith.constant 0 : index
    %342 = tpu.strided_load %arg16[%c8_484, %c0_485] {strides = array<i32: 2, 1>} : memref<56x16xf32, #tpu.memory_space<vmem>>, vector<2x16xf32>
    %c0_486 = arith.constant 0 : index
    %c16_487 = arith.constant 16 : index
    %343 = vector.load %arg13[%c0_486, %c16_487] : memref<8x144xf32, #tpu.memory_space<vmem>>, vector<2x16xf32>
    tpu.vector_store %arg13[%c0_486, %c16_487], %342 {strides = array<i32>} : memref<8x144xf32, #tpu.memory_space<vmem>>, vector<2x16xf32>,
    %c9 = arith.constant 9 : index
    %c0_488 = arith.constant 0 : index
    %344 = tpu.strided_load %arg16[%c9, %c0_488] {strides = array<i32: 2, 1>} : memref<56x16xf32, #tpu.memory_space<vmem>>, vector<2x16xf32>
    %c0_489 = arith.constant 0 : index
    %c32_490 = arith.constant 32 : index
    %345 = vector.load %arg13[%c0_489, %c32_490] : memref<8x144xf32, #tpu.memory_space<vmem>>, vector<2x16xf32>
    tpu.vector_store %arg13[%c0_489, %c32_490], %344 {strides = array<i32>} : memref<8x144xf32, #tpu.memory_space<vmem>>, vector<2x16xf32>,
    %c15_491 = arith.constant 15 : index
    %c0_492 = arith.constant 0 : index
    %346 = tpu.strided_load %arg16[%c15_491, %c0_492] {strides = array<i32: 2, 1>} : memref<56x16xf32, #tpu.memory_space<vmem>>, vector<2x16xf32>
    %c0_493 = arith.constant 0 : index
    %c48_494 = arith.constant 48 : index
    %347 = vector.load %arg13[%c0_493, %c48_494] : memref<8x144xf32, #tpu.memory_space<vmem>>, vector<2x16xf32>
    tpu.vector_store %arg13[%c0_493, %c48_494], %346 {strides = array<i32>} : memref<8x144xf32, #tpu.memory_space<vmem>>, vector<2x16xf32>,
    %c16_495 = arith.constant 16 : index
    %c0_496 = arith.constant 0 : index
    %348 = tpu.strided_load %arg16[%c16_495, %c0_496] {strides = array<i32: 2, 1>} : memref<56x16xf32, #tpu.memory_space<vmem>>, vector<2x16xf32>
    %c0_497 = arith.constant 0 : index
    %c64_498 = arith.constant 64 : index
    %349 = vector.load %arg13[%c0_497, %c64_498] : memref<8x144xf32, #tpu.memory_space<vmem>>, vector<2x16xf32>
    tpu.vector_store %arg13[%c0_497, %c64_498], %348 {strides = array<i32>} : memref<8x144xf32, #tpu.memory_space<vmem>>, vector<2x16xf32>,
    %c17_499 = arith.constant 17 : index
    %c0_500 = arith.constant 0 : index
    %350 = tpu.strided_load %arg16[%c17_499, %c0_500] {strides = array<i32: 2, 1>} : memref<56x16xf32, #tpu.memory_space<vmem>>, vector<2x16xf32>
    %c0_501 = arith.constant 0 : index
    %c80_502 = arith.constant 80 : index
    %351 = vector.load %arg13[%c0_501, %c80_502] : memref<8x144xf32, #tpu.memory_space<vmem>>, vector<2x16xf32>
    tpu.vector_store %arg13[%c0_501, %c80_502], %350 {strides = array<i32>} : memref<8x144xf32, #tpu.memory_space<vmem>>, vector<2x16xf32>,
    %c23_503 = arith.constant 23 : index
    %c0_504 = arith.constant 0 : index
    %352 = tpu.strided_load %arg16[%c23_503, %c0_504] {strides = array<i32: 2, 1>} : memref<56x16xf32, #tpu.memory_space<vmem>>, vector<2x16xf32>
    %c0_505 = arith.constant 0 : index
    %c96_506 = arith.constant 96 : index
    %353 = vector.load %arg13[%c0_505, %c96_506] : memref<8x144xf32, #tpu.memory_space<vmem>>, vector<2x16xf32>
    tpu.vector_store %arg13[%c0_505, %c96_506], %352 {strides = array<i32>} : memref<8x144xf32, #tpu.memory_space<vmem>>, vector<2x16xf32>,
    %c24_507 = arith.constant 24 : index
    %c0_508 = arith.constant 0 : index
    %354 = tpu.strided_load %arg16[%c24_507, %c0_508] {strides = array<i32: 2, 1>} : memref<56x16xf32, #tpu.memory_space<vmem>>, vector<2x16xf32>
    %c0_509 = arith.constant 0 : index
    %c112_510 = arith.constant 112 : index
    %355 = vector.load %arg13[%c0_509, %c112_510] : memref<8x144xf32, #tpu.memory_space<vmem>>, vector<2x16xf32>
    tpu.vector_store %arg13[%c0_509, %c112_510], %354 {strides = array<i32>} : memref<8x144xf32, #tpu.memory_space<vmem>>, vector<2x16xf32>,
    %c25_511 = arith.constant 25 : index
    %c0_512 = arith.constant 0 : index
    %356 = tpu.strided_load %arg16[%c25_511, %c0_512] {strides = array<i32: 2, 1>} : memref<56x16xf32, #tpu.memory_space<vmem>>, vector<2x16xf32>
    %c0_513 = arith.constant 0 : index
    %c128_514 = arith.constant 128 : index
    %357 = vector.load %arg13[%c0_513, %c128_514] : memref<8x144xf32, #tpu.memory_space<vmem>>, vector<2x16xf32>
    tpu.vector_store %arg13[%c0_513, %c128_514], %356 {strides = array<i32>} : memref<8x144xf32, #tpu.memory_space<vmem>>, vector<2x16xf32>,
    %c23_515 = arith.constant 23 : index
    %c0_516 = arith.constant 0 : index
    %358 = tpu.strided_load %arg16[%c23_515, %c0_516] {strides = array<i32: 2, 1>} : memref<56x16xf32, #tpu.memory_space<vmem>>, vector<2x16xf32>
    %c2 = arith.constant 2 : index
    %c0_517 = arith.constant 0 : index
    %359 = vector.load %arg13[%c2, %c0_517] : memref<8x144xf32, #tpu.memory_space<vmem>>, vector<2x16xf32>
    tpu.vector_store %arg13[%c2, %c0_517], %358 {strides = array<i32>} : memref<8x144xf32, #tpu.memory_space<vmem>>, vector<2x16xf32>,
    %c24_518 = arith.constant 24 : index
    %c0_519 = arith.constant 0 : index
    %360 = tpu.strided_load %arg16[%c24_518, %c0_519] {strides = array<i32: 2, 1>} : memref<56x16xf32, #tpu.memory_space<vmem>>, vector<2x16xf32>
    %c2_520 = arith.constant 2 : index
    %c16_521 = arith.constant 16 : index
    %361 = vector.load %arg13[%c2_520, %c16_521] : memref<8x144xf32, #tpu.memory_space<vmem>>, vector<2x16xf32>
    tpu.vector_store %arg13[%c2_520, %c16_521], %360 {strides = array<i32>} : memref<8x144xf32, #tpu.memory_space<vmem>>, vector<2x16xf32>,
    %c25_522 = arith.constant 25 : index
    %c0_523 = arith.constant 0 : index
    %362 = tpu.strided_load %arg16[%c25_522, %c0_523] {strides = array<i32: 2, 1>} : memref<56x16xf32, #tpu.memory_space<vmem>>, vector<2x16xf32>
    %c2_524 = arith.constant 2 : index
    %c32_525 = arith.constant 32 : index
    %363 = vector.load %arg13[%c2_524, %c32_525] : memref<8x144xf32, #tpu.memory_space<vmem>>, vector<2x16xf32>
    tpu.vector_store %arg13[%c2_524, %c32_525], %362 {strides = array<i32>} : memref<8x144xf32, #tpu.memory_space<vmem>>, vector<2x16xf32>,
    %c31_526 = arith.constant 31 : index
    %c0_527 = arith.constant 0 : index
    %364 = tpu.strided_load %arg16[%c31_526, %c0_527] {strides = array<i32: 2, 1>} : memref<56x16xf32, #tpu.memory_space<vmem>>, vector<2x16xf32>
    %c2_528 = arith.constant 2 : index
    %c48_529 = arith.constant 48 : index
    %365 = vector.load %arg13[%c2_528, %c48_529] : memref<8x144xf32, #tpu.memory_space<vmem>>, vector<2x16xf32>
    tpu.vector_store %arg13[%c2_528, %c48_529], %364 {strides = array<i32>} : memref<8x144xf32, #tpu.memory_space<vmem>>, vector<2x16xf32>,
    %c32_530 = arith.constant 32 : index
    %c0_531 = arith.constant 0 : index
    %366 = tpu.strided_load %arg16[%c32_530, %c0_531] {strides = array<i32: 2, 1>} : memref<56x16xf32, #tpu.memory_space<vmem>>, vector<2x16xf32>
    %c2_532 = arith.constant 2 : index
    %c64_533 = arith.constant 64 : index
    %367 = vector.load %arg13[%c2_532, %c64_533] : memref<8x144xf32, #tpu.memory_space<vmem>>, vector<2x16xf32>
    tpu.vector_store %arg13[%c2_532, %c64_533], %366 {strides = array<i32>} : memref<8x144xf32, #tpu.memory_space<vmem>>, vector<2x16xf32>,
    %c33_534 = arith.constant 33 : index
    %c0_535 = arith.constant 0 : index
    %368 = tpu.strided_load %arg16[%c33_534, %c0_535] {strides = array<i32: 2, 1>} : memref<56x16xf32, #tpu.memory_space<vmem>>, vector<2x16xf32>
    %c2_536 = arith.constant 2 : index
    %c80_537 = arith.constant 80 : index
    %369 = vector.load %arg13[%c2_536, %c80_537] : memref<8x144xf32, #tpu.memory_space<vmem>>, vector<2x16xf32>
    tpu.vector_store %arg13[%c2_536, %c80_537], %368 {strides = array<i32>} : memref<8x144xf32, #tpu.memory_space<vmem>>, vector<2x16xf32>,
    %c39 = arith.constant 39 : index
    %c0_538 = arith.constant 0 : index
    %370 = tpu.strided_load %arg16[%c39, %c0_538] {strides = array<i32: 2, 1>} : memref<56x16xf32, #tpu.memory_space<vmem>>, vector<2x16xf32>
    %c2_539 = arith.constant 2 : index
    %c96_540 = arith.constant 96 : index
    %371 = vector.load %arg13[%c2_539, %c96_540] : memref<8x144xf32, #tpu.memory_space<vmem>>, vector<2x16xf32>
    tpu.vector_store %arg13[%c2_539, %c96_540], %370 {strides = array<i32>} : memref<8x144xf32, #tpu.memory_space<vmem>>, vector<2x16xf32>,
    %c40_541 = arith.constant 40 : index
    %c0_542 = arith.constant 0 : index
    %372 = tpu.strided_load %arg16[%c40_541, %c0_542] {strides = array<i32: 2, 1>} : memref<56x16xf32, #tpu.memory_space<vmem>>, vector<2x16xf32>
    %c2_543 = arith.constant 2 : index
    %c112_544 = arith.constant 112 : index
    %373 = vector.load %arg13[%c2_543, %c112_544] : memref<8x144xf32, #tpu.memory_space<vmem>>, vector<2x16xf32>
    tpu.vector_store %arg13[%c2_543, %c112_544], %372 {strides = array<i32>} : memref<8x144xf32, #tpu.memory_space<vmem>>, vector<2x16xf32>,
    %c41 = arith.constant 41 : index
    %c0_545 = arith.constant 0 : index
    %374 = tpu.strided_load %arg16[%c41, %c0_545] {strides = array<i32: 2, 1>} : memref<56x16xf32, #tpu.memory_space<vmem>>, vector<2x16xf32>
    %c2_546 = arith.constant 2 : index
    %c128_547 = arith.constant 128 : index
    %375 = vector.load %arg13[%c2_546, %c128_547] : memref<8x144xf32, #tpu.memory_space<vmem>>, vector<2x16xf32>
    tpu.vector_store %arg13[%c2_546, %c128_547], %374 {strides = array<i32>} : memref<8x144xf32, #tpu.memory_space<vmem>>, vector<2x16xf32>,
    %c0_548 = arith.constant 0 : index
    %c0_549 = arith.constant 0 : index
    %376 = vector.load %arg13[%c0_548, %c0_549] : memref<8x144xf32, #tpu.memory_space<vmem>>, vector<8x144xf32>
    %377 = arith.truncf %376 : vector<8x144xf32> to vector<8x144xbf16>
    %c0_550 = arith.constant 0 : index
    %c0_551 = arith.constant 0 : index
    %378 = vector.load %arg6[%c0_550, %c0_551] : memref<144x128xbf16, #tpu.memory_space<vmem>>, vector<144x128xbf16>
    %cst_552 = arith.constant dense<0.000000e+00> : vector<8x128xf32>
    %379 = tpu.matmul %377, %378, %cst_552 {dimension_numbers = #tpu.dot_dimension_numbers<[1], [0], [0], [1], [0, 0, 1, 1], [], []>} : vector<8x144xbf16>, vector<144x128xbf16>, vector<8x128xf32> -> vector<8x128xf32>
    %c0_553 = arith.constant 0 : index
    %c0_554 = arith.constant 0 : index
    %380 = vector.load %arg7[%c0_553, %c0_554] : memref<1x128xf32, #tpu.memory_space<vmem>>, vector<1x128xf32>
    %381 = vector.broadcast %380 : vector<1x128xf32> to vector<8x128xf32>
    %382 = arith.addf %379, %381 : vector<8x128xf32>
    %cst_555 = arith.constant 0.000000e+00 : f32
    %383 = vector.broadcast %cst_555 : f32 to vector<8x128xf32>
    %384 = arith.maximumf %382, %383 : vector<8x128xf32>
    %cst_556 = arith.constant 0.000000e+00 : f32
    %385 = vector.broadcast %cst_556 : f32 to vector<40x32xf32>
    %c0_557 = arith.constant 0 : index
    %c0_558 = arith.constant 0 : index
    %386 = vector.load %arg17[%c0_557, %c0_558] : memref<40x32xf32, #tpu.memory_space<vmem>>, vector<40x32xf32>
    tpu.vector_store %arg17[%c0_557, %c0_558], %385 {strides = array<i32>} : memref<40x32xf32, #tpu.memory_space<vmem>>, vector<40x32xf32>,
    %387 = vector.extract_strided_slice %384 {offsets = [0, 0], sizes = [2, 32], strides = [1, 1]} : vector<8x128xf32> to vector<2x32xf32>
    %c16_559 = arith.constant 16 : index
    %c0_560 = arith.constant 0 : index
    %388 = vector.load %arg17[%c16_559, %c0_560] : memref<40x32xf32, #tpu.memory_space<vmem>>, vector<2x32xf32>
    tpu.vector_store %arg17[%c16_559, %c0_560], %387 {strides = array<i32>} : memref<40x32xf32, #tpu.memory_space<vmem>>, vector<2x32xf32>,
    %389 = vector.extract_strided_slice %384 {offsets = [2, 0], sizes = [2, 32], strides = [1, 1]} : vector<8x128xf32> to vector<2x32xf32>
    %c24_561 = arith.constant 24 : index
    %c0_562 = arith.constant 0 : index
    %390 = vector.load %arg17[%c24_561, %c0_562] : memref<40x32xf32, #tpu.memory_space<vmem>>, vector<2x32xf32>
    tpu.vector_store %arg17[%c24_561, %c0_562], %389 {strides = array<i32>} : memref<40x32xf32, #tpu.memory_space<vmem>>, vector<2x32xf32>,
    %cst_563 = arith.constant 0.000000e+00 : f32
    %391 = vector.broadcast %cst_563 : f32 to vector<8x288xf32>
    %c0_564 = arith.constant 0 : index
    %c0_565 = arith.constant 0 : index
    %392 = vector.load %arg14[%c0_564, %c0_565] : memref<8x288xf32, #tpu.memory_space<vmem>>, vector<8x288xf32>
    tpu.vector_store %arg14[%c0_564, %c0_565], %391 {strides = array<i32>} : memref<8x288xf32, #tpu.memory_space<vmem>>, vector<8x288xf32>,
    %c7_566 = arith.constant 7 : index
    %c0_567 = arith.constant 0 : index
    %393 = vector.load %arg17[%c7_566, %c0_567] : memref<40x32xf32, #tpu.memory_space<vmem>>, vector<1x32xf32>
    %c0_568 = arith.constant 0 : index
    %c0_569 = arith.constant 0 : index
    %394 = vector.load %arg14[%c0_568, %c0_569] : memref<8x288xf32, #tpu.memory_space<vmem>>, vector<1x32xf32>
    tpu.vector_store %arg14[%c0_568, %c0_569], %393 {strides = array<i32>} : memref<8x288xf32, #tpu.memory_space<vmem>>, vector<1x32xf32>,
    %c8_570 = arith.constant 8 : index
    %c0_571 = arith.constant 0 : index
    %395 = vector.load %arg17[%c8_570, %c0_571] : memref<40x32xf32, #tpu.memory_space<vmem>>, vector<1x32xf32>
    %c0_572 = arith.constant 0 : index
    %c32_573 = arith.constant 32 : index
    %396 = vector.load %arg14[%c0_572, %c32_573] : memref<8x288xf32, #tpu.memory_space<vmem>>, vector<1x32xf32>
    tpu.vector_store %arg14[%c0_572, %c32_573], %395 {strides = array<i32>} : memref<8x288xf32, #tpu.memory_space<vmem>>, vector<1x32xf32>,
    %c9_574 = arith.constant 9 : index
    %c0_575 = arith.constant 0 : index
    %397 = vector.load %arg17[%c9_574, %c0_575] : memref<40x32xf32, #tpu.memory_space<vmem>>, vector<1x32xf32>
    %c0_576 = arith.constant 0 : index
    %c64_577 = arith.constant 64 : index
    %398 = vector.load %arg14[%c0_576, %c64_577] : memref<8x288xf32, #tpu.memory_space<vmem>>, vector<1x32xf32>
    tpu.vector_store %arg14[%c0_576, %c64_577], %397 {strides = array<i32>} : memref<8x288xf32, #tpu.memory_space<vmem>>, vector<1x32xf32>,
    %c15_578 = arith.constant 15 : index
    %c0_579 = arith.constant 0 : index
    %399 = vector.load %arg17[%c15_578, %c0_579] : memref<40x32xf32, #tpu.memory_space<vmem>>, vector<1x32xf32>
    %c0_580 = arith.constant 0 : index
    %c96_581 = arith.constant 96 : index
    %400 = vector.load %arg14[%c0_580, %c96_581] : memref<8x288xf32, #tpu.memory_space<vmem>>, vector<1x32xf32>
    tpu.vector_store %arg14[%c0_580, %c96_581], %399 {strides = array<i32>} : memref<8x288xf32, #tpu.memory_space<vmem>>, vector<1x32xf32>,
    %c16_582 = arith.constant 16 : index
    %c0_583 = arith.constant 0 : index
    %401 = vector.load %arg17[%c16_582, %c0_583] : memref<40x32xf32, #tpu.memory_space<vmem>>, vector<1x32xf32>
    %c0_584 = arith.constant 0 : index
    %c128_585 = arith.constant 128 : index
    %402 = vector.load %arg14[%c0_584, %c128_585] : memref<8x288xf32, #tpu.memory_space<vmem>>, vector<1x32xf32>
    tpu.vector_store %arg14[%c0_584, %c128_585], %401 {strides = array<i32>} : memref<8x288xf32, #tpu.memory_space<vmem>>, vector<1x32xf32>,
    %c17_586 = arith.constant 17 : index
    %c0_587 = arith.constant 0 : index
    %403 = vector.load %arg17[%c17_586, %c0_587] : memref<40x32xf32, #tpu.memory_space<vmem>>, vector<1x32xf32>
    %c0_588 = arith.constant 0 : index
    %c160 = arith.constant 160 : index
    %404 = vector.load %arg14[%c0_588, %c160] : memref<8x288xf32, #tpu.memory_space<vmem>>, vector<1x32xf32>
    tpu.vector_store %arg14[%c0_588, %c160], %403 {strides = array<i32>} : memref<8x288xf32, #tpu.memory_space<vmem>>, vector<1x32xf32>,
    %c23_589 = arith.constant 23 : index
    %c0_590 = arith.constant 0 : index
    %405 = vector.load %arg17[%c23_589, %c0_590] : memref<40x32xf32, #tpu.memory_space<vmem>>, vector<1x32xf32>
    %c0_591 = arith.constant 0 : index
    %c192_592 = arith.constant 192 : index
    %406 = vector.load %arg14[%c0_591, %c192_592] : memref<8x288xf32, #tpu.memory_space<vmem>>, vector<1x32xf32>
    tpu.vector_store %arg14[%c0_591, %c192_592], %405 {strides = array<i32>} : memref<8x288xf32, #tpu.memory_space<vmem>>, vector<1x32xf32>,
    %c24_593 = arith.constant 24 : index
    %c0_594 = arith.constant 0 : index
    %407 = vector.load %arg17[%c24_593, %c0_594] : memref<40x32xf32, #tpu.memory_space<vmem>>, vector<1x32xf32>
    %c0_595 = arith.constant 0 : index
    %c224 = arith.constant 224 : index
    %408 = vector.load %arg14[%c0_595, %c224] : memref<8x288xf32, #tpu.memory_space<vmem>>, vector<1x32xf32>
    tpu.vector_store %arg14[%c0_595, %c224], %407 {strides = array<i32>} : memref<8x288xf32, #tpu.memory_space<vmem>>, vector<1x32xf32>,
    %c25_596 = arith.constant 25 : index
    %c0_597 = arith.constant 0 : index
    %409 = vector.load %arg17[%c25_596, %c0_597] : memref<40x32xf32, #tpu.memory_space<vmem>>, vector<1x32xf32>
    %c0_598 = arith.constant 0 : index
    %c256 = arith.constant 256 : index
    %410 = vector.load %arg14[%c0_598, %c256] : memref<8x288xf32, #tpu.memory_space<vmem>>, vector<1x32xf32>
    tpu.vector_store %arg14[%c0_598, %c256], %409 {strides = array<i32>} : memref<8x288xf32, #tpu.memory_space<vmem>>, vector<1x32xf32>,
    %c0_599 = arith.constant 0 : index
    %c0_600 = arith.constant 0 : index
    %411 = vector.load %arg14[%c0_599, %c0_600] : memref<8x288xf32, #tpu.memory_space<vmem>>, vector<8x288xf32>
    %412 = arith.truncf %411 : vector<8x288xf32> to vector<8x288xbf16>
    %c0_601 = arith.constant 0 : index
    %c0_602 = arith.constant 0 : index
    %413 = vector.load %arg8[%c0_601, %c0_602] : memref<288x128xbf16, #tpu.memory_space<vmem>>, vector<288x128xbf16>
    %cst_603 = arith.constant dense<0.000000e+00> : vector<8x128xf32>
    %414 = tpu.matmul %412, %413, %cst_603 {dimension_numbers = #tpu.dot_dimension_numbers<[1], [0], [0], [1], [0, 0, 1, 1], [], []>} : vector<8x288xbf16>, vector<288x128xbf16>, vector<8x128xf32> -> vector<8x128xf32>
    %c0_604 = arith.constant 0 : index
    %c0_605 = arith.constant 0 : index
    %415 = vector.load %arg9[%c0_604, %c0_605] : memref<1x128xf32, #tpu.memory_space<vmem>>, vector<1x128xf32>
    %416 = vector.broadcast %415 : vector<1x128xf32> to vector<8x128xf32>
    %417 = arith.addf %414, %416 : vector<8x128xf32>
    %cst_606 = arith.constant 0.000000e+00 : f32
    %418 = vector.broadcast %cst_606 : f32 to vector<8x128xf32>
    %419 = arith.maximumf %417, %418 : vector<8x128xf32>
    %c0_607 = arith.constant 0 : index
    %c0_608 = arith.constant 0 : index
    %c0_609 = arith.constant 0 : index
    %420 = vector.load %arg10[%c0_607, %c0_608, %c0_609] : memref<1x8x128xf32, #tpu.memory_space<vmem>>, vector<1x8x128xf32>
    %421 = vector.shape_cast %420 : vector<1x8x128xf32> to vector<8x128xf32>
    %422 = vector.shape_cast %419 : vector<8x128xf32> to vector<1x8x128xf32>
    tpu.vector_store %arg10[%c0_607, %c0_608, %c0_609], %422 {strides = array<i32>} : memref<1x8x128xf32, #tpu.memory_space<vmem>>, vector<1x8x128xf32>,
    return
  }
  func.func @transform_0(%arg0: i32) -> (i32, i32, i32) {
    %c0_i32 = arith.constant 0 : i32
    %c0_i32_0 = arith.constant 0 : i32
    %c0_i32_1 = arith.constant 0 : i32
    return %arg0, %c0_i32, %c0_i32_0 : i32, i32, i32
  }
  func.func @transform_1(%arg0: i32) -> (i32, i32) {
    %c0_i32 = arith.constant 0 : i32
    %c0_i32_0 = arith.constant 0 : i32
    %c0_i32_1 = arith.constant 0 : i32
    return %c0_i32, %c0_i32_0 : i32, i32
  }
  func.func @transform_2(%arg0: i32) -> (i32, i32) {
    %c0_i32 = arith.constant 0 : i32
    %c0_i32_0 = arith.constant 0 : i32
    %c0_i32_1 = arith.constant 0 : i32
    return %c0_i32, %c0_i32_0 : i32, i32
  }
  func.func @transform_3(%arg0: i32) -> (i32, i32) {
    %c0_i32 = arith.constant 0 : i32
    %c0_i32_0 = arith.constant 0 : i32
    %c0_i32_1 = arith.constant 0 : i32
    return %c0_i32, %c0_i32_0 : i32, i32
  }
  func.func @transform_4(%arg0: i32) -> (i32, i32) {
    %c0_i32 = arith.constant 0 : i32
    %c0_i32_0 = arith.constant 0 : i32
    %c0_i32_1 = arith.constant 0 : i32
    return %c0_i32, %c0_i32_0 : i32, i32
  }
  func.func @transform_5(%arg0: i32) -> (i32, i32) {
    %c0_i32 = arith.constant 0 : i32
    %c0_i32_0 = arith.constant 0 : i32
    %c0_i32_1 = arith.constant 0 : i32
    return %c0_i32, %c0_i32_0 : i32, i32
  }
  func.func @transform_6(%arg0: i32) -> (i32, i32) {
    %c0_i32 = arith.constant 0 : i32
    %c0_i32_0 = arith.constant 0 : i32
    %c0_i32_1 = arith.constant 0 : i32
    return %c0_i32, %c0_i32_0 : i32, i32
  }
  func.func @transform_7(%arg0: i32) -> (i32, i32) {
    %c0_i32 = arith.constant 0 : i32
    %c0_i32_0 = arith.constant 0 : i32
    %c0_i32_1 = arith.constant 0 : i32
    return %c0_i32, %c0_i32_0 : i32, i32
  }
  func.func @transform_8(%arg0: i32) -> (i32, i32) {
    %c0_i32 = arith.constant 0 : i32
    %c0_i32_0 = arith.constant 0 : i32
    %c0_i32_1 = arith.constant 0 : i32
    return %c0_i32, %c0_i32_0 : i32, i32
  }
  func.func @transform_9(%arg0: i32) -> (i32, i32, i32) {
    %c0_i32 = arith.constant 0 : i32
    %c0_i32_0 = arith.constant 0 : i32
    %c0_i32_1 = arith.constant 0 : i32
    return %arg0, %c0_i32, %c0_i32_0 : i32, i32, i32
  }
}

</mosaic_0001>

<bundles_post_ra>
// kernel: tpu_custom_call.1
= control target key start
LH: loop header
LB: loop body
LE: loop exit
PB: predicated region body
PF: predicated region fallthrough
CT: control target
= control target key end

     0   :  { %14 = vsyncpa [#allocation10], 0  ;;  %s2875_s0 = inlined_call_operand.vmem [shape: f32[2,456,4], index: 0, kind: input, shape index: {}]   ;;  %s2876_s1 = inlined_call_operand.vmem [shape: bf16[36,128], index: 1, kind: input, shape index: {}]   ;;  %s2877_s2 = inlined_call_operand.vmem [shape: f32[1,128], index: 2, kind: input, shape index: {}]   ;;  %s2878_s3 = inlined_call_operand.vmem [shape: bf16[72,128], index: 3, kind: input, shape index: {}]   ;;  %s2879_s4 = inlined_call_operand.vmem [shape: f32[1,128], index: 4, kind: input, shape index: {}]   ;;  %s2880_s5 = inlined_call_operand.vmem [shape: bf16[144,128], index: 5, kind: input, shape index: {}]   ;;  %s2881_s6 = inlined_call_operand.vmem [shape: f32[1,128], index: 6, kind: input, shape index: {}]   ;;  %s2882_s7 = inlined_call_operand.vmem [shape: bf16[288,128], index: 7, kind: input, shape index: {}]   ;;  %s2883_s8 = inlined_call_operand.vmem [shape: f32[1,128], index: 8, kind: input, shape index: {}]   ;;  %s2884_s9 = inlined_call_operand.hbm [shape: f32[2,8,128], index: 9, kind: output, shape index: {}]  }
   0x1   :  { %16 = vsyncpa [#allocation10 + $0x1], 0  ;;  %s2265_s30 = smov 0   ;;  %s2267_s10 = smov 0  }
   0x2   :  { %s2269_s11 = smov 0   ;;  %s2271_s12 = smov 0  }
   0x3 LB: > { %s2286_s13 = sadd.s32 4294967295, %s2197_s12   ;;  %s1820_s14 = sadd.s32 4294967294, %s2197_s12   ;;  %s2197_s12 = sphi %s2271_s12, %s2896_s12   ;;  %s2193_s11 = sphi %s2269_s11, %s2895_s11   ;;  %s2189_s10 = sphi %s2267_s10, %s2894_s10   ;;  %s2185_s30 = sphi %s2265_s30, %s2893_s30  }
   0x4   : > { %s2290_s15 = sadd.s32 1, %s2197_s12   ;;  %s223_s16 = sadd.s32 1, %s2193_s11 }
   0x5   : > { %s220_s17 = ssub.s32 %s2197_s12, %s2290_s15  ;;  %p233_p0 = scmp.ne.s32.totalorder %s2193_s11, %s2189_s10 }
   0x6   : > { %p221_p1 = scmp.eq.s32.totalorder %s220_s17, 0  ;;  %p234_p2 = scmp.eq.s32.totalorder %s2286_s13, 1 }
   0x7   : > { %p239_p3 = scmp.ne.s32.totalorder %s2189_s10, %s2185_s30  ;;  %p240_p4 = scmp.eq.s32.totalorder %s1820_s14, 1 }
   0x8   : > { %s2301_s18 = scalar_select %p221_p1, %s2193_s11, %s223_s16  }
   0x9   : > { %p2303_p5 = por %p234_p2, %p233_p0  ;;  %p2307_p6 = por %p240_p4, %p239_p3 }
   0xa   : > { %p1823_p7 = scmp.ge.s32.totalorder %s2197_s12, 1  ;;  %p290_p8 = scmp.lt.s32.totalorder %s2197_s12, 3 }
   0xc   : > { %p291_p9 = pnand %p1823_p7, %p290_p8 }
   0xd   : > { %p326_p10 = scmp.lt.s32.totalorder (!%p291_p9), %s2286_s13, 1  ;;  %s2199_s26 = smov (!%p291_p9), 8  }
   0xe   : > { %294 = sbr.rel (%p291_p9) target bundleno = 1303 (0x517), region = 56  ;;  %s2200_s27 = smov (!%p291_p9), 4  }
   0xf   : > { %s2201_s28 = smov (!%p291_p9), 12   ;;  %s2202_s29 = smov (!%p291_p9), 16  }
  0x10   : > { %s2203_s14 = smov (!%p291_p9), 20   ;;  %s2204_s16 = smov (!%p291_p9), 24  }
  0x11   : > { %s2205_s17 = smov (!%p291_p9), 28   ;;  %s2211_s24 = smov (!%p291_p9), 48  }
  0x13   : > { %s327_s21 = scalar_select %p326_p10, %s2286_s13, 1  ;;  %vm332_vm0 = vcmask 293888   ;;  %v2207_v33 = vmov 0.0   ;;  %vm343_vm1 = vcmask 31744   ;;  %vm351_vm2 = vcmask 64544  }
  0x14   : > { %333 = vst.msk [vmem:[#allocation2] sm:$0xff] %vm332_vm0, %v2207_v33  ;;  %vm359_vm3 = vcmask 97344   ;;  %vm367_vm4 = vcmask 130144   ;;  %v817_v56 = vld [vmem:[%s2876_s1 + $0x10] sm:$0x3]  ;;  %vm849_vm5 = vcmask 1041408  }
  0x15   : > { %s2074_s22 = smul.u32 456, %s327_s21  ;;  %s2885_s21 = smov 32   ;;  %334 = vst.msk [vmem:[#allocation2 + $0x8] sm:$0xff] %vm332_vm0, %v2207_v33  ;;  %v831_v57 = vunpack.c.l.b16 %v817_v56  ;;  %vm375_vm6 = vcmask 162944   ;;  %vm383_vm7 = vcmask 195744   ;;  %vm391_vm8 = vcmask 228544  }
  0x16   : > { %335 = vst.msk [vmem:[#allocation2 + $0x10] sm:$0xff] %vm332_vm0, %v2207_v33  ;;  %vm399_vm9 = vcmask 261344   ;;  %vm407_vm10 = vcmask 294144   ;;  %vm890_vm11 = vcmask 64512   ;;  %vm921_vm12 = vcmask 588800  }
  0x17   : > { %s2318_s25 = scalar_lea.vmem %s2875_s0, %s2074_s22  ;;  %336 = vst.msk [vmem:[#allocation2 + $0x18] sm:$0xff] %vm332_vm0, %v2207_v33  ;;  %v834_v60 = vpack.c.b16 %v831_v57, %v831_v57  ;;  %vm926_vm13 = vcmask 60416   ;;  %vm934_vm14 = vcmask 126016   ;;  %vm942_vm15 = vcmask 191616  }
  0x18   : > { %v1828_v0 = vld [vmem:[%s2318_s25 + $0x19] ss:$2 sm:$0xff]  ;;  %v1827_v1 = vld [vmem:[%s2318_s25 + $0x18] ss:$2 sm:$0xff]  ;;  %v1837_v3 = vld [vmem:[%s2318_s25 + $0x49] ss:$2 sm:$0xff] }
  0x19   : > { %356 = vrot.lane.b32.xlu1 %v1828_v0, %s2199_s26  ;;  %348 = vrot.lane.b32.xlu0 %v1827_v1, %s2200_s27  ;;  %v1829_v2 = vld [vmem:[%s2318_s25 + $0x2f] ss:$2 sm:$0xff]  ;;  %v1836_v4 = vld [vmem:[%s2318_s25 + $0x48] ss:$2 sm:$0xff]  ;;  %337 = vst.msk [vmem:[#allocation2 + $0x20] sm:$0xff] %vm332_vm0, %v2207_v33  ;;  %v851_v63 = vsel %vm849_vm5, %v834_v60, 0 }
  0x1a   : > { %364 = vrot.lane.b32.xlu2 %v1829_v2, %s2201_s28  ;;  %v1838_v5 = vld [vmem:[%s2318_s25 + $0x5f] ss:$2 sm:$0xff]  ;;  %v1839_v6 = vld [vmem:[%s2318_s25 + $0x60] ss:$2 sm:$0xff]  ;;  %v1830_v7 = vld [vmem:[%s2318_s25 + $0x30] ss:$2 sm:$0xff]  ;;  %858 = vmatpush.bf16.msra.mxu0 %v851_v63 }
  0x1b   : > { %v1831_v8 = vld [vmem:[%s2318_s25 + $0x31] ss:$2 sm:$0xff]  ;;  %v1840_v10 = vld [vmem:[%s2318_s25 + $0x61] ss:$2 sm:$0xff]  ;;  %v1842_v12 = vld [vmem:[%s2318_s25 + $0x78] ss:$2 sm:$0xff] }
  0x1c   : > { %v1832_v9 = vld [vmem:[%s2318_s25 + $0x47] ss:$2 sm:$0xff]  ;;  %v1841_v11 = vld [vmem:[%s2318_s25 + $0x77] ss:$2 sm:$0xff]  ;;  %v1833_v13 = vld [vmem:[%s2318_s25 + $0x48] ss:$2 sm:$0xff] }
  0x1d   : > { %v1834_v14 = vld [vmem:[%s2318_s25 + $0x49] ss:$2 sm:$0xff]  ;;  %v1845_v15 = vld [vmem:[%s2318_s25 + $0x78] ss:$2 sm:$0xff]  ;;  %v1843_v16 = vld [vmem:[%s2318_s25 + $0x79] ss:$2 sm:$0xff] }
  0x1e   : > { %v1854_v17 = vld [vmem:[%s2318_s25 + $0xa8] ss:$2 sm:$0xff]  ;;  %v1855_v18 = vld [vmem:[%s2318_s25 + $0xa9] ss:$2 sm:$0xff]  ;;  %v1846_v19 = vld [vmem:[%s2318_s25 + $0x79] ss:$2 sm:$0xff] }
  0x1f   : > { %v1847_v20 = vld [vmem:[%s2318_s25 + $0x8f] ss:$2 sm:$0xff]  ;;  %v1848_v21 = vld [vmem:[%s2318_s25 + $0x90] ss:$2 sm:$0xff]  ;;  %v1856_v22 = vld [vmem:[%s2318_s25 + $0xbf] ss:$2 sm:$0xff] }
  0x20   : > { %v1857_v23 = vld [vmem:[%s2318_s25 + $0xc0] ss:$2 sm:$0xff]  ;;  %v1858_v24 = vld [vmem:[%s2318_s25 + $0xc1] ss:$2 sm:$0xff]  ;;  %v1849_v25 = vld [vmem:[%s2318_s25 + $0x91] ss:$2 sm:$0xff] }
  0x21   : > { %419 = vrot.lane.b32.xlu1 %v1837_v3, %s2199_s26  ;;  %413 = vrot.lane.b32.xlu0 %v1836_v4, %s2200_s27  ;;  %v1850_v26 = vld [vmem:[%s2318_s25 + $0xa7] ss:$2 sm:$0xff]  ;;  %v1851_v27 = vld [vmem:[%s2318_s25 + $0xa8] ss:$2 sm:$0xff]  ;;  %338 = vst.msk [vmem:[#allocation2 + $0x28] sm:$0xff] %vm332_vm0, %v2207_v33  ;;  %vm990_vm5 = vcmask 585216  }
  0x22   : > { %426 = vrot.lane.b32.xlu2 %v1838_v5, %s2201_s28  ;;  %v1859_v28 = vld [vmem:[%s2318_s25 + $0xd7] ss:$2 sm:$0xff]  ;;  %v1860_v29 = vld [vmem:[%s2318_s25 + $0xd8] ss:$2 sm:$0xff]  ;;  %v1872_v35 = vld [vmem:[%s2318_s25 + $0x108] ss:$2 sm:$0xff] }
  0x23   : > { %v1861_v30 = vld [vmem:[%s2318_s25 + $0xd9] ss:$2 sm:$0xff]  ;;  %v1852_v31 = vld [vmem:[%s2318_s25 + $0xa9] ss:$2 sm:$0xff]  ;;  %v1863_v32 = vld [vmem:[%s2318_s25 + $0xd8] ss:$2 sm:$0xff] }
  0x24   : > { %v1826_v34 = vld [vmem:[%s2318_s25 + $0x17] ss:$2 sm:$0xff]  ;;  %339 = vst.msk [vmem:[#allocation2 + $0x30] sm:$0xff] %vm332_vm0, %v2207_v33  ;;  %v1835_v38 = vld [vmem:[%s2318_s25 + $0x47] ss:$2 sm:$0xff] }
  0x25   : > { %344 = vst.msk [vmem:[#allocation2] sm:$0xff] %vm343_vm1, %v1826_v34  ;;  %v1864_v36 = vld [vmem:[%s2318_s25 + $0xd9] ss:$2 sm:$0xff]  ;;  %v1873_v37 = vld [vmem:[%s2318_s25 + $0x109] ss:$2 sm:$0xff] }
  0x26   : > { %340 = vst.msk [vmem:[#allocation2 + $0x38] sm:$0xff] %vm332_vm0, %v2207_v33  ;;  %v1865_v39 = vld [vmem:[%s2318_s25 + $0xef] ss:$2 sm:$0xff]  ;;  %v1874_v40 = vld [vmem:[%s2318_s25 + $0x11f] ss:$2 sm:$0xff] }
  0x27   : > { %1240 = vst [vmem:[#allocation4] sm:$0xff] %v2207_v33  ;;  %v1866_v42 = vld [vmem:[%s2318_s25 + $0xf0] ss:$2 sm:$0xff]  ;;  %v1875_v43 = vld [vmem:[%s2318_s25 + $0x120] ss:$2 sm:$0xff] }
  0x28   : > { %1498 = vst [vmem:[#allocation5] sm:$0xff] %v2207_v33  ;;  %v1867_v44 = vld [vmem:[%s2318_s25 + $0xf1] ss:$2 sm:$0xff]  ;;  %v1876_v46 = vld [vmem:[%s2318_s25 + $0x121] ss:$2 sm:$0xff] }
  0x29   : > { %433 = vrot.lane.b32.xlu1 %v1839_v6, %s2202_s29  ;;  %372 = vrot.lane.b32.xlu0 %v1830_v7, %s2202_s29  ;;  %1499 = vst [vmem:[#allocation5 + $0x8] sm:$0xff] %v2207_v33  ;;  %v1868_v47 = vld [vmem:[%s2318_s25 + $0x107] ss:$2 sm:$0xff]  ;;  %v1877_v48 = vld [vmem:[%s2318_s25 + $0x137] ss:$2 sm:$0xff] }
  0x2a   : > { %380 = vrot.lane.b32.xlu2 %v1831_v8, %s2203_s14  ;;  %410 = vst.msk [vmem:[#allocation2 + $0x8] sm:$0xff] %vm343_vm1, %v1835_v38  ;;  %v1869_v50 = vld [vmem:[%s2318_s25 + $0x108] ss:$2 sm:$0xff]  ;;  %v1878_v53 = vld [vmem:[%s2318_s25 + $0x138] ss:$2 sm:$0xff] }
  0x2b   : > { %v1870_v54 = vld [vmem:[%s2318_s25 + $0x109] ss:$2 sm:$0xff]  ;;  %v1879_v58 = vld [vmem:[%s2318_s25 + $0x139] ss:$2 sm:$0xff]  ;;  %v1881_v1 = vld [vmem:[%s2318_s25 + $0x138] ss:$2 sm:$0xff] }
  0x2c   : > { %v1844_v59 = vld [vmem:[%s2318_s25 + $0x77] ss:$2 sm:$0xff]  ;;  %v1853_v0 = vld [vmem:[%s2318_s25 + $0xa7] ss:$2 sm:$0xff]  ;;  %v1890_v2 = vld [vmem:[%s2318_s25 + $0x168] ss:$2 sm:$0xff] }
  0x2d   : > { %466 = vst.msk [vmem:[#allocation2 + $0x10] sm:$0xff] %vm343_vm1, %v1844_v59  ;;  %v2042_v4 = vld [vmem:[%s2876_s1 + $0x8] sm:$0xff]  ;;  %v1882_v5 = vld [vmem:[%s2318_s25 + $0x139] ss:$2 sm:$0xff] }
  0x2e   : > { %522 = vst.msk [vmem:[#allocation2 + $0x18] sm:$0xff] %vm343_vm1, %v1853_v0  ;;  %859 = vmatpush.bf16.msra.mxu0 %v2042_v4  ;;  %v2041_v6 = vld [vmem:[%s2876_s1] sm:$0xff] }
  0x2f   : > { %v1871_v38 = vld [vmem:[%s2318_s25 + $0x107] ss:$2 sm:$0xff]  ;;  %895 = vst.msk [vmem:[#allocation6 + $0x20] sm:$0xff] %vm890_vm11, %v2207_v33 }
  0x30   : > { %634 = vst.msk [vmem:[#allocation2 + $0x28] sm:$0xff] %vm343_vm1, %v1871_v38 }
  0x31   : > { %388 = vrot.lane.b32.xlu1 %v1832_v9, %s2204_s16  ;;  %440 = vrot.lane.b32.xlu0 %v1840_v10, %s2203_s14  ;;  %v1891_v9 = vld [vmem:[%s2318_s25 + $0x169] ss:$2 sm:$0xff]  ;;  %892 = vst.msk [vmem:[#allocation6 + $0x8] sm:$0xff] %vm890_vm11, %v2207_v33 }
  0x32   : > { %447 = vrot.lane.b32.xlu2 %v1841_v11, %s2204_s16  ;;  %v1883_v10 = vld [vmem:[%s2318_s25 + $0x14f] ss:$2 sm:$0xff]  ;;  %860 = vmatpush.bf16.msra.mxu0 %v2041_v6  ;;  %893 = vst.msk [vmem:[#allocation6 + $0x10] sm:$0xff] %vm890_vm11, %v2207_v33 }
  0x33   : > { %894 = vst.msk [vmem:[#allocation6 + $0x18] sm:$0xff] %vm890_vm11, %v2207_v33 }
  0x34   : > { %896 = vst.msk [vmem:[#allocation6 + $0x28] sm:$0xff] %vm890_vm11, %v2207_v33 }
  0x35   : > { %897 = vst.msk [vmem:[#allocation6 + $0x30] sm:$0xff] %vm890_vm11, %v2207_v33 }
  0x36   : > { %898 = vst.msk [vmem:[#allocation6 + $0x38] sm:$0xff] %vm890_vm11, %v2207_v33 }
  0x37   : > { %899 = vst.msk [vmem:[#allocation6 + $0x40] sm:$0xff] %vm890_vm11, %v2207_v33 }
  0x38   : > { %900 = vst.msk [vmem:[#allocation6 + $0x48] sm:$0xff] %vm890_vm11, %v2207_v33 }
  0x39   : > { %454 = vrot.lane.b32.xlu1 %v1842_v12, %s2205_s17  ;;  %396 = vrot.lane.b32.xlu0 %v1833_v13, %s2205_s17  ;;  %v1892_v12 = vld [vmem:[%s2318_s25 + $0x17f] ss:$2 sm:$0xff]  ;;  %901 = vst.msk [vmem:[#allocation6 + $0x50] sm:$0xff] %vm890_vm11, %v2207_v33 }
  0x3a   : > { %404 = vrot.lane.b32.xlu2 %v1834_v14, %s2885_s21  ;;  %902 = vst.msk [vmem:[#allocation6 + $0x58] sm:$0xff] %vm890_vm11, %v2207_v33 }
  0x3b   : > { %903 = vst.msk [vmem:[#allocation6 + $0x60] sm:$0xff] %vm890_vm11, %v2207_v33 }
  0x3c   : > { %904 = vst.msk [vmem:[#allocation6 + $0x68] sm:$0xff] %vm890_vm11, %v2207_v33 }
  0x3d   : > { %905 = vst.msk [vmem:[#allocation6 + $0x70] sm:$0xff] %vm890_vm11, %v2207_v33 }
  0x3e   : > { %906 = vst.msk [vmem:[#allocation6 + $0x78] sm:$0xff] %vm890_vm11, %v2207_v33 }
  0x3f   : > { %907 = vst.msk [vmem:[#allocation6 + $0x80] sm:$0xff] %vm890_vm11, %v2207_v33 }
  0x40   : > { %908 = vst.msk [vmem:[#allocation6 + $0x88] sm:$0xff] %vm890_vm11, %v2207_v33 }
  0x41   : > { %469 = vrot.lane.b32.xlu1 %v1845_v15, %s2200_s27  ;;  %461 = vrot.lane.b32.xlu0 %v1843_v16, %s2885_s21  ;;  %v1884_v15 = vld [vmem:[%s2318_s25 + $0x150] ss:$2 sm:$0xff]  ;;  %v1893_v16 = vld [vmem:[%s2318_s25 + $0x180] ss:$2 sm:$0xff]  ;;  %909 = vst.msk [vmem:[#allocation6 + $0x90] sm:$0xff] %vm890_vm11, %v2207_v33 }
  0x42   : > { %525 = vrot.lane.b32.xlu2 %v1854_v17, %s2200_s27  ;;  %922 = vst.msk [vmem:[#allocation3] sm:$0xff] %vm921_vm12, %v2207_v33 }
  0x43   : > { %923 = vst.msk [vmem:[#allocation3 + $0x8] sm:$0xff] %vm921_vm12, %v2207_v33 }
  0x49   : > { %531 = vrot.lane.b32.xlu1 %v1855_v18, %s2199_s26  ;;  %475 = vrot.lane.b32.xlu0 %v1846_v19, %s2199_s26  ;;  %v1885_v18 = vld [vmem:[%s2318_s25 + $0x151] ss:$2 sm:$0xff] }
  0x4a   : > { %482 = vrot.lane.b32.xlu2 %v1847_v20, %s2201_s28 }
  0x51   : > { %489 = vrot.lane.b32.xlu1 %v1848_v21, %s2202_s29  ;;  %538 = vrot.lane.b32.xlu0 %v1856_v22, %s2201_s28  ;;  %v1894_v21 = vld [vmem:[%s2318_s25 + $0x181] ss:$2 sm:$0xff] }
  0x52   : > { %545 = vrot.lane.b32.xlu2 %v1857_v23, %s2202_s29  ;;  %v1886_v22 = vld [vmem:[%s2318_s25 + $0x167] ss:$2 sm:$0xff] }
  0x59   : > { %552 = vrot.lane.b32.xlu1 %v1858_v24, %s2203_s14  ;;  %496 = vrot.lane.b32.xlu0 %v1849_v25, %s2203_s14  ;;  %v1895_v24 = vld [vmem:[%s2318_s25 + $0x197] ss:$2 sm:$0xff] }
  0x5a   : > { %503 = vrot.lane.b32.xlu2 %v1850_v26, %s2204_s16 }
  0x61   : > { %510 = vrot.lane.b32.xlu1 %v1851_v27, %s2205_s17  ;;  %559 = vrot.lane.b32.xlu0 %v1859_v28, %s2204_s16  ;;  %v1887_v27 = vld [vmem:[%s2318_s25 + $0x168] ss:$2 sm:$0xff]  ;;  %v1896_v28 = vld [vmem:[%s2318_s25 + $0x198] ss:$2 sm:$0xff] }
  0x62   : > { %566 = vrot.lane.b32.xlu2 %v1860_v29, %s2205_s17 }
  0x69   : > { %573 = vrot.lane.b32.xlu1 %v1861_v30, %s2885_s21  ;;  %517 = vrot.lane.b32.xlu0 %v1852_v31, %s2885_s21  ;;  %v1888_v30 = vld [vmem:[%s2318_s25 + $0x169] ss:$2 sm:$0xff] }
  0x6a   : > { %581 = vrot.lane.b32.xlu2 %v1863_v32, %s2200_s27 }
  0x71   : > { %637 = vrot.lane.b32.xlu0 %v1872_v35, %s2200_s27  ;;  %587 = vrot.lane.b32.xlu1 %v1864_v36, %s2199_s26 }
  0x72   : > { %643 = vrot.lane.b32.xlu2 %v1873_v37, %s2199_s26  ;;  %v1862_v37 = vld [vmem:[%s2318_s25 + $0xd7] ss:$2 sm:$0xff] }
  0x73   : > { %578 = vst.msk [vmem:[#allocation2 + $0x20] sm:$0xff] %vm343_vm1, %v1862_v37 }
  0x74   : > { %v365_v41 = vpop.permute.xlu2 %364 }
  0x79   : > { %594 = vrot.lane.b32.xlu0 %v1865_v39, %s2201_s28  ;;  %650 = vrot.lane.b32.xlu1 %v1874_v40, %s2201_s28  ;;  %v1897_v39 = vld [vmem:[%s2318_s25 + $0x199] ss:$2 sm:$0xff] }
  0x7a   : > { %601 = vrot.lane.b32.xlu2 %v1866_v42, %s2202_s29 }
  0x7c   : > { %v427_v45 = vpop.permute.xlu2 %426 }
  0x81   : > { %657 = vrot.lane.b32.xlu0 %v1875_v43, %s2202_s29  ;;  %608 = vrot.lane.b32.xlu1 %v1867_v44, %s2203_s14 }
  0x82   : > { %664 = vrot.lane.b32.xlu2 %v1876_v46, %s2203_s14 }
  0x84   : > { %v381_v49 = vpop.permute.xlu2 %380 }
  0x89   : > { %615 = vrot.lane.b32.xlu0 %v1868_v47, %s2204_s16  ;;  %671 = vrot.lane.b32.xlu1 %v1877_v48, %s2204_s16 }
  0x8a   : > { %622 = vrot.lane.b32.xlu2 %v1869_v50, %s2205_s17 }
  0x8b   : > { %v357_v51 = vpop.permute.xlu1 %356  ;;  %v349_v52 = vpop.permute.xlu0 %348 }
  0x8c   : > { %352 = vst.msk [vmem:[#allocation2] sm:$0xff] %vm351_vm2, %v349_v52  ;;  %v448_v55 = vpop.permute.xlu2 %447 }
  0x8d   : > { %360 = vst.msk [vmem:[#allocation2] sm:$0xff] %vm359_vm3, %v357_v51 }
  0x8e   : > { %368 = vst.msk [vmem:[#allocation2] sm:$0xff] %vm367_vm4, %v365_v41 }
  0x91   : > { %678 = vrot.lane.b32.xlu0 %v1878_v53, %s2205_s17  ;;  %629 = vrot.lane.b32.xlu1 %v1870_v54, %s2885_s21 }
  0x92   : > { %685 = vrot.lane.b32.xlu2 %v1879_v58, %s2885_s21  ;;  %v1880_v58 = vld [vmem:[%s2318_s25 + $0x137] ss:$2 sm:$0xff]  ;;  %s2210_s21 = smov 64  }
  0x93   : > { %v420_v61 = vpop.permute.xlu1 %419  ;;  %v414_v62 = vpop.permute.xlu0 %413  ;;  %690 = vst.msk [vmem:[#allocation2 + $0x30] sm:$0xff] %vm343_vm1, %v1880_v58 }
  0x94   : > { %416 = vst.msk [vmem:[#allocation2 + $0x8] sm:$0xff] %vm351_vm2, %v414_v62  ;;  %v405_v3 = vpop.permute.xlu2 %404  ;;  %v1889_v62 = vld [vmem:[%s2318_s25 + $0x167] ss:$2 sm:$0xff]  ;;  %s2892_s25 = smov 96  }
  0x95   : > { %422 = vst.msk [vmem:[#allocation2 + $0x8] sm:$0xff] %vm359_vm3, %v420_v61 }
  0x96   : > { %429 = vst.msk [vmem:[#allocation2 + $0x8] sm:$0xff] %vm367_vm4, %v427_v45 }
  0x97   : > { %746 = vst.msk [vmem:[#allocation2 + $0x38] sm:$0xff] %vm343_vm1, %v1889_v62  ;;  %vm958_vm1 = vcmask 322816  }
  0x99   : > { %693 = vrot.lane.b32.xlu0 %v1881_v1, %s2200_s27  ;;  %749 = vrot.lane.b32.xlu1 %v1890_v2, %s2200_s27  ;;  %s2891_s27 = smov 32  }
  0x9a   : > { %699 = vrot.lane.b32.xlu2 %v1882_v5, %s2199_s26 }
  0x9b   : > { %v434_v7 = vpop.permute.xlu1 %433  ;;  %v373_v8 = vpop.permute.xlu0 %372 }
  0x9c   : > { %436 = vst.msk [vmem:[#allocation2 + $0x8] sm:$0xff] %vm375_vm6, %v434_v7  ;;  %v526_v11 = vpop.permute.xlu2 %525 }
  0x9d   : > { %376 = vst.msk [vmem:[#allocation2] sm:$0xff] %vm375_vm6, %v373_v8 }
  0x9e   : > { %384 = vst.msk [vmem:[#allocation2] sm:$0xff] %vm383_vm7, %v381_v49 }
  0x9f   : > { %528 = vst.msk [vmem:[#allocation2 + $0x18] sm:$0xff] %vm351_vm2, %v526_v11 }
  0xa1   : > { %755 = vrot.lane.b32.xlu0 %v1891_v9, %s2199_s26  ;;  %706 = vrot.lane.b32.xlu1 %v1883_v10, %s2201_s28 }
  0xa2   : > { %762 = vrot.lane.b32.xlu2 %v1892_v12, %s2201_s28 }
  0xa3   : > { %v389_v13 = vpop.permute.xlu1 %388  ;;  %v441_v14 = vpop.permute.xlu0 %440 }
  0xa4   : > { %392 = vst.msk [vmem:[#allocation2] sm:$0xff] %vm391_vm8, %v389_v13  ;;  %v483_v17 = vpop.permute.xlu2 %482 }
  0xa5   : > { %443 = vst.msk [vmem:[#allocation2 + $0x8] sm:$0xff] %vm383_vm7, %v441_v14 }
  0xa6   : > { %450 = vst.msk [vmem:[#allocation2 + $0x8] sm:$0xff] %vm391_vm8, %v448_v55 }
  0xa9   : > { %713 = vrot.lane.b32.xlu0 %v1884_v15, %s2202_s29  ;;  %769 = vrot.lane.b32.xlu1 %v1893_v16, %s2202_s29 }
  0xaa   : > { %720 = vrot.lane.b32.xlu2 %v1885_v18, %s2203_s14 }
  0xab   : > { %v455_v19 = vpop.permute.xlu1 %454  ;;  %v397_v20 = vpop.permute.xlu0 %396 }
  0xac   : > { %457 = vst.msk [vmem:[#allocation2 + $0x8] sm:$0xff] %vm399_vm9, %v455_v19  ;;  %v546_v23 = vpop.permute.xlu2 %545 }
  0xad   : > { %400 = vst.msk [vmem:[#allocation2] sm:$0xff] %vm399_vm9, %v397_v20 }
  0xae   : > { %408 = vst.msk [vmem:[#allocation2] sm:$0xff] %vm407_vm10, %v405_v3 }
  0xb1   : > { %776 = vrot.lane.b32.xlu0 %v1894_v21, %s2203_s14  ;;  %727 = vrot.lane.b32.xlu1 %v1886_v22, %s2204_s16  ;;  %v937_v21 = vld [vmem:[#allocation6 + $0x11] ss:$2 sm:$0xf]  ;;  %v929_v22 = vld [vmem:[#allocation6 + $0x10] ss:$2 sm:$0xf] }
  0xb2   : > { %783 = vrot.lane.b32.xlu2 %v1895_v24, %s2204_s16  ;;  %s2208_s14 = smov 40  }
  0xb3   : > { %v470_v25 = vpop.permute.xlu1 %469  ;;  %v462_v26 = vpop.permute.xlu0 %461 }
  0xb4   : > { %472 = vst.msk [vmem:[#allocation2 + $0x10] sm:$0xff] %vm351_vm2, %v470_v25  ;;  %v504_v29 = vpop.permute.xlu2 %503 }
  0xb5   : > { %464 = vst.msk [vmem:[#allocation2 + $0x8] sm:$0xff] %vm407_vm10, %v462_v26  ;;  %v801_v31 = vld [vmem:[#allocation2] sm:$0xff] }
  0xb9   : > { %734 = vrot.lane.b32.xlu0 %v1887_v27, %s2205_s17  ;;  %790 = vrot.lane.b32.xlu1 %v1896_v28, %s2205_s17  ;;  %v2600_v27 = vld [vmem:[%s2877_s2] ss:$0 sm:$0xff]  ;;  %s2209_s17 = smov 56  }
  0xba   : > { %741 = vrot.lane.b32.xlu2 %v1888_v30, %s2891_s27 }
  0xbb   : > { %v532_v32 = vpop.permute.xlu1 %531  ;;  %v476_v34 = vpop.permute.xlu0 %475 }
  0xbc   : > { %534 = vst.msk [vmem:[#allocation2 + $0x18] sm:$0xff] %vm359_vm3, %v532_v32  ;;  %v802_v35 = vld [vmem:[#allocation2 + $0x8] sm:$0xff]  ;;  %v567_v40 = vpop.permute.xlu2 %566 }
  0xbd   : > { %478 = vst.msk [vmem:[#allocation2 + $0x10] sm:$0xff] %vm359_vm3, %v476_v34  ;;  %v809_v36 = vpack.c.bf16 %v802_v35, %v801_v31 }
  0xbe   : > { %485 = vst.msk [vmem:[#allocation2 + $0x10] sm:$0xff] %vm367_vm4, %v483_v17 }
  0xbf   : > { %1906 = vmatmul.msk.bf16.vlgmr.msra.gmra.mxu0 %vm332_vm0, %v809_v36 }
  0xc1   : > { %797 = vrot.lane.b32.xlu0 %v1897_v39, %s2891_s27  ;;  %931 = vrot.lane.b32.xlu1 %v929_v22, %s2199_s26 }
  0xc2   : > { %939 = vrot.lane.b32.xlu2 %v937_v21, %s2202_s29 }
  0xc3   : > { %v490_v41 = vpop.permute.xlu1 %489  ;;  %v539_v42 = vpop.permute.xlu0 %538 }
  0xc4   : > { %492 = vst.msk [vmem:[#allocation2 + $0x10] sm:$0xff] %vm375_vm6, %v490_v41  ;;  %v582_v43 = vpop.permute.xlu2 %581 }
  0xc5   : > { %541 = vst.msk [vmem:[#allocation2 + $0x18] sm:$0xff] %vm367_vm4, %v539_v42 }
  0xc6   : > { %548 = vst.msk [vmem:[#allocation2 + $0x18] sm:$0xff] %vm375_vm6, %v546_v23 }
  0xc7   : > { %584 = vst.msk [vmem:[#allocation2 + $0x20] sm:$0xff] %vm351_vm2, %v582_v43 }
  0xcb   : > { %v553_v44 = vpop.permute.xlu1 %552  ;;  %v497_v45 = vpop.permute.xlu0 %496 }
  0xcc   : > { %555 = vst.msk [vmem:[#allocation2 + $0x18] sm:$0xff] %vm383_vm7, %v553_v44  ;;  %v644_v46 = vpop.permute.xlu2 %643 }
  0xcd   : > { %499 = vst.msk [vmem:[#allocation2 + $0x10] sm:$0xff] %vm383_vm7, %v497_v45 }
  0xce   : > { %506 = vst.msk [vmem:[#allocation2 + $0x10] sm:$0xff] %vm391_vm8, %v504_v29 }
  0xd3   : > { %v511_v47 = vpop.permute.xlu1 %510  ;;  %v560_v48 = vpop.permute.xlu0 %559 }
  0xd4   : > { %513 = vst.msk [vmem:[#allocation2 + $0x10] sm:$0xff] %vm399_vm9, %v511_v47  ;;  %v602_v51 = vpop.permute.xlu2 %601 }
  0xd5   : > { %562 = vst.msk [vmem:[#allocation2 + $0x18] sm:$0xff] %vm391_vm8, %v560_v48 }
  0xd6   : > { %569 = vst.msk [vmem:[#allocation2 + $0x18] sm:$0xff] %vm399_vm9, %v567_v40 }
  0xdb   : > { %v574_v49 = vpop.permute.xlu1 %573  ;;  %v518_v50 = vpop.permute.xlu0 %517 }
  0xdc   : > { %576 = vst.msk [vmem:[#allocation2 + $0x18] sm:$0xff] %vm407_vm10, %v574_v49  ;;  %v665_v57 = vpop.permute.xlu2 %664 }
  0xdd   : > { %520 = vst.msk [vmem:[#allocation2 + $0x10] sm:$0xff] %vm407_vm10, %v518_v50 }
  0xe3   : > { %v638_v52 = vpop.permute.xlu0 %637  ;;  %v588_v53 = vpop.permute.xlu1 %587  ;;  %v804_v54 = vld [vmem:[#allocation2 + $0x18] sm:$0xff] }
  0xe4   : > { %640 = vst.msk [vmem:[#allocation2 + $0x28] sm:$0xff] %vm351_vm2, %v638_v52  ;;  %v803_v55 = vld [vmem:[#allocation2 + $0x10] sm:$0xff]  ;;  %v623_v61 = vpop.permute.xlu2 %622 }
  0xe5   : > { %646 = vst.msk [vmem:[#allocation2 + $0x28] sm:$0xff] %vm359_vm3, %v644_v46  ;;  %v810_v56 = vpack.c.bf16 %v804_v54, %v803_v55 }
  0xe6   : > { %590 = vst.msk [vmem:[#allocation2 + $0x20] sm:$0xff] %vm359_vm3, %v588_v53 }
  0xe7   : > { %1907 = vmatmul.msk.bf16.gmra.mxu0 %vm332_vm0, %v810_v56 }
  0xeb   : > { %v595_v59 = vpop.permute.xlu0 %594  ;;  %v651_v60 = vpop.permute.xlu1 %650 }
  0xec   : > { %597 = vst.msk [vmem:[#allocation2 + $0x20] sm:$0xff] %vm367_vm4, %v595_v59  ;;  %v686_v1 = vpop.permute.xlu2 %685 }
  0xed   : > { %604 = vst.msk [vmem:[#allocation2 + $0x20] sm:$0xff] %vm375_vm6, %v602_v51 }
  0xee   : > { %653 = vst.msk [vmem:[#allocation2 + $0x28] sm:$0xff] %vm367_vm4, %v651_v60 }
  0xf3   : > { %v658_v63 = vpop.permute.xlu0 %657  ;;  %v609_v0 = vpop.permute.xlu1 %608 }
  0xf4   : > { %660 = vst.msk [vmem:[#allocation2 + $0x28] sm:$0xff] %vm375_vm6, %v658_v63  ;;  %v700_v4 = vpop.permute.xlu2 %699 }
  0xf5   : > { %667 = vst.msk [vmem:[#allocation2 + $0x28] sm:$0xff] %vm383_vm7, %v665_v57 }
  0xf6   : > { %611 = vst.msk [vmem:[#allocation2 + $0x20] sm:$0xff] %vm383_vm7, %v609_v0 }
  0xfb   : > { %v616_v2 = vpop.permute.xlu0 %615  ;;  %v672_v3 = vpop.permute.xlu1 %671 }
  0xfc   : > { %618 = vst.msk [vmem:[#allocation2 + $0x20] sm:$0xff] %vm391_vm8, %v616_v2  ;;  %v763_v10 = vpop.permute.xlu2 %762 }
  0xfd   : > { %625 = vst.msk [vmem:[#allocation2 + $0x20] sm:$0xff] %vm399_vm9, %v623_v61  ;;  %v925_v61 = vld [vmem:[#allocation6 + $0xf] ss:$2 sm:$0xf] }
  0xfe   : > { %674 = vst.msk [vmem:[#allocation2 + $0x28] sm:$0xff] %vm391_vm8, %v672_v3 }
  0xff   : > { %927 = vst.msk [vmem:[#allocation3] sm:$0xf] %vm926_vm13, %v925_v61 }
 0x103   : > { %v679_v5 = vpop.permute.xlu0 %678  ;;  %v630_v6 = vpop.permute.xlu1 %629 }
 0x104   : > { %681 = vst.msk [vmem:[#allocation2 + $0x28] sm:$0xff] %vm399_vm9, %v679_v5  ;;  %v721_v15 = vpop.permute.xlu2 %720 }
 0x105   : > { %688 = vst.msk [vmem:[#allocation2 + $0x28] sm:$0xff] %vm407_vm10, %v686_v1 }
 0x106   : > { %632 = vst.msk [vmem:[#allocation2 + $0x20] sm:$0xff] %vm407_vm10, %v630_v6 }
 0x10b   : > { %v694_v7 = vpop.permute.xlu0 %693  ;;  %v750_v8 = vpop.permute.xlu1 %749 }
 0x10c   : > { %696 = vst.msk [vmem:[#allocation2 + $0x30] sm:$0xff] %vm351_vm2, %v694_v7  ;;  %v806_v9 = vld [vmem:[#allocation2 + $0x28] sm:$0xff]  ;;  %v784_v18 = vpop.permute.xlu2 %783 }
 0x10d   : > { %v805_v11 = vld [vmem:[#allocation2 + $0x20] sm:$0xff]  ;;  %752 = vst.msk [vmem:[#allocation2 + $0x38] sm:$0xff] %vm351_vm2, %v750_v8  ;;  %vm966_vm2 = vcmask 388416  }
 0x10e   : > { %v811_v12 = vpack.c.bf16 %v806_v9, %v805_v11  ;;  %702 = vst.msk [vmem:[#allocation2 + $0x30] sm:$0xff] %vm359_vm3, %v700_v4 }
 0x110   : > { %1908 = vmatmul.msk.bf16.gmra.mxu0 %vm332_vm0, %v811_v12 }
 0x113   : > { %v756_v13 = vpop.permute.xlu0 %755  ;;  %v707_v14 = vpop.permute.xlu1 %706 }
 0x114   : > { %758 = vst.msk [vmem:[#allocation2 + $0x38] sm:$0xff] %vm359_vm3, %v756_v13  ;;  %v742_v23 = vpop.permute.xlu2 %741  ;;  %vm974_vm3 = vcmask 454016  }
 0x115   : > { %709 = vst.msk [vmem:[#allocation2 + $0x30] sm:$0xff] %vm367_vm4, %v707_v14 }
 0x116   : > { %765 = vst.msk [vmem:[#allocation2 + $0x38] sm:$0xff] %vm367_vm4, %v763_v10  ;;  %vm982_vm4 = vcmask 519616  }
 0x11b   : > { %v714_v16 = vpop.permute.xlu0 %713  ;;  %v770_v17 = vpop.permute.xlu1 %769 }
 0x11c   : > { %716 = vst.msk [vmem:[#allocation2 + $0x30] sm:$0xff] %vm375_vm6, %v714_v16  ;;  %v940_v6 = vpop.permute.xlu2 %939 }
 0x11d   : > { %772 = vst.msk [vmem:[#allocation2 + $0x38] sm:$0xff] %vm375_vm6, %v770_v17  ;;  %vm1206_vm6 = vcmask 1043456  }
 0x11e   : > { %723 = vst.msk [vmem:[#allocation2 + $0x30] sm:$0xff] %vm383_vm7, %v721_v15 }
 0x123   : > { %v777_v19 = vpop.permute.xlu0 %776  ;;  %v728_v20 = vpop.permute.xlu1 %727 }
 0x124   : > { %779 = vst.msk [vmem:[#allocation2 + $0x38] sm:$0xff] %vm383_vm7, %v777_v19  ;;  %vm1226_vm7 = vcmask 130048  }
 0x125   : > { %730 = vst.msk [vmem:[#allocation2 + $0x30] sm:$0xff] %vm391_vm8, %v728_v20 }
 0x126   : > { %786 = vst.msk [vmem:[#allocation2 + $0x38] sm:$0xff] %vm391_vm8, %v784_v18  ;;  %vm1234_vm8 = vcmask 125952  }
 0x127   : > { %1229 = vst.msk [vmem:[#allocation7 + $0x10] sm:$0xff] %vm1226_vm7, %v2207_v33 }
 0x128   : > { %1230 = vst.msk [vmem:[#allocation7 + $0x18] sm:$0xff] %vm1226_vm7, %v2207_v33 }
 0x129   : > { %1227 = vst.msk [vmem:[#allocation7] sm:$0xff] %vm1226_vm7, %v2207_v33 }
 0x12a   : > { %1228 = vst.msk [vmem:[#allocation7 + $0x8] sm:$0xff] %vm1226_vm7, %v2207_v33 }
 0x12b   : > { %v735_v24 = vpop.permute.xlu0 %734  ;;  %v791_v25 = vpop.permute.xlu1 %790  ;;  %1231 = vst.msk [vmem:[#allocation7 + $0x20] sm:$0xff] %vm1226_vm7, %v2207_v33 }
 0x12c   : > { %737 = vst.msk [vmem:[#allocation2 + $0x30] sm:$0xff] %vm399_vm9, %v735_v24 }
 0x12d   : > { %793 = vst.msk [vmem:[#allocation2 + $0x38] sm:$0xff] %vm399_vm9, %v791_v25  ;;  %vm1236_vm9 = vcmask 130052  }
 0x12e   : > { %744 = vst.msk [vmem:[#allocation2 + $0x30] sm:$0xff] %vm407_vm10, %v742_v23 }
 0x12f   : > { %1232 = vst.msk [vmem:[#allocation7 + $0x28] sm:$0xff] %vm1226_vm7, %v2207_v33 }
 0x130   : > { %1241 = vst.msk [vmem:[#allocation4 + $0x8] sm:$0xff] %vm1226_vm7, %v2207_v33 }
 0x133   : > { %v798_v26 = vpop.permute.xlu0 %797  ;;  %v932_v8 = vpop.permute.xlu1 %931 }
 0x134   : > { %800 = vst.msk [vmem:[#allocation2 + $0x38] sm:$0xff] %vm407_vm10, %v798_v26  ;;  %vm1244_vm10 = vcmask 123904  }
 0x135   : > { %v807_v28 = vld [vmem:[#allocation2 + $0x30] sm:$0xff]  ;;  %935 = vst.msk [vmem:[#allocation3] sm:$0xf] %vm934_vm14, %v932_v8  ;;  %v2131_v8 = vld [vmem:[%s2879_s4] ss:$0 sm:$0xff] }
 0x136   : > { %943 = vst.msk [vmem:[#allocation3] sm:$0xf] %vm942_vm15, %v940_v6  ;;  %v1255_v6 = vld [vmem:[#allocation7 + $0x9] ss:$2 sm:$0x3] }
 0x13b   : > { %v808_v29 = vld [vmem:[#allocation2 + $0x38] sm:$0xff] }
 0x13c   : > { %v862_v30 = vpop.f32.mrf.mxu0  ;;  %v812_v31 = vpack.c.bf16 %v808_v29, %v807_v28 }
 0x13d   : > { %v863_v32 = vadd.f32 %v2600_v27, %v862_v30 }
 0x13e   : > { %1909 = vmatmul.msk.bf16.gmra.mxu0 %vm332_vm0, %v812_v31  ;;  %vm950_vm0 = vcmask 257216  }
 0x13f   : > { %v882_v34 = vmax.f32 %v863_v32, 0.0 }
 0x141   : > { %913 = vst.msk [vmem:[#allocation6 + $0x20] sm:$0xff] %vm890_vm11, %v882_v34 }
 0x144   : > { %v864_v35 = vpop.f32.mrf.mxu0 }
 0x145   : > { %v865_v36 = vadd.f32 %v2600_v27, %v864_v35 }
 0x147   : > { %v883_v37 = vmax.f32 %v865_v36, 0.0 }
 0x148   : > { %v961_v38 = vld [vmem:[#allocation6 + $0x21] ss:$2 sm:$0xf]  ;;  %v953_v39 = vld [vmem:[#allocation6 + $0x20] ss:$2 sm:$0xf] }
 0x149   : > { %914 = vst.msk [vmem:[#allocation6 + $0x30] sm:$0xff] %vm890_vm11, %v883_v37  ;;  %963 = vrot.lane.b32.xlu2 %v961_v38, %s2208_s14  ;;  %955 = vrot.lane.b32.xlu1 %v953_v39, %s2891_s27  ;;  %v945_v40 = vld [vmem:[#allocation6 + $0x1f] ss:$2 sm:$0xf] }
 0x14a   : > { %947 = vrot.lane.b32.xlu0 %v945_v40, %s2204_s16 }
 0x150   : > { %v994_v41 = vld [vmem:[#allocation6 + $0x30] ss:$2 sm:$0xf]  ;;  %v1000_v43 = vld [vmem:[#allocation6 + $0x31] ss:$2 sm:$0xf] }
 0x151   : > { %v977_v42 = vld [vmem:[#allocation6 + $0x30] ss:$2 sm:$0xf]  ;;  %996 = vrot.lane.b32.xlu2 %v994_v41, %s2199_s26  ;;  %v992_v44 = vld [vmem:[#allocation6 + $0x2f] ss:$2 sm:$0xf] }
 0x152   : > { %979 = vrot.lane.b32.xlu1 %v977_v42, %s2209_s17  ;;  %1002 = vrot.lane.b32.xlu0 %v1000_v43, %s2202_s29  ;;  %993 = vst.msk [vmem:[#allocation3 + $0x4] sm:$0xf] %vm926_vm13, %v992_v44  ;;  %v985_v45 = vld [vmem:[#allocation6 + $0x31] ss:$2 sm:$0xf] }
 0x153   : > { %v969_v46 = vld [vmem:[#allocation6 + $0x2f] ss:$2 sm:$0xf] }
 0x159   : > { %987 = vrot.lane.b32.xlu2 %v985_v45, %s2210_s21 }
 0x15a   : > { %971 = vrot.lane.b32.xlu0 %v969_v46, %s2211_s24 }
 0x164   : > { %v867_v47 = vpop.f32.mrf.mxu0 }
 0x165   : > { %v868_v48 = vadd.f32 %v2600_v27, %v867_v47 }
 0x167   : > { %v884_v49 = vmax.f32 %v868_v48, 0.0 }
 0x169   : > { %915 = vst.msk [vmem:[#allocation6 + $0x40] sm:$0xff] %vm890_vm11, %v884_v49 }
 0x16c   : > { %v869_v50 = vpop.f32.mrf.mxu0 }
 0x16d   : > { %v870_v51 = vadd.f32 %v2600_v27, %v869_v50 }
 0x16f   : > { %v885_v52 = vmax.f32 %v870_v51, 0.0  ;;  %v1171_v51 = vld [vmem:[%s2878_s3 + $0x20] sm:$0xf] }
 0x170   : > { %v1014_v53 = vld [vmem:[#allocation6 + $0x40] ss:$2 sm:$0xf]  ;;  %v1007_v54 = vld [vmem:[#allocation6 + $0x3f] ss:$2 sm:$0xf] }
 0x171   : > { %916 = vst.msk [vmem:[#allocation6 + $0x50] sm:$0xff] %vm890_vm11, %v885_v52  ;;  %1016 = vrot.lane.b32.xlu2 %v1014_v53, %s2891_s27  ;;  %1009 = vrot.lane.b32.xlu1 %v1007_v54, %s2204_s16  ;;  %v1021_v55 = vld [vmem:[#allocation6 + $0x41] ss:$2 sm:$0xf]  ;;  %v1193_v52 = vunpack.c.l.b16 %v1171_v51 }
 0x172   : > { %1023 = vrot.lane.b32.xlu0 %v1021_v55, %s2208_s14  ;;  %v2046_v55 = vld [vmem:[%s2878_s3 + $0x18] sm:$0xff] }
 0x173   : > { %v1198_v53 = vpack.c.b16 %v1193_v52, %v1193_v52 }
 0x175   : > { %v1208_v54 = vsel %vm1206_vm6, %v1198_v53, 0  ;;  %v2048_v53 = vld [vmem:[%s2880_s5 + $0x8] sm:$0xff]  ;;  %vm1300_vm6 = vcmask 1042304  }
 0x176   : > { %1213 = vmatpush.bf16.msra.mxu1 %v1208_v54 }
 0x178   : > { %v1035_v56 = vld [vmem:[#allocation6 + $0x50] ss:$2 sm:$0xf]  ;;  %v1056_v57 = vld [vmem:[#allocation6 + $0x51] ss:$2 sm:$0xf] }
 0x179   : > { %1037 = vrot.lane.b32.xlu2 %v1035_v56, %s2209_s17  ;;  %1058 = vrot.lane.b32.xlu1 %v1056_v57, %s2202_s29  ;;  %v1050_v58 = vld [vmem:[#allocation6 + $0x50] ss:$2 sm:$0xf]  ;;  %v1048_v59 = vld [vmem:[#allocation6 + $0x4f] ss:$2 sm:$0xf] }
 0x17a   : > { %1052 = vrot.lane.b32.xlu0 %v1050_v58, %s2199_s26  ;;  %1049 = vst.msk [vmem:[#allocation3 + $0x8] sm:$0xf] %vm926_vm13, %v1048_v59  ;;  %v1028_v60 = vld [vmem:[#allocation6 + $0x4f] ss:$2 sm:$0xf]  ;;  %1214 = vmatpush.bf16.msra.mxu1 %v2046_v55  ;;  %v2045_v56 = vld [vmem:[%s2878_s3 + $0x10] sm:$0xff] }
 0x17b   : > { %v1042_v36 = vld [vmem:[#allocation6 + $0x51] ss:$2 sm:$0xf]  ;;  %v2043_v58 = vld [vmem:[%s2878_s3] sm:$0xff] }
 0x17c   : > { %v2044_v57 = vld [vmem:[%s2878_s3 + $0x8] sm:$0xff]  ;;  %v2047_v55 = vld [vmem:[%s2880_s5] sm:$0xff] }
 0x17e   : > { %1215 = vmatpush.bf16.msra.mxu1 %v2045_v56 }
 0x181   : > { %1030 = vrot.lane.b32.xlu1 %v1028_v60, %s2211_s24 }
 0x182   : > { %1216 = vmatpush.bf16.msra.mxu1 %v2044_v57 }
 0x186   : > { %1217 = vmatpush.bf16.msra.mxu1 %v2043_v58  ;;  %v2134_v58 = vld [vmem:[#allocation5] sm:$0xff] }
 0x18d   : > { %v872_v62 = vpop.f32.mrf.mxu0 }
 0x18e   : > { %v873_v63 = vadd.f32 %v2600_v27, %v872_v62 }
 0x190   : > { %v886_v0 = vmax.f32 %v873_v63, 0.0 }
 0x192   : > { %917 = vst.msk [vmem:[#allocation6 + $0x60] sm:$0xff] %vm890_vm11, %v886_v0 }
 0x195   : > { %v874_v1 = vpop.f32.mrf.mxu0 }
 0x196   : > { %v875_v2 = vadd.f32 %v2600_v27, %v874_v1 }
 0x198   : > { %v887_v3 = vmax.f32 %v875_v2, 0.0 }
 0x199   : > { %v1063_v4 = vld [vmem:[#allocation6 + $0x5f] ss:$2 sm:$0xf]  ;;  %v1070_v7 = vld [vmem:[#allocation6 + $0x60] ss:$2 sm:$0xf] }
 0x19a   : > { %v1077_v5 = vld [vmem:[#allocation6 + $0x61] ss:$2 sm:$0xf]  ;;  %918 = vst.msk [vmem:[#allocation6 + $0x70] sm:$0xff] %vm890_vm11, %v887_v3  ;;  %1065 = vrot.lane.b32.xlu2 %v1063_v4, %s2204_s16  ;;  %1072 = vrot.lane.b32.xlu0 %v1070_v7, %s2891_s27 }
 0x19b   : > { %1079 = vrot.lane.b32.xlu1 %v1077_v5, %s2208_s14  ;;  %v1247_v7 = vld [vmem:[#allocation7 + $0x8] ss:$2 sm:$0x3] }
 0x1a1   : > { %v1112_v9 = vld [vmem:[#allocation6 + $0x71] ss:$2 sm:$0xf]  ;;  %v1106_v10 = vld [vmem:[#allocation6 + $0x70] ss:$2 sm:$0xf] }
 0x1a2   : > { %1114 = vrot.lane.b32.xlu2 %v1112_v9, %s2202_s29  ;;  %v1091_v11 = vld [vmem:[#allocation6 + $0x70] ss:$2 sm:$0xf]  ;;  %v1104_v13 = vld [vmem:[#allocation6 + $0x6f] ss:$2 sm:$0xf] }
 0x1a3   : > { %1108 = vrot.lane.b32.xlu1 %v1106_v10, %s2199_s26  ;;  %1093 = vrot.lane.b32.xlu0 %v1091_v11, %s2209_s17  ;;  %v964_v12 = vpop.permute.xlu2 %963  ;;  %1105 = vst.msk [vmem:[#allocation3 + $0xc] sm:$0xf] %vm926_vm13, %v1104_v13  ;;  %v1084_v14 = vld [vmem:[#allocation6 + $0x6f] ss:$2 sm:$0xf]  ;;  %s2214_s26 = smov 112  }
 0x1a4   : > { %v1098_v35 = vld [vmem:[#allocation6 + $0x71] ss:$2 sm:$0xf]  ;;  %v2055_v9 = vld [vmem:[%s2880_s5 + $0x40] sm:$0xff]  ;;  %vm1260_vm13 = vcmask 386304  }
 0x1a5   : > { %1481 = vmatpush.bf16.msra.mxu3 %v2055_v9 }
 0x1aa   : > { %1086 = vrot.lane.b32.xlu2 %v1084_v14, %s2211_s24 }
 0x1ab   : > { %v997_v15 = vpop.permute.xlu2 %996 }
 0x1ac   : > { %999 = vst.msk [vmem:[#allocation3 + $0x4] sm:$0xf] %vm934_vm14, %v997_v15 }
 0x1bb   : > { %v956_v16 = vpop.permute.xlu1 %955  ;;  %v877_v17 = vpop.f32.mrf.mxu0 }
 0x1bc   : > { %v948_v18 = vpop.permute.xlu0 %947  ;;  %v878_v19 = vadd.f32 %v2600_v27, %v877_v17 }
 0x1bd   : > { %951 = vst.msk [vmem:[#allocation3] sm:$0xf] %vm950_vm0, %v948_v18 }
 0x1be   : > { %959 = vst.msk [vmem:[#allocation3] sm:$0xf] %vm958_vm1, %v956_v16  ;;  %v888_v20 = vmax.f32 %v878_v19, 0.0 }
 0x1bf   : > { %967 = vst.msk [vmem:[#allocation3] sm:$0xf] %vm966_vm2, %v964_v12 }
 0x1c0   : > { %919 = vst.msk [vmem:[#allocation6 + $0x80] sm:$0xff] %vm890_vm11, %v888_v20 }
 0x1c3   : > { %v879_v21 = vpop.f32.mrf.mxu0 }
 0x1c4   : > { %v1003_v22 = vpop.permute.xlu0 %1002  ;;  %v880_v23 = vadd.f32 %v2600_v27, %v879_v21  ;;  %v980_v30 = vpop.permute.xlu1 %979 }
 0x1c5   : > { %1005 = vst.msk [vmem:[#allocation3 + $0x4] sm:$0xf] %vm942_vm15, %v1003_v22  ;;  %v988_v27 = vpop.permute.xlu2 %987 }
 0x1c6   : > { %v889_v24 = vmax.f32 %v880_v23, 0.0 }
 0x1c7   : > { %v1133_v25 = vld [vmem:[#allocation6 + $0x81] ss:$2 sm:$0xf]  ;;  %v1126_v26 = vld [vmem:[#allocation6 + $0x80] ss:$2 sm:$0xf] }
 0x1c8   : > { %920 = vst.msk [vmem:[#allocation6 + $0x90] sm:$0xff] %vm890_vm11, %v889_v24  ;;  %1135 = vrot.lane.b32.xlu2 %v1133_v25, %s2208_s14  ;;  %1128 = vrot.lane.b32.xlu1 %v1126_v26, %s2891_s27  ;;  %v1119_v28 = vld [vmem:[#allocation6 + $0x7f] ss:$2 sm:$0xf]  ;;  %s2212_s14 = smov 80   ;;  %vm1309_vm11 = vcmask 125954  }
 0x1c9   : > { %1121 = vrot.lane.b32.xlu0 %v1119_v28, %s2204_s16 }
 0x1cc   : > { %v972_v29 = vpop.permute.xlu0 %971 }
 0x1cd   : > { %975 = vst.msk [vmem:[#allocation3] sm:$0xf] %vm974_vm3, %v972_v29  ;;  %v1017_v37 = vpop.permute.xlu2 %1016 }
 0x1ce   : > { %983 = vst.msk [vmem:[#allocation3] sm:$0xf] %vm982_vm4, %v980_v30 }
 0x1cf   : > { %v1154_v31 = vld [vmem:[#allocation6 + $0x91] ss:$2 sm:$0xf]  ;;  %v1147_v32 = vld [vmem:[#allocation6 + $0x90] ss:$2 sm:$0xf] }
 0x1d0   : > { %1156 = vrot.lane.b32.xlu2 %v1154_v31, %s2210_s21  ;;  %1149 = vrot.lane.b32.xlu1 %v1147_v32, %s2209_s17  ;;  %v1140_v34 = vld [vmem:[#allocation6 + $0x8f] ss:$2 sm:$0xf]  ;;  %991 = vst.msk [vmem:[#allocation3] sm:$0xf] %vm990_vm5, %v988_v27  ;;  %s2887_s17 = smov 96  }
 0x1d1   : > { %1142 = vrot.lane.b32.xlu0 %v1140_v34, %s2211_s24 }
 0x1d5   : > { %v1038_v42 = vpop.permute.xlu2 %1037 }
 0x1d8   : > { %1100 = vrot.lane.b32.xlu1 %v1098_v35, %s2210_s21  ;;  %1257 = vrot.lane.b32.xlu2 %v1255_v6, %s2891_s27 }
 0x1d9   : > { %1044 = vrot.lane.b32.xlu0 %v1042_v36, %s2210_s21 }
 0x1e1   : > { %1249 = vrot.lane.b32.xlu0 %v1247_v7, %s2202_s29 }
 0x1e3   : > { %v1010_v38 = vpop.permute.xlu1 %1009 }
 0x1e4   : > { %1012 = vst.msk [vmem:[#allocation3 + $0x4] sm:$0xf] %vm950_vm0, %v1010_v38  ;;  %v1024_v39 = vpop.permute.xlu0 %1023 }
 0x1e5   : > { %1019 = vst.msk [vmem:[#allocation3 + $0x4] sm:$0xf] %vm958_vm1, %v1017_v37 }
 0x1e6   : > { %1026 = vst.msk [vmem:[#allocation3 + $0x4] sm:$0xf] %vm966_vm2, %v1024_v39 }
 0x1eb   : > { %v1059_v40 = vpop.permute.xlu1 %1058 }
 0x1ec   : > { %v1053_v41 = vpop.permute.xlu0 %1052 }
 0x1ed   : > { %1055 = vst.msk [vmem:[#allocation3 + $0x8] sm:$0xf] %vm934_vm14, %v1053_v41 }
 0x1ee   : > { %1061 = vst.msk [vmem:[#allocation3 + $0x8] sm:$0xf] %vm942_vm15, %v1059_v40 }
 0x1f3   : > { %v1031_v43 = vpop.permute.xlu1 %1030 }
 0x1f4   : > { %1033 = vst.msk [vmem:[#allocation3 + $0x4] sm:$0xf] %vm974_vm3, %v1031_v43  ;;  %v1066_v44 = vpop.permute.xlu2 %1065 }
 0x1f5   : > { %1040 = vst.msk [vmem:[#allocation3 + $0x4] sm:$0xf] %vm982_vm4, %v1038_v42  ;;  %v1243_v42 = vld [vmem:[#allocation7 + $0x7] ss:$2 sm:$0x3] }
 0x1f6   : > { %1068 = vst.msk [vmem:[#allocation3 + $0x8] sm:$0xf] %vm950_vm0, %v1066_v44 }
 0x1f7   : > { %1245 = vst.msk [vmem:[#allocation4] sm:$0x3] %vm1244_vm10, %v1243_v42  ;;  %v2067_v42 = vld [vmem:[%s2882_s7 + $0x58] sm:$0xff] }
 0x1fc   : > { %v1115_v45 = vpop.permute.xlu2 %1114 }
 0x204   : > { %v1087_v48 = vpop.permute.xlu2 %1086 }
 0x20c   : > { %v1073_v47 = vpop.permute.xlu0 %1072 }
 0x20d   : > { %v1080_v46 = vpop.permute.xlu1 %1079  ;;  %1075 = vst.msk [vmem:[#allocation3 + $0x8] sm:$0xf] %vm958_vm1, %v1073_v47  ;;  %v2052_v47 = vld [vmem:[%s2880_s5 + $0x28] sm:$0xff] }
 0x20e   : > { %1082 = vst.msk [vmem:[#allocation3 + $0x8] sm:$0xf] %vm966_vm2, %v1080_v46  ;;  %v2053_v46 = vld [vmem:[%s2880_s5 + $0x30] sm:$0xff] }
 0x20f   : > { %1089 = vst.msk [vmem:[#allocation3 + $0x8] sm:$0xf] %vm974_vm3, %v1087_v48  ;;  %v2051_v48 = vld [vmem:[%s2880_s5 + $0x20] sm:$0xff] }
 0x215   : > { %v1109_v49 = vpop.permute.xlu1 %1108  ;;  %v1094_v50 = vpop.permute.xlu0 %1093 }
 0x216   : > { %1111 = vst.msk [vmem:[#allocation3 + $0xc] sm:$0xf] %vm934_vm14, %v1109_v49  ;;  %v2050_v49 = vld [vmem:[%s2880_s5 + $0x18] sm:$0xff]  ;;  %vm1268_vm14 = vcmask 517504  }
 0x217   : > { %1117 = vst.msk [vmem:[#allocation3 + $0xc] sm:$0xf] %vm942_vm15, %v1115_v45  ;;  %v2054_v45 = vld [vmem:[%s2880_s5 + $0x38] sm:$0xff]  ;;  %vm1276_vm15 = vcmask 648704  }
 0x218   : > { %1096 = vst.msk [vmem:[#allocation3 + $0x8] sm:$0xf] %vm982_vm4, %v1094_v50  ;;  %1461 = vmatpush.bf16.msra.mxu2 %v2054_v45  ;;  %v2049_v50 = vld [vmem:[%s2880_s5 + $0x10] sm:$0xff]  ;;  %v2064_v45 = vld [vmem:[%s2882_s7 + $0x40] sm:$0xff] }
 0x21c   : > { %1462 = vmatpush.bf16.msra.mxu2 %v2053_v46 }
 0x220   : > { %1463 = vmatpush.bf16.msra.mxu2 %v2052_v47 }
 0x222   : > { %v1136_v60 = vpop.permute.xlu2 %1135 }
 0x224   : > { %1464 = vmatpush.bf16.msra.mxu2 %v2051_v48 }
 0x228   : > { %1465 = vmatpush.bf16.msra.mxu2 %v2050_v49 }
 0x22a   : > { %v1157_v0 = vpop.permute.xlu2 %1156 }
 0x22c   : > { %1466 = vmatpush.bf16.msra.mxu2 %v2049_v50 }
 0x230   : > { %1467 = vmatpush.bf16.msra.mxu2 %v2048_v53 }
 0x232   : > { %v1258_v44 = vpop.permute.xlu2 %1257 }
 0x234   : > { %1468 = vmatpush.bf16.msra.mxu2 %v2047_v55  ;;  %v2133_v55 = vld [vmem:[%s2883_s8] ss:$0 sm:$0xff] }
 0x23a   : > { %v1129_v59 = vpop.permute.xlu1 %1128 }
 0x23b   : > { %v1122_v61 = vpop.permute.xlu0 %1121 }
 0x23c   : > { %1124 = vst.msk [vmem:[#allocation3 + $0xc] sm:$0xf] %vm950_vm0, %v1122_v61  ;;  %vm1284_vm0 = vcmask 779904  }
 0x23d   : > { %1131 = vst.msk [vmem:[#allocation3 + $0xc] sm:$0xf] %vm958_vm1, %v1129_v59  ;;  %vm1292_vm1 = vcmask 911104  }
 0x23e   : > { %1138 = vst.msk [vmem:[#allocation3 + $0xc] sm:$0xf] %vm966_vm2, %v1136_v60  ;;  %vm1488_vm2 = vcmask 261120  }
 0x23f   : > { %1490 = vst.msk [vmem:[#allocation8 + $0x8] sm:$0xff] %vm1488_vm2, %v2134_v58 }
 0x240   : > { %1489 = vst.msk [vmem:[#allocation8] sm:$0xff] %vm1488_vm2, %v2134_v58 }
 0x241   : > { %1491 = vst.msk [vmem:[#allocation8 + $0x10] sm:$0xff] %vm1488_vm2, %v2134_v58 }
 0x242   : > { %v1150_v62 = vpop.permute.xlu1 %1149  ;;  %1492 = vst.msk [vmem:[#allocation8 + $0x18] sm:$0xff] %vm1488_vm2, %v2134_v58 }
 0x243   : > { %v1143_v63 = vpop.permute.xlu0 %1142  ;;  %1500 = vst.msk [vmem:[#allocation5 + $0x10] sm:$0xff] %vm1488_vm2, %v2134_v58 }
 0x244   : > { %1145 = vst.msk [vmem:[#allocation3 + $0xc] sm:$0xf] %vm974_vm3, %v1143_v63  ;;  %vm1317_vm3 = vcmask 257154  }
 0x245   : > { %1152 = vst.msk [vmem:[#allocation3 + $0xc] sm:$0xf] %vm982_vm4, %v1150_v62  ;;  %vm1325_vm4 = vcmask 388354  }
 0x246   : > { %1159 = vst.msk [vmem:[#allocation3 + $0xc] sm:$0xf] %vm990_vm5, %v1157_v0  ;;  %v1511_v62 = vld [vmem:[#allocation8 + $0x9] sm:$0x1]  ;;  %v1518_v63 = vld [vmem:[#allocation8 + $0xf] sm:$0x1] }
 0x248   : > { %v1533_v9 = vld [vmem:[#allocation8 + $0x17] sm:$0x1] }
 0x24a   : > { %v1101_v1 = vpop.permute.xlu1 %1100 }
 0x24b   : > { %1103 = vst.msk [vmem:[#allocation3 + $0x8] sm:$0xf] %vm990_vm5, %v1101_v1  ;;  %v1045_v2 = vpop.permute.xlu0 %1044 }
 0x24c   : > { %1047 = vst.msk [vmem:[#allocation3 + $0x4] sm:$0xf] %vm990_vm5, %v1045_v2  ;;  %vm1334_vm5 = vcmask 519554  }
 0x252   : > { %v1161_v3 = vld [vmem:[#allocation3 + $0x8] sm:$0xff] }
 0x253   : > { %v1160_v4 = vld [vmem:[#allocation3] sm:$0xff]  ;;  %v1250_v43 = vpop.permute.xlu0 %1249 }
 0x254   : > { %v1162_v5 = vpack.c.bf16 %v1161_v3, %v1160_v4 }
 0x256   : > { %1926 = vmatmul.msk.bf16.vlgmr.msra.gmra.mxu1 %vm921_vm12, %v1162_v5  ;;  %vm1252_vm12 = vcmask 255104  }
 0x257   : > { %1253 = vst.msk [vmem:[#allocation4] sm:$0x3] %vm1252_vm12, %v1250_v43  ;;  %vm1494_vm12 = vcmask 254976   ;;  %v2066_v43 = vld [vmem:[%s2882_s7 + $0x50] sm:$0xff] }
 0x258   : > { %1261 = vst.msk [vmem:[#allocation4] sm:$0x3] %vm1260_vm13, %v1258_v44  ;;  %vm1496_vm13 = vcmask 257026   ;;  %v2065_v44 = vld [vmem:[%s2882_s7 + $0x48] sm:$0xff] }
 0x2d3   : > { %v1219_v10 = vpop.f32.mrf.mxu1 }
 0x2d4   : > { %v1220_v11 = vadd.f32 %v2131_v8, %v1219_v10  ;;  %v2073_v10 = vld [vmem:[%s2882_s7 + $0x88] sm:$0xff] }
 0x2d5   : > { %1736 = vmatpush.bf16.msrb.mxu2 %v2073_v10 }
 0x2d6   : > { %v1224_v12 = vmax.f32 %v1220_v11, 0.0  ;;  %v2072_v11 = vld [vmem:[%s2882_s7 + $0x80] sm:$0xff] }
 0x2d8   : > { %1235 = vst.msk [vmem:[#allocation7 + $0x10] sm:$0xf] %vm1234_vm8, %v1224_v12 }
 0x2d9   : > { %1237 = vst.msk [vmem:[#allocation7 + $0x14] sm:$0xf0] %vm1236_vm9, %v1224_v12  ;;  %1737 = vmatpush.bf16.msrb.mxu2 %v2072_v11  ;;  %v2063_v12 = vld [vmem:[%s2882_s7 + $0x38] sm:$0xff] }
 0x2da   : > { %1704 = vmatpush.bf16.msrb.mxu3 %v2063_v12 }
 0x2db   : > { %v1221_v33 = vpop.f32.mrf.mxu1 }
 0x2dc   : > { %v1222_v13 = vadd.f32 %v2131_v8, %v1221_v33  ;;  %v1504_v8 = vld [vmem:[#allocation8 + $0x8] sm:$0x1]  ;;  %v1501_v33 = vld [vmem:[#allocation8 + $0x7] sm:$0x1] }
 0x2de   : > { %v1225_v14 = vmax.f32 %v1222_v13, 0.0  ;;  %v2062_v13 = vld [vmem:[%s2882_s7 + $0x30] sm:$0xff] }
 0x2df   : > { %v1279_v15 = vld [vmem:[#allocation7 + $0x11] ss:$2 sm:$0x3]  ;;  %v1271_v16 = vld [vmem:[#allocation7 + $0x10] ss:$2 sm:$0x3]  ;;  %1705 = vmatpush.bf16.msrb.mxu3 %v2062_v13 }
 0x2e0   : > { %v1303_v17 = vld [vmem:[#allocation7 + $0x19] ss:$2 sm:$0x3]  ;;  %1238 = vst.msk [vmem:[#allocation7 + $0x20] sm:$0xf] %vm1234_vm8, %v1225_v14  ;;  %1281 = vrot.lane.b32.xlu2 %v1279_v15, %s2212_s14  ;;  %1273 = vrot.lane.b32.xlu0 %v1271_v16, %s2210_s21  ;;  %vm1352_vm8 = vcmask 781954  }
 0x2e1   : > { %1239 = vst.msk [vmem:[#allocation7 + $0x24] sm:$0xf0] %vm1236_vm9, %v1225_v14  ;;  %v1263_v18 = vld [vmem:[#allocation7 + $0xf] ss:$2 sm:$0x3]  ;;  %vm1361_vm9 = vcmask 913154  }
 0x2e2   : > { %1265 = vrot.lane.b32.xlu1 %v1263_v18, %s2211_s24  ;;  %v1319_v19 = vld [vmem:[#allocation7 + $0x19] ss:$2 sm:$0x3]  ;;  %1304 = vst.msk [vmem:[#allocation4 + $0x8] sm:$0x3] %vm1244_vm10, %v1303_v17  ;;  %vm1370_vm10 = vcmask 1044354  }
 0x2e3   : > { %v1305_v20 = vld [vmem:[#allocation7 + $0x17] ss:$2 sm:$0x3]  ;;  %v1321_v21 = vrot.slane %v1319_v19, 6  ;;  %v2132_v14 = vld [vmem:[%s2881_s6] ss:$0 sm:$0xff] }
 0x2e4   : > { %v1307_v22 = vrot.slane %v1305_v20, 6  ;;  %v1287_v28 = vld [vmem:[#allocation7 + $0x17] ss:$2 sm:$0x3] }
 0x2e5   : > { %v1311_v30 = vld [vmem:[#allocation7 + $0x18] ss:$2 sm:$0x3] }
 0x2e6   : > { %1310 = vst.msk [vmem:[#allocation4] sm:$0xc] %vm1309_vm11, %v1307_v22  ;;  %v1313_v32 = vrot.slane %v1311_v30, 6  ;;  %v1295_v38 = vld [vmem:[#allocation7 + $0x18] ss:$2 sm:$0x3] }
 0x2e7   : > { %v1328_v23 = vld [vmem:[#allocation7 + $0x1f] ss:$2 sm:$0x3]  ;;  %v1337_v37 = vld [vmem:[#allocation7 + $0x20] ss:$2 sm:$0x3] }
 0x2e8   : > { %v1373_v24 = vld [vmem:[#allocation7 + $0x29] ss:$2 sm:$0x3]  ;;  %1322 = vrot.lane.b32.xlu0 %v1321_v21, %s2891_s27  ;;  %v1330_v25 = vrot.slane %v1328_v23, 6  ;;  %v1339_v39 = vrot.slane %v1337_v37, 6  ;;  %v2059_v30 = vld [vmem:[%s2882_s7 + $0x18] sm:$0xff] }
 0x2e9   : > { %v1375_v26 = vrot.slane %v1373_v24, 6  ;;  %v1346_v29 = vld [vmem:[#allocation7 + $0x21] ss:$2 sm:$0x3] }
 0x2ea   : > { %1289 = vrot.lane.b32.xlu1 %v1287_v28, %s2887_s17  ;;  %1331 = vrot.lane.b32.xlu2 %v1330_v25, %s2211_s24  ;;  %v1355_v27 = vld [vmem:[#allocation7 + $0x27] ss:$2 sm:$0x3]  ;;  %v1348_v31 = vrot.slane %v1346_v29, 6  ;;  %v2060_v28 = vld [vmem:[%s2882_s7 + $0x20] sm:$0xff]  ;;  %s323_s24 = sand.u32 1, %s2189_s10  }
 0x2eb   : > { %1377 = vst.msk [vmem:[#allocation4 + $0x8] sm:$0xc] %vm1309_vm11, %v1375_v26  ;;  %v1357_v34 = vrot.slane %v1355_v27, 6  ;;  %v1364_v40 = vld [vmem:[#allocation7 + $0x28] ss:$2 sm:$0x3] }
 0x2ec   : > { %v1366_v41 = vrot.slane %v1364_v40, 6  ;;  %vm1502_vm11 = vcmask 253952   ;;  %v2061_v26 = vld [vmem:[%s2882_s7 + $0x28] sm:$0xff]  ;;  %v2071_v27 = vld [vmem:[%s2882_s7 + $0x78] sm:$0xff]  ;;  %s1824_s16 = sshll.u32 %s323_s24, 3 }
 0x2ed   : > { %1503 = vst.msk [vmem:[#allocation5] sm:$0x1] %vm1502_vm11, %v1501_v33  ;;  %1706 = vmatpush.bf16.msrb.mxu3 %v2061_v26  ;;  %1717 = vmatpush.bf16.msrb.mxu1 %v2071_v27  ;;  %v2069_v37 = vld [vmem:[%s2882_s7 + $0x68] sm:$0xff]  ;;  %s325_s28 = scalar_lea.vmem [#allocation9], %s1824_s16  ;;  %s2155_s16 = scalar_lea.hbm %s2884_s9, 16 }
 0x2f0   : > { %1349 = vrot.lane.b32.xlu0 %v1348_v31, %s2212_s14  ;;  %s1758_s14 = sshll.u32 %s325_s28, 4  ;;  %s1759_s14 = int_to_ptr.vmem [resolvable:$true] %s1758_s14 }
 0x2f1   : > { %1707 = vmatpush.bf16.msrb.mxu3 %v2060_v28 }
 0x2f2   : > { %1314 = vrot.lane.b32.xlu1 %v1313_v32, %s2202_s29  ;;  %1358 = vrot.lane.b32.xlu2 %v1357_v34, %s2887_s17  ;;  %v1379_v35 = vld [vmem:[#allocation4 + $0x8] sm:$0xff]  ;;  %v2058_v34 = vld [vmem:[%s2882_s7 + $0x10] sm:$0xff]  ;;  %s1746_s29 = scalar_lea.sflag [#allocation10], %s323_s24 }
 0x2f3   : > { %v1381_v36 = vpack.c.bf16 %v1379_v35, %v1379_v35  ;;  %v2070_v35 = vld [vmem:[%s2882_s7 + $0x70] sm:$0xff] }
 0x2f4   : > { %1718 = vmatpush.bf16.msrb.mxu1 %v2070_v35 }
 0x2f5   : > { %1963 = vmatmul.msk.bf16.vlgmr.msra.gmra.mxu3 %vm1226_vm7, %v1381_v36  ;;  %vm1343_vm7 = vcmask 650754   ;;  %v2057_v36 = vld [vmem:[%s2882_s7 + $0x8] sm:$0xff] }
 0x2f6   : > { %1708 = vmatpush.bf16.msrb.mxu3 %v2059_v30 }
 0x2f8   : > { %1297 = vrot.lane.b32.xlu0 %v1295_v38, %s2214_s26  ;;  %1719 = vmatpush.bf16.msrb.mxu1 %v2069_v37  ;;  %v2056_v38 = vld [vmem:[%s2882_s7] sm:$0xff] }
 0x2fa   : > { %1340 = vrot.lane.b32.xlu1 %v1339_v39, %s2210_s21  ;;  %1506 = vrot.lane.b32.xlu2 %v1504_v8, %s2891_s27  ;;  %v2068_v39 = vld [vmem:[%s2882_s7 + $0x60] sm:$0xff] }
 0x2fb   : > { %1709 = vmatpush.bf16.msrb.mxu3 %v2058_v34 }
 0x2fc   : > { %1720 = vmatpush.bf16.msrb.mxu1 %v2068_v39 }
 0x2ff   : > { %1710 = vmatpush.bf16.msrb.mxu3 %v2057_v36 }
 0x300   : > { %1513 = vrot.lane.b32.xlu0 %v1511_v62, %s2210_s21  ;;  %1721 = vmatpush.bf16.msrb.mxu1 %v2067_v42 }
 0x302   : > { %1367 = vrot.lane.b32.xlu1 %v1366_v41, %s2214_s26 }
 0x303   : > { %1711 = vmatpush.bf16.msrb.mxu3 %v2056_v38 }
 0x304   : > { %1722 = vmatpush.bf16.msrb.mxu1 %v2066_v43 }
 0x308   : > { %1535 = vrot.lane.b32.xlu0 %v1533_v9, %s2210_s21  ;;  %1723 = vmatpush.bf16.msrb.mxu1 %v2065_v44  ;;  %s2038_s21 = sshll.u32 %s2286_s13, 3 }
 0x309   : > { %s1756_s23 = scalar_lea.hbm %s2884_s9, %s2038_s21 }
 0x30a   : > { %1520 = vrot.lane.b32.xlu1 %v1518_v63, %s2892_s25  ;;  %s1760_s26 = sshll.u32 %s1756_s23, 4  ;;  %s1761_s26 = int_to_ptr.hbm [resolvable:$true] %s1760_s26 }
 0x30c   : > { %1724 = vmatpush.bf16.msrb.mxu1 %v2064_v45 }
 0x33a   : > { %v1282_v54 = vpop.permute.xlu2 %1281 }
 0x344   : > { %v1332_v60 = vpop.permute.xlu2 %1331 }
 0x34c   : > { %v1359_v2 = vpop.permute.xlu2 %1358 }
 0x352   : > { %v1274_v51 = vpop.permute.xlu0 %1273 }
 0x354   : > { %v1266_v52 = vpop.permute.xlu1 %1265  ;;  %v1507_v29 = vpop.permute.xlu2 %1506 }
 0x355   : > { %1269 = vst.msk [vmem:[#allocation4] sm:$0x3] %vm1268_vm14, %v1266_v52  ;;  %vm1509_vm14 = vcmask 516352  }
 0x356   : > { %1277 = vst.msk [vmem:[#allocation4] sm:$0x3] %vm1276_vm15, %v1274_v51  ;;  %vm1516_vm15 = vcmask 778752  }
 0x357   : > { %1285 = vst.msk [vmem:[#allocation4] sm:$0x3] %vm1284_vm0, %v1282_v54  ;;  %vm1523_vm0 = vcmask 1041152  }
 0x358   : > { %1510 = vst.msk [vmem:[#allocation5] sm:$0x1] %vm1509_vm14, %v1507_v29 }
 0x35a   : > { %v1323_v56 = vpop.permute.xlu0 %1322 }
 0x35c   : > { %v1290_v57 = vpop.permute.xlu1 %1289 }
 0x35d   : > { %1293 = vst.msk [vmem:[#allocation4] sm:$0x3] %vm1292_vm1, %v1290_v57 }
 0x362   : > { %v1350_v59 = vpop.permute.xlu0 %1349 }
 0x364   : > { %v1315_v61 = vpop.permute.xlu1 %1314 }
 0x365   : > { %1318 = vst.msk [vmem:[#allocation4] sm:$0xc] %vm1317_vm3, %v1315_v61 }
 0x366   : > { %1326 = vst.msk [vmem:[#allocation4] sm:$0xc] %vm1325_vm4, %v1323_v56 }
 0x367   : > { %1335 = vst.msk [vmem:[#allocation4] sm:$0xc] %vm1334_vm5, %v1332_v60 }
 0x36a   : > { %v1298_v0 = vpop.permute.xlu0 %1297 }
 0x36b   : > { %1301 = vst.msk [vmem:[#allocation4] sm:$0x3] %vm1300_vm6, %v1298_v0 }
 0x36c   : > { %v1341_v1 = vpop.permute.xlu1 %1340 }
 0x36d   : > { %1344 = vst.msk [vmem:[#allocation4] sm:$0xc] %vm1343_vm7, %v1341_v1 }
 0x36e   : > { %1353 = vst.msk [vmem:[#allocation4] sm:$0xc] %vm1352_vm8, %v1350_v59 }
 0x36f   : > { %1362 = vst.msk [vmem:[#allocation4] sm:$0xc] %vm1361_vm9, %v1359_v2 }
 0x372   : > { %v1514_v31 = vpop.permute.xlu0 %1513 }
 0x373   : > { %1517 = vst.msk [vmem:[#allocation5] sm:$0x1] %vm1516_vm15, %v1514_v31 }
 0x374   : > { %v1368_v3 = vpop.permute.xlu1 %1367 }
 0x375   : > { %1371 = vst.msk [vmem:[#allocation4] sm:$0xc] %vm1370_vm10, %v1368_v3 }
 0x378   : > { %v1483_v4 = vpop.f32.mrf.mxu3 }
 0x37a   : > { %v1536_v46 = vpop.permute.xlu0 %1535 }
 0x37c   : > { %v1378_v5 = vld [vmem:[#allocation4] sm:$0xff]  ;;  %v1521_v32 = vpop.permute.xlu1 %1520 }
 0x37d   : > { %v1380_v6 = vpack.c.bf16 %v1378_v5, %v1378_v5  ;;  %1524 = vst.msk [vmem:[#allocation5] sm:$0x1] %vm1523_vm0, %v1521_v32 }
 0x37f   : > { %1469 = vmatmul.bf16.vlgmr.msra.gmra.mxu2 %v1380_v6 }
 0x380   : > { %v1485_v7 = vpop.f32.mrf.mxu3 }
 0x384   : > { %v1547_v40 = vld [vmem:[#allocation5] sm:$0xff] }
 0x385   : > { %v1550_v41 = vpack.c.bf16 %v1547_v40, %v1547_v40 }
 0x387   : > { %1712 = vmatmul.bf16.vlgmr.msrb.gmra.mxu3 %v1550_v41 }
 0x402   : > { %v1470_v15 = vpop.f32.mrf.mxu2 }
 0x403   : > { %v1471_v16 = vadd.f32 %v2132_v14, %v1470_v15 }
 0x405   : > { %v1484_v17 = vadd.f32 %v1483_v4, %v1471_v16 }
 0x407   : > { %v1487_v18 = vmax.f32 %v1484_v17, 0.0 }
 0x409   : > { %1495 = vst.msk [vmem:[#allocation8 + $0x10] sm:$0x3] %vm1494_vm12, %v1487_v18 }
 0x40a   : > { %1497 = vst.msk [vmem:[#allocation8 + $0x16] sm:$0xc] %vm1496_vm13, %v1487_v18  ;;  %v1472_v19 = vpop.f32.mrf.mxu2  ;;  %v1713_v53 = vpop.f32.mrf.mxu3 }
 0x40b   : > { %v1714_v56 = vadd.f32 %v2133_v55, %v1713_v53 }
 0x410   : > { %v1527_v20 = vld [vmem:[#allocation8 + $0x11] sm:$0x1]  ;;  %v1525_v21 = vld [vmem:[#allocation8 + $0x10] sm:$0x1] }
 0x411   : > { %v1545_v22 = vld [vmem:[#allocation8 + $0x19] sm:$0x1]  ;;  %v1539_v23 = vld [vmem:[#allocation8 + $0x18] sm:$0x1]  ;;  %1529 = vrot.lane.b32.xlu2 %v1527_v20, %s2891_s27  ;;  %1526 = vst.msk [vmem:[#allocation5 + $0x8] sm:$0x1] %vm1502_vm11, %v1525_v21 }
 0x412   : > { %1541 = vrot.lane.b32.xlu1 %v1539_v23, %s2892_s25  ;;  %1546 = vst.msk [vmem:[#allocation5 + $0x10] sm:$0x1] %vm1502_vm11, %v1545_v22  ;;  %v1715_v54 = vpop.f32.mrf.mxu3  ;;  %s2149_s27 = sshra.s32 %s1761_s26, 4  ;;  %s2150_s27 = int_to_ptr.hbm [resolvable:$true] %s2149_s27 }
 0x413   : > { %s2151_s13 = scalar_lea.hbm %s2150_s27, 8  ;;  %p2156_p0 = scmp.lt.s32.totalorder %s2150_s27, %s2884_s9 }
 0x414   : > { %p2152_p11 = scmp.ne.s32.totalorder %s2150_s27, %s2151_s13  ;;  %p2157_p1 = scmp.lt.s32.totalorder %s2155_s16, %s2151_s13 }
 0x416   : > { %p2153_p12 = pnand %p2152_p11, %p2303_p5  ;;  %p2158_p2 = por %p2157_p1, %p2156_p0 }
 0x418   : > { %p2154_p13 = pneg %p2153_p12 }
 0x419   : > { %v1549_v24 = vld [vmem:[#allocation5 + $0x10] sm:$0xff] }
 0x41a   : > { %v1552_v25 = vpack.c.bf16 %v1549_v24, %v1549_v24  ;;  %p2159_p3 = pnand %p2158_p2, %p2154_p13 }
 0x41c   : > { %2036 = vmatmul.msk.bf16.vlgmr.msrb.gmra.mxu2 %vm1488_vm2, %v1552_v25 }
 0x46b   : > { %v1530_v47 = vpop.permute.xlu2 %1529 }
 0x46c   : > { %1532 = vst.msk [vmem:[#allocation5 + $0x8] sm:$0x1] %vm1509_vm14, %v1530_v47 }
 0x46d   : > { %1538 = vst.msk [vmem:[#allocation5 + $0x8] sm:$0x1] %vm1516_vm15, %v1536_v46 }
 0x484   : > { %v1542_v48 = vpop.permute.xlu1 %1541 }
 0x485   : > { %1544 = vst.msk [vmem:[#allocation5 + $0x8] sm:$0x1] %vm1523_vm0, %v1542_v48 }
 0x48c   : > { %v1548_v49 = vld [vmem:[#allocation5 + $0x8] sm:$0xff] }
 0x48d   : > { %v1551_v50 = vpack.c.bf16 %v1548_v49, %v1548_v49 }
 0x48f   : > { %1725 = vmatmul.bf16.vlgmr.msrb.gmra.mxu1 %v1551_v50 }
 0x49f   : > { %v1739_v51 = vpop.f32.mrf.mxu2 }
 0x4a7   : > { %v1741_v52 = vpop.f32.mrf.mxu2 }
 0x50c   : > { %v1726_v57 = vpop.f32.mrf.mxu1 }
 0x50d   : > { %v1727_v58 = vadd.f32 %v1726_v57, %v1714_v56 }
 0x50f   : > { %v1740_v59 = vadd.f32 %v1739_v51, %v1727_v58 }
 0x511   : > { %v1743_v60 = vmax.f32 %v1740_v59, 0.0 }
 0x513   : > { %1744 = vst [vmem:[%s325_s28] sm:$0xff] %v1743_v60 }
 0x514   : > { %v1728_v61 = vpop.f32.mrf.mxu1 }
 0x515   : > { %2162 = shalt.err (!%p2159_p3)
}
 0x516   : > { %2075 = dma.vmem_to_hbm [thread:$0]  (%p2303_p5), %s1759_s14, 128, %s1761_s26, %s1746_s29  }
 0x517 PF: > { %p2081_p4 = scmp.ge.s32.totalorder %s2197_s12, 2  ;;  %s1772_s24 = sand.u32 1, %s2185_s30  }
 0x518   : > { %s1773_s23 = scalar_lea.sflag [#allocation10], %s1772_s24 }
 0x519   : > { %p2078_p7 = pnand %p2081_p4, %p2307_p6 }
 0x51b   : > { %p2079_p8 = pneg %p2078_p7 }
 0x51d   : > { %2180 = dma.done.wait (%p2079_p8), %s1773_s23, 128  }
 0x51e   : > { %2182 = vsyncadd (%p2079_p8), %s1773_s23, 4294967168  ;;  %p19_p9 = scmp.ge.s32.totalorder %s2290_s15, 4   ;;  %s2893_s30 = smov %s2189_s10 }
 0x51f   : > { %s2894_s10 = smov %s2193_s11  ;;  %s2895_s11 = smov %s2301_s18 }
 0x520   : > { %s2896_s12 = smov %s2290_s15  ;;  %21 = sbr.rel (!%p19_p9) target bundleno = 3 (0x3), region = 184 }
 0x525   :  { %1779 = vsyncpa [#allocation10], 1 }
 0x526   :  { %1781 = vsyncpa [#allocation10 + $0x1], 1 }

</bundles_post_ra>
